<compile_context>
chip_gen: v6e
topology: v6e:2x2x1
jax: 0.10.0
libtpu: 0.0.40
codegen_flags: <defaults>
</compile_context>

<pallas_src>
import functools

import jax
import jax.numpy as jnp
from jax.experimental import pallas as pl
from jax.experimental.pallas import tpu as pltpu


def _rcu_kernel(xm_ref, xt_ref, xb_ref, w_ref, b_ref, o_ref,
                win_ref, slab_ref, *, TH, W, C):
    """One (batch, row-tile) grid step.

    xm_ref  : (1, TH, W, C)   rows [h*TH, h*TH+TH) of x (unpadded)
    xt_ref  : (1, 1,  W, C)   row  h*TH-1 of x (index clamped; zeroed at h==0)
    xb_ref  : (1, 1,  W, C)   row  h*TH+TH of x (index clamped; zeroed at h==last)
    w_ref   : (9*C, C)        conv weights, taps folded into K (row = t*C + ci)
    b_ref   : (1, C)          conv bias (f32)
    o_ref   : (1, TH, W, C)   output tile
    win_ref : (TH+2, W+2, C)  scratch: zero-padded row window for this tile
    slab_ref: (TH*W, 9*C)     scratch: im2col slab
    """
    Wp = W + 2
    h = pl.program_id(1)
    last_h = pl.num_programs(1) - 1

    # ---- Assemble the zero-padded window (in-kernel "same" padding; no HBM
    # pad pass).  Left/right pad columns are re-zeroed every step: cheap
    # (2 columns) and megacore-safe (no reliance on "first grid step").
    win_ref[:, 0:1, :] = jnp.zeros((TH + 2, 1, C), dtype=win_ref.dtype)
    win_ref[:, Wp - 1:Wp, :] = jnp.zeros((TH + 2, 1, C), dtype=win_ref.dtype)

    win_ref[1:TH + 1, 1:W + 1, :] = xm_ref[0]

    # Halo rows: write the (clamped) neighbour rows, then zero them when the
    # tile touches the top / bottom image boundary.
    win_ref[0:1, 1:W + 1, :] = xt_ref[0]
    win_ref[TH + 1:TH + 2, 1:W + 1, :] = xb_ref[0]

    @pl.when(h == 0)
    def _():
        win_ref[0:1, 1:W + 1, :] = jnp.zeros((1, W, C), dtype=win_ref.dtype)

    @pl.when(h == last_h)
    def _():
        win_ref[TH + 1:TH + 2, 1:W + 1, :] = jnp.zeros((1, W, C),
                                                       dtype=win_ref.dtype)

    # ---- im2col: slab[r*W + c, (3*ky+kx)*C : +C] = win[r+ky, c+kx, :]
    for ky in range(3):
        rows = win_ref[ky:ky + TH]                    # (TH, Wp, C) leading-dim slice
        for kx in range(3):
            t = ky * 3 + kx
            patch = rows[:, kx:kx + W, :]             # (TH, W, C)
            slab_ref[:, t * C:(t + 1) * C] = patch.reshape(TH * W, C)

    # ---- Single big-K matmul on the MXU, f32 accumulation.  The slab ref is
    # read directly by the dot so the 9x-tile value does not have to stay live
    # into the epilogue.
    acc = jnp.dot(slab_ref[...], w_ref[...], preferred_element_type=jnp.float32)

    # ---- Fused epilogue: + bias + residual.  Residual is x itself, read from
    # the centre of the window scratch (not from the slab), ending the slab's
    # live range at the matmul.
    resid = win_ref[1:TH + 1, 1:W + 1, :].reshape(TH * W, C).astype(jnp.float32)
    out = acc + b_ref[...].astype(jnp.float32) + resid
    o_ref[0] = out.reshape(TH, W, C).astype(o_ref.dtype)


def _round_up(x, m):
    return (x + m - 1) // m * m


def _vmem_bytes_per_step(th, W, C, itemsize):
    """Per-grid-step VMEM footprint estimate (includes f32 temporaries)."""
    lanes = _round_up(C, 128)
    lanes9 = _round_up(9 * C, 128)
    w8 = _round_up(W, 8)
    wp8 = _round_up(W + 2, 8)
    m8 = _round_up(th * W, 8)

    in_main = 2 * th * w8 * lanes * itemsize          # double-buffered input tile
    halos = 2 * 2 * 1 * w8 * lanes * itemsize         # two 1-row halo blocks (x2 bufs)
    out_blk = 2 * th * w8 * lanes * itemsize          # double-buffered output tile
    win = (th + 2) * wp8 * lanes * itemsize           # padded window scratch
    slab = m8 * lanes9 * itemsize                     # im2col slab scratch
    f32_tmp = 3 * m8 * lanes * 4                      # acc, out, residual (f32)
    wgt = 2 * _round_up(9 * C, 8) * lanes * itemsize + 2 * 8 * lanes * 4
    return int(1.2 * (in_main + halos + out_blk + win + slab + f32_tmp + wgt))


def _pick_tile_rows(H, W, C, itemsize, budget_bytes, max_rows=None):
    """Largest divisor TH of H (<= max_rows) whose footprint fits the budget."""
    limit = H if max_rows is None else max(1, min(H, max_rows))
    best = 1
    for th in range(1, limit + 1):
        if H % th != 0:
            continue
        if _vmem_bytes_per_step(th, W, C, itemsize) <= budget_bytes:
            best = th
    return best


def _vmem_budgets():
    """Generation-aware (scoped VMEM limit, tile budget), in bytes."""
    cap = 64 * 2**20                                  # conservative default (v7x)
    try:
        info = pltpu.get_tpu_info()
        cap = int(getattr(info, "vmem_capacity_bytes", cap))
    except Exception:
        pass
    cap = max(cap, 32 * 2**20)
    # ~41 MiB scoped on v7x (64 MiB physical), ~83 MiB on v5e/v6e (128 MiB).
    limit = min(int(cap * 0.65), 100 * 2**20)
    budget = limit // 2
    return limit, budget


def residual_conv_unit_nhwc(x_nhwc, weight_oihw, bias, *, block_rows=None):
    """y = conv3x3_same(x) + bias + x, NHWC in / NHWC out."""
    N, H, W, C = x_nhwc.shape
    assert weight_oihw.shape == (C, C, 3, 3)
    dtype = x_nhwc.dtype
    Wp = W + 2

    vmem_limit, budget = _vmem_budgets()
    # With a single batch, keep >= 2 grid steps so both v7x TensorCores get
    # work under ("parallel", "parallel") grid semantics.
    max_rows = max(1, H // 2) if (N == 1 and H > 1) else None
    TH = block_rows if block_rows is not None else _pick_tile_rows(
        H, W, C, jnp.dtype(dtype).itemsize, budget, max_rows=max_rows)
    assert H % TH == 0
    nH = H // TH

    # (Cout, Cin, ky, kx) -> (ky, kx, Cin, Cout) -> (9*Cin, Cout): all 9 taps
    # folded into the contraction dim so the kernel runs one big-K matmul.
    w_flat = jnp.transpose(weight_oihw, (2, 3, 1, 0)).reshape(9 * C, C).astype(dtype)
    b2d = bias.reshape(1, C).astype(jnp.float32)

    kernel = functools.partial(_rcu_kernel, TH=TH, W=W, C=C)

    grid_spec = pltpu.PrefetchScalarGridSpec(
        num_scalar_prefetch=0,
        grid=(N, nH),
        in_specs=[
            # Main TH rows of this tile (unpadded x).
            pl.BlockSpec((1, TH, W, C), lambda n, h: (n, h, 0, 0)),
            # Top / bottom halo rows; indices clamped at the image edges (the
            # kernel zeroes them when the tile touches the boundary).
            pl.BlockSpec((1, 1, W, C),
                         lambda n, h: (n, jnp.maximum(h * TH - 1, 0), 0, 0)),
            pl.BlockSpec((1, 1, W, C),
                         lambda n, h: (n, jnp.minimum(h * TH + TH, H - 1), 0, 0)),
            pl.BlockSpec((9 * C, C), lambda n, h: (0, 0)),
            pl.BlockSpec((1, C), lambda n, h: (0, 0)),
        ],
        out_specs=pl.BlockSpec((1, TH, W, C), lambda n, h: (n, h, 0, 0)),
        scratch_shapes=[
            pltpu.VMEM((TH + 2, Wp, C), dtype),   # zero-padded row window
            pltpu.VMEM((TH * W, 9 * C), dtype),   # im2col slab
        ],
    )

    return pl.pallas_call(
        kernel,
        out_shape=jax.ShapeDtypeStruct((N, H, W, C), dtype),
        grid_spec=grid_spec,
        compiler_params=pltpu.CompilerParams(
            dimension_semantics=("parallel", "parallel"),
            vmem_limit_bytes=vmem_limit,
        ),
    )(x_nhwc, x_nhwc, x_nhwc, w_flat, b2d)


def residual_conv_unit(x_nchw, weight_oihw, bias):
    """PyTorch-style interface: NCHW in / NCHW out.

    If the surrounding model is NHWC, call residual_conv_unit_nhwc directly
    and skip these two boundary transposes (extra HBM passes).
    """
    x_nhwc = jnp.transpose(x_nchw, (0, 2, 3, 1))
    out_nhwc = residual_conv_unit_nhwc(x_nhwc, weight_oihw, bias)
    return jnp.transpose(out_nhwc, (0, 3, 1, 2))


def _reference(x_nchw, weight_oihw, bias):
    """Plain-JAX reference (lax conv) for correctness check."""
    y = jax.lax.conv_general_dilated(
        x_nchw, weight_oihw,
        window_strides=(1, 1), padding="SAME",
        dimension_numbers=("NCHW", "OIHW", "NCHW"),
    )
    return y + bias[None, :, None, None] + x_nchw


if __name__ == "__main__":
    key = jax.random.PRNGKey(0)
    k_x, k_w, k_b = jax.random.split(key, 3)

    N, C, H, W = 2, 4, 16, 16
    x = jax.random.normal(k_x, (N, C, H, W), dtype=jnp.float32)
    # Deterministic synthetic Conv2d(cin, cin, 3, padding=1, bias=True) params.
    weight = jax.random.normal(k_w, (C, C, 3, 3), dtype=jnp.float32) * 0.1
    bias = jax.random.normal(k_b, (C,), dtype=jnp.float32) * 0.1

    out = residual_conv_unit(x, weight, bias)
    out = jax.block_until_ready(out)

    ref = jax.block_until_ready(_reference(x, weight, bias))
    assert out.shape == (N, C, H, W)
    # Tolerance covers MXU default-precision accumulation-order differences vs
    # the XLA conv reference; structural errors are orders of magnitude larger.
    assert jnp.allclose(out, ref, atol=1e-2, rtol=1e-2), "mismatch vs reference"

    print("KERNEL_OK")
</pallas_src>

<mosaic_0001>
module attributes {stable_mosaic.version = 11 : i64} {
  func.func @_rcu_kernel(%arg0: i32, %arg1: i32, %arg2: memref<1x16x16x4xf32, #tpu.memory_space<vmem>>, %arg3: memref<1x1x16x4xf32, #tpu.memory_space<vmem>>, %arg4: memref<1x1x16x4xf32, #tpu.memory_space<vmem>>, %arg5: memref<36x4xf32, #tpu.memory_space<vmem>>, %arg6: memref<1x4xf32, #tpu.memory_space<vmem>>, %arg7: memref<1x16x16x4xf32, #tpu.memory_space<vmem>>, %arg8: memref<18x18x4xf32, #tpu.memory_space<vmem>>, %arg9: memref<256x36xf32, #tpu.memory_space<vmem>>) attributes {dimension_semantics = [#tpu.dimension_semantics<parallel>, #tpu.dimension_semantics<parallel>], iteration_bounds = array<i64: 2, 1>, scalar_prefetch = 0 : i64, scratch_operands = 2 : i64, tpu.core_type = #tpu.core_type<tc>, window_params = [{transform_indices = @transform_0, window_bounds = array<i64: 1, 16, 16, 4>}, {transform_indices = @transform_1, window_bounds = array<i64: 1, 1, 16, 4>}, {transform_indices = @transform_2, window_bounds = array<i64: 1, 1, 16, 4>}, {pipeline_mode = #tpu.pipeline_mode<synchronous>, transform_indices = @transform_3, window_bounds = array<i64: 36, 4>}, {pipeline_mode = #tpu.pipeline_mode<synchronous>, transform_indices = @transform_4, window_bounds = array<i64: 1, 4>}, {transform_indices = @transform_5, window_bounds = array<i64: 1, 16, 16, 4>}]} {
    %cst = arith.constant 0.000000e+00 : f32
    %0 = vector.broadcast %cst : f32 to vector<18x1x4xf32>
    %c0 = arith.constant 0 : index
    %c0_0 = arith.constant 0 : index
    %c0_1 = arith.constant 0 : index
    %1 = vector.load %arg8[%c0, %c0_0, %c0_1] : memref<18x18x4xf32, #tpu.memory_space<vmem>>, vector<18x1x4xf32>
    tpu.vector_store %arg8[%c0, %c0_0, %c0_1], %0 {strides = array<i32>} : memref<18x18x4xf32, #tpu.memory_space<vmem>>, vector<18x1x4xf32>,
    %cst_2 = arith.constant 0.000000e+00 : f32
    %2 = vector.broadcast %cst_2 : f32 to vector<18x1x4xf32>
    %c0_3 = arith.constant 0 : index
    %c17 = arith.constant 17 : index
    %c0_4 = arith.constant 0 : index
    %3 = vector.load %arg8[%c0_3, %c17, %c0_4] : memref<18x18x4xf32, #tpu.memory_space<vmem>>, vector<18x1x4xf32>
    tpu.vector_store %arg8[%c0_3, %c17, %c0_4], %2 {strides = array<i32>} : memref<18x18x4xf32, #tpu.memory_space<vmem>>, vector<18x1x4xf32>,
    %c0_5 = arith.constant 0 : index
    %c0_6 = arith.constant 0 : index
    %c0_7 = arith.constant 0 : index
    %c0_8 = arith.constant 0 : index
    %4 = vector.load %arg2[%c0_5, %c0_6, %c0_7, %c0_8] : memref<1x16x16x4xf32, #tpu.memory_space<vmem>>, vector<1x16x16x4xf32>
    %5 = vector.shape_cast %4 : vector<1x16x16x4xf32> to vector<16x16x4xf32>
    %c1 = arith.constant 1 : index
    %c1_9 = arith.constant 1 : index
    %c0_10 = arith.constant 0 : index
    %6 = vector.load %arg8[%c1, %c1_9, %c0_10] : memref<18x18x4xf32, #tpu.memory_space<vmem>>, vector<16x16x4xf32>
    tpu.vector_store %arg8[%c1, %c1_9, %c0_10], %5 {strides = array<i32>} : memref<18x18x4xf32, #tpu.memory_space<vmem>>, vector<16x16x4xf32>,
    %c0_11 = arith.constant 0 : index
    %c0_12 = arith.constant 0 : index
    %c0_13 = arith.constant 0 : index
    %c0_14 = arith.constant 0 : index
    %7 = vector.load %arg3[%c0_11, %c0_12, %c0_13, %c0_14] : memref<1x1x16x4xf32, #tpu.memory_space<vmem>>, vector<1x1x16x4xf32>
    %8 = vector.shape_cast %7 : vector<1x1x16x4xf32> to vector<1x16x4xf32>
    %c0_15 = arith.constant 0 : index
    %c1_16 = arith.constant 1 : index
    %c0_17 = arith.constant 0 : index
    %9 = vector.load %arg8[%c0_15, %c1_16, %c0_17] : memref<18x18x4xf32, #tpu.memory_space<vmem>>, vector<1x16x4xf32>
    tpu.vector_store %arg8[%c0_15, %c1_16, %c0_17], %8 {strides = array<i32>} : memref<18x18x4xf32, #tpu.memory_space<vmem>>, vector<1x16x4xf32>,
    %c0_18 = arith.constant 0 : index
    %c0_19 = arith.constant 0 : index
    %c0_20 = arith.constant 0 : index
    %c0_21 = arith.constant 0 : index
    %10 = vector.load %arg4[%c0_18, %c0_19, %c0_20, %c0_21] : memref<1x1x16x4xf32, #tpu.memory_space<vmem>>, vector<1x1x16x4xf32>
    %11 = vector.shape_cast %10 : vector<1x1x16x4xf32> to vector<1x16x4xf32>
    %c17_22 = arith.constant 17 : index
    %c1_23 = arith.constant 1 : index
    %c0_24 = arith.constant 0 : index
    %12 = vector.load %arg8[%c17_22, %c1_23, %c0_24] : memref<18x18x4xf32, #tpu.memory_space<vmem>>, vector<1x16x4xf32>
    tpu.vector_store %arg8[%c17_22, %c1_23, %c0_24], %11 {strides = array<i32>} : memref<18x18x4xf32, #tpu.memory_space<vmem>>, vector<1x16x4xf32>,
    %c0_i32 = arith.constant 0 : i32
    %13 = arith.cmpi eq, %arg1, %c0_i32 : i32
    %14 = arith.extui %13 : i1 to i32
    %c0_i32_25 = arith.constant 0 : i32
    %15 = arith.cmpi ne, %14, %c0_i32_25 : i32
    scf.if %15 {
      %cst_60 = arith.constant 0.000000e+00 : f32
      %62 = vector.broadcast %cst_60 : f32 to vector<1x16x4xf32>
      %c0_61 = arith.constant 0 : index
      %c1_62 = arith.constant 1 : index
      %c0_63 = arith.constant 0 : index
      %63 = vector.load %arg8[%c0_61, %c1_62, %c0_63] : memref<18x18x4xf32, #tpu.memory_space<vmem>>, vector<1x16x4xf32>
      tpu.vector_store %arg8[%c0_61, %c1_62, %c0_63], %62 {strides = array<i32>} : memref<18x18x4xf32, #tpu.memory_space<vmem>>, vector<1x16x4xf32>,
    } else {
    }
    %c0_i32_26 = arith.constant 0 : i32
    %16 = arith.cmpi eq, %arg1, %c0_i32_26 : i32
    %17 = arith.extui %16 : i1 to i32
    %c0_i32_27 = arith.constant 0 : i32
    %18 = arith.cmpi ne, %17, %c0_i32_27 : i32
    scf.if %18 {
      %cst_60 = arith.constant 0.000000e+00 : f32
      %62 = vector.broadcast %cst_60 : f32 to vector<1x16x4xf32>
      %c17_61 = arith.constant 17 : index
      %c1_62 = arith.constant 1 : index
      %c0_63 = arith.constant 0 : index
      %63 = vector.load %arg8[%c17_61, %c1_62, %c0_63] : memref<18x18x4xf32, #tpu.memory_space<vmem>>, vector<1x16x4xf32>
      tpu.vector_store %arg8[%c17_61, %c1_62, %c0_63], %62 {strides = array<i32>} : memref<18x18x4xf32, #tpu.memory_space<vmem>>, vector<1x16x4xf32>,
    } else {
    }
    %c0_28 = arith.constant 0 : index
    %c0_29 = arith.constant 0 : index
    %c0_30 = arith.constant 0 : index
    %19 = vector.load %arg8[%c0_28, %c0_29, %c0_30] : memref<18x18x4xf32, #tpu.memory_space<vmem>>, vector<16x18x4xf32>
    %20 = vector.extract_strided_slice %19 {offsets = [0, 0, 0], sizes = [16, 16, 4], strides = [1, 1, 1]} : vector<16x18x4xf32> to vector<16x16x4xf32>
    %21 = vector.shape_cast %20 : vector<16x16x4xf32> to vector<256x4xf32>
    %c0_31 = arith.constant 0 : index
    %c0_32 = arith.constant 0 : index
    %22 = vector.load %arg9[%c0_31, %c0_32] : memref<256x36xf32, #tpu.memory_space<vmem>>, vector<256x4xf32>
    tpu.vector_store %arg9[%c0_31, %c0_32], %21 {strides = array<i32>} : memref<256x36xf32, #tpu.memory_space<vmem>>, vector<256x4xf32>,
    %23 = vector.extract_strided_slice %19 {offsets = [0, 1, 0], sizes = [16, 16, 4], strides = [1, 1, 1]} : vector<16x18x4xf32> to vector<16x16x4xf32>
    %24 = vector.shape_cast %23 : vector<16x16x4xf32> to vector<256x4xf32>
    %c0_33 = arith.constant 0 : index
    %c4 = arith.constant 4 : index
    %25 = vector.load %arg9[%c0_33, %c4] : memref<256x36xf32, #tpu.memory_space<vmem>>, vector<256x4xf32>
    tpu.vector_store %arg9[%c0_33, %c4], %24 {strides = array<i32>} : memref<256x36xf32, #tpu.memory_space<vmem>>, vector<256x4xf32>,
    %26 = vector.extract_strided_slice %19 {offsets = [0, 2, 0], sizes = [16, 16, 4], strides = [1, 1, 1]} : vector<16x18x4xf32> to vector<16x16x4xf32>
    %27 = vector.shape_cast %26 : vector<16x16x4xf32> to vector<256x4xf32>
    %c0_34 = arith.constant 0 : index
    %c8 = arith.constant 8 : index
    %28 = vector.load %arg9[%c0_34, %c8] : memref<256x36xf32, #tpu.memory_space<vmem>>, vector<256x4xf32>
    tpu.vector_store %arg9[%c0_34, %c8], %27 {strides = array<i32>} : memref<256x36xf32, #tpu.memory_space<vmem>>, vector<256x4xf32>,
    %c1_35 = arith.constant 1 : index
    %c0_36 = arith.constant 0 : index
    %c0_37 = arith.constant 0 : index
    %29 = vector.load %arg8[%c1_35, %c0_36, %c0_37] : memref<18x18x4xf32, #tpu.memory_space<vmem>>, vector<16x18x4xf32>
    %30 = vector.extract_strided_slice %29 {offsets = [0, 0, 0], sizes = [16, 16, 4], strides = [1, 1, 1]} : vector<16x18x4xf32> to vector<16x16x4xf32>
    %31 = vector.shape_cast %30 : vector<16x16x4xf32> to vector<256x4xf32>
    %c0_38 = arith.constant 0 : index
    %c12 = arith.constant 12 : index
    %32 = vector.load %arg9[%c0_38, %c12] : memref<256x36xf32, #tpu.memory_space<vmem>>, vector<256x4xf32>
    tpu.vector_store %arg9[%c0_38, %c12], %31 {strides = array<i32>} : memref<256x36xf32, #tpu.memory_space<vmem>>, vector<256x4xf32>,
    %33 = vector.extract_strided_slice %29 {offsets = [0, 1, 0], sizes = [16, 16, 4], strides = [1, 1, 1]} : vector<16x18x4xf32> to vector<16x16x4xf32>
    %34 = vector.shape_cast %33 : vector<16x16x4xf32> to vector<256x4xf32>
    %c0_39 = arith.constant 0 : index
    %c16 = arith.constant 16 : index
    %35 = vector.load %arg9[%c0_39, %c16] : memref<256x36xf32, #tpu.memory_space<vmem>>, vector<256x4xf32>
    tpu.vector_store %arg9[%c0_39, %c16], %34 {strides = array<i32>} : memref<256x36xf32, #tpu.memory_space<vmem>>, vector<256x4xf32>,
    %36 = vector.extract_strided_slice %29 {offsets = [0, 2, 0], sizes = [16, 16, 4], strides = [1, 1, 1]} : vector<16x18x4xf32> to vector<16x16x4xf32>
    %37 = vector.shape_cast %36 : vector<16x16x4xf32> to vector<256x4xf32>
    %c0_40 = arith.constant 0 : index
    %c20 = arith.constant 20 : index
    %38 = vector.load %arg9[%c0_40, %c20] : memref<256x36xf32, #tpu.memory_space<vmem>>, vector<256x4xf32>
    tpu.vector_store %arg9[%c0_40, %c20], %37 {strides = array<i32>} : memref<256x36xf32, #tpu.memory_space<vmem>>, vector<256x4xf32>,
    %c2 = arith.constant 2 : index
    %c0_41 = arith.constant 0 : index
    %c0_42 = arith.constant 0 : index
    %39 = vector.load %arg8[%c2, %c0_41, %c0_42] : memref<18x18x4xf32, #tpu.memory_space<vmem>>, vector<16x18x4xf32>
    %40 = vector.extract_strided_slice %39 {offsets = [0, 0, 0], sizes = [16, 16, 4], strides = [1, 1, 1]} : vector<16x18x4xf32> to vector<16x16x4xf32>
    %41 = vector.shape_cast %40 : vector<16x16x4xf32> to vector<256x4xf32>
    %c0_43 = arith.constant 0 : index
    %c24 = arith.constant 24 : index
    %42 = vector.load %arg9[%c0_43, %c24] : memref<256x36xf32, #tpu.memory_space<vmem>>, vector<256x4xf32>
    tpu.vector_store %arg9[%c0_43, %c24], %41 {strides = array<i32>} : memref<256x36xf32, #tpu.memory_space<vmem>>, vector<256x4xf32>,
    %43 = vector.extract_strided_slice %39 {offsets = [0, 1, 0], sizes = [16, 16, 4], strides = [1, 1, 1]} : vector<16x18x4xf32> to vector<16x16x4xf32>
    %44 = vector.shape_cast %43 : vector<16x16x4xf32> to vector<256x4xf32>
    %c0_44 = arith.constant 0 : index
    %c28 = arith.constant 28 : index
    %45 = vector.load %arg9[%c0_44, %c28] : memref<256x36xf32, #tpu.memory_space<vmem>>, vector<256x4xf32>
    tpu.vector_store %arg9[%c0_44, %c28], %44 {strides = array<i32>} : memref<256x36xf32, #tpu.memory_space<vmem>>, vector<256x4xf32>,
    %46 = vector.extract_strided_slice %39 {offsets = [0, 2, 0], sizes = [16, 16, 4], strides = [1, 1, 1]} : vector<16x18x4xf32> to vector<16x16x4xf32>
    %47 = vector.shape_cast %46 : vector<16x16x4xf32> to vector<256x4xf32>
    %c0_45 = arith.constant 0 : index
    %c32 = arith.constant 32 : index
    %48 = vector.load %arg9[%c0_45, %c32] : memref<256x36xf32, #tpu.memory_space<vmem>>, vector<256x4xf32>
    tpu.vector_store %arg9[%c0_45, %c32], %47 {strides = array<i32>} : memref<256x36xf32, #tpu.memory_space<vmem>>, vector<256x4xf32>,
    %c0_46 = arith.constant 0 : index
    %c0_47 = arith.constant 0 : index
    %49 = vector.load %arg9[%c0_46, %c0_47] : memref<256x36xf32, #tpu.memory_space<vmem>>, vector<256x36xf32>
    %c0_48 = arith.constant 0 : index
    %c0_49 = arith.constant 0 : index
    %50 = vector.load %arg5[%c0_48, %c0_49] : memref<36x4xf32, #tpu.memory_space<vmem>>, vector<36x4xf32>
    %cst_50 = arith.constant dense<0.000000e+00> : vector<256x4xf32>
    %51 = tpu.matmul %49, %50, %cst_50 {dimension_numbers = #tpu.dot_dimension_numbers<[1], [0], [0], [1], [0, 0, 1, 1], [], []>} : vector<256x36xf32>, vector<36x4xf32>, vector<256x4xf32> -> vector<256x4xf32>
    %c1_51 = arith.constant 1 : index
    %c1_52 = arith.constant 1 : index
    %c0_53 = arith.constant 0 : index
    %52 = vector.load %arg8[%c1_51, %c1_52, %c0_53] : memref<18x18x4xf32, #tpu.memory_space<vmem>>, vector<16x16x4xf32>
    %53 = vector.shape_cast %52 : vector<16x16x4xf32> to vector<256x4xf32>
    %c0_54 = arith.constant 0 : index
    %c0_55 = arith.constant 0 : index
    %54 = vector.load %arg6[%c0_54, %c0_55] : memref<1x4xf32, #tpu.memory_space<vmem>>, vector<1x4xf32>
    %55 = vector.broadcast %54 : vector<1x4xf32> to vector<256x4xf32>
    %56 = arith.addf %51, %55 : vector<256x4xf32>
    %57 = arith.addf %56, %53 : vector<256x4xf32>
    %58 = vector.shape_cast %57 : vector<256x4xf32> to vector<16x16x4xf32>
    %c0_56 = arith.constant 0 : index
    %c0_57 = arith.constant 0 : index
    %c0_58 = arith.constant 0 : index
    %c0_59 = arith.constant 0 : index
    %59 = vector.load %arg7[%c0_56, %c0_57, %c0_58, %c0_59] : memref<1x16x16x4xf32, #tpu.memory_space<vmem>>, vector<1x16x16x4xf32>
    %60 = vector.shape_cast %59 : vector<1x16x16x4xf32> to vector<16x16x4xf32>
    %61 = vector.shape_cast %58 : vector<16x16x4xf32> to vector<1x16x16x4xf32>
    tpu.vector_store %arg7[%c0_56, %c0_57, %c0_58, %c0_59], %61 {strides = array<i32>} : memref<1x16x16x4xf32, #tpu.memory_space<vmem>>, vector<1x16x16x4xf32>,
    return
  }
  func.func @transform_0(%arg0: i32, %arg1: i32) -> (i32, i32, i32, i32) {
    %c0_i32 = arith.constant 0 : i32
    %c0_i32_0 = arith.constant 0 : i32
    %c0_i32_1 = arith.constant 0 : i32
    return %arg0, %arg1, %c0_i32, %c0_i32_0 : i32, i32, i32, i32
  }
  func.func @transform_1(%arg0: i32, %arg1: i32) -> (i32, i32, i32, i32) {
    %c16_i32 = arith.constant 16 : i32
    %0 = arith.muli %arg1, %c16_i32 : i32
    %c1_i32 = arith.constant 1 : i32
    %1 = arith.subi %0, %c1_i32 : i32
    %c0_i32 = arith.constant 0 : i32
    %2 = arith.maxsi %1, %c0_i32 : i32
    %c0_i32_0 = arith.constant 0 : i32
    %c0_i32_1 = arith.constant 0 : i32
    %c0_i32_2 = arith.constant 0 : i32
    return %arg0, %2, %c0_i32_0, %c0_i32_1 : i32, i32, i32, i32
  }
  func.func @transform_2(%arg0: i32, %arg1: i32) -> (i32, i32, i32, i32) {
    %c16_i32 = arith.constant 16 : i32
    %0 = arith.muli %arg1, %c16_i32 : i32
    %c16_i32_0 = arith.constant 16 : i32
    %1 = arith.addi %0, %c16_i32_0 : i32
    %c15_i32 = arith.constant 15 : i32
    %2 = arith.minsi %1, %c15_i32 : i32
    %c0_i32 = arith.constant 0 : i32
    %c0_i32_1 = arith.constant 0 : i32
    %c0_i32_2 = arith.constant 0 : i32
    return %arg0, %2, %c0_i32, %c0_i32_1 : i32, i32, i32, i32
  }
  func.func @transform_3(%arg0: i32, %arg1: i32) -> (i32, i32) {
    %c0_i32 = arith.constant 0 : i32
    %c0_i32_0 = arith.constant 0 : i32
    %c0_i32_1 = arith.constant 0 : i32
    return %c0_i32, %c0_i32_0 : i32, i32
  }
  func.func @transform_4(%arg0: i32, %arg1: i32) -> (i32, i32) {
    %c0_i32 = arith.constant 0 : i32
    %c0_i32_0 = arith.constant 0 : i32
    %c0_i32_1 = arith.constant 0 : i32
    return %c0_i32, %c0_i32_0 : i32, i32
  }
  func.func @transform_5(%arg0: i32, %arg1: i32) -> (i32, i32, i32, i32) {
    %c0_i32 = arith.constant 0 : i32
    %c0_i32_0 = arith.constant 0 : i32
    %c0_i32_1 = arith.constant 0 : i32
    return %arg0, %arg1, %c0_i32, %c0_i32_0 : i32, i32, i32, i32
  }
}

</mosaic_0001>

<bundles_post_ra>
// kernel: tpu_custom_call.1
= control target key start
LH: loop header
LB: loop body
LE: loop exit
PB: predicated region body
PF: predicated region fallthrough
CT: control target
= control target key end

     0   :  { %s3210_s18 = smov 0   ;;  %s3212_s19 = smov 0   ;;  %s4928_s0 = inlined_call_operand.vmem [shape: f32[2,16,16,4], index: 0, kind: input, shape index: {}]   ;;  %s4929_s1 = inlined_call_operand.vmem [shape: f32[2,16,16,4], index: 1, kind: input, shape index: {}]   ;;  %s4930_s2 = inlined_call_operand.vmem [shape: f32[2,16,16,4], index: 2, kind: input, shape index: {}]   ;;  %s4931_s3 = inlined_call_operand.vmem [shape: f32[36,4], index: 3, kind: input, shape index: {}]   ;;  %s4932_s4 = inlined_call_operand.vmem [shape: f32[1,4], index: 4, kind: input, shape index: {}]   ;;  %s4933_s5 = inlined_call_operand.vmem [shape: f32[2,16,16,4], index: 5, kind: output, shape index: {}]  }
   0x1   :  { %s3214_s20 = smov 0  }
   0x2 LB: > { %s27_s21 = sadd.s32 1, %s3165_s19  ;;  %p2956_p0 = scmp.ge.s32.totalorder %s3169_s20, 1  ;;  %s3169_s20 = sphi %s3214_s20, %s15_s20   ;;  %s3165_s19 = sphi %s3212_s19, %s5044_s19   ;;  %s3161_s18 = sphi %s3210_s18, %s5043_s18  }
   0x3   : > { %p29_p1 = scmp.ge.s32.totalorder %s27_s21, 2  ;;  %p273_p2 = scmp.lt.s32.totalorder %s3169_s20, 3 }
   0x5   : > { %s5046_s21 = smov (%p29_p1, %s27_s21), 0  ;;  %p274_p3 = pnand %p2956_p0, %p273_p2 }
   0x7   : > { %277 = sbr.rel (%p274_p3) target bundleno = 874 (0x36a), region = 40 }
   0xc   : > { %p338_p4 = scmp.lt.s32.totalorder %s3161_s18, 1  ;;  %vm393_vm0 = vcmask 24576   ;;  %v4934_v0 = vmov 0.0   ;;  %vm463_vm1 = vcmask 31744   ;;  %vm641_vm2 = vcmask 1046528   ;;  %s3172_s29 = smov 4  }
   0xd   : > { %396 = vst.msk [vmem:[#allocation2 + $0x30] sm:$0x1] %vm393_vm0, %v4934_v0  ;;  %394 = vst.msk [vmem:[#allocation2] sm:$0x1] %vm393_vm0, %v4934_v0  ;;  %vm851_vm3 = vcmask 1045504   ;;  %s3173_s30 = smov 8  }
   0xe   : > { %395 = vst.msk [vmem:[#allocation2 + $0x18] sm:$0x1] %vm393_vm0, %v4934_v0  ;;  %397 = vst.msk [vmem:[#allocation2 + $0x48] sm:$0x1] %vm393_vm0, %v4934_v0  ;;  %s5048_s18 = smov (!%p338_p4, %s3161_s18), 1  ;;  %vm818_vm4 = vcmask 64544  }
   0xf   : > { %398 = vst.msk [vmem:[#allocation2 + $0x60] sm:$0x1] %vm393_vm0, %v4934_v0  ;;  %399 = vst.msk [vmem:[#allocation2 + $0x78] sm:$0x1] %vm393_vm0, %v4934_v0  ;;  %s3306_s22 = sshll.u32 %s5048_s18, 8  ;;  %s3174_s6 = smov 12  }
  0x10   : > { %400 = vst.msk [vmem:[#allocation2 + $0x90] sm:$0x1] %vm393_vm0, %v4934_v0  ;;  %401 = vst.msk [vmem:[#allocation2 + $0xa8] sm:$0x1] %vm393_vm0, %v4934_v0  ;;  %s3312_s25 = scalar_lea.vmem %s4928_s0, %s3306_s22  ;;  %s360_s28 = scalar_lea.vmem %s4929_s1, %s3306_s22  ;;  %vm1028_vm5 = vcmask 97344   ;;  %vm2521_vm6 = vcmask 1043456  }
  0x11   : > { %402 = vst.msk [vmem:[#allocation2 + $0xc0] sm:$0x1] %vm393_vm0, %v4934_v0  ;;  %403 = vst.msk [vmem:[#allocation2 + $0xd8] sm:$0x1] %vm393_vm0, %v4934_v0  ;;  %v432_v1 = vld [vmem:[%s3312_s25 + $0x10] sm:$0xff]  ;;  %v433_v2 = vld [vmem:[%s3312_s25 + $0x18] sm:$0xff] }
  0x12   : > { %404 = vst.msk [vmem:[#allocation2 + $0xf0] sm:$0x1] %vm393_vm0, %v4934_v0  ;;  %405 = vst.msk [vmem:[#allocation2 + $0x108] sm:$0x1] %vm393_vm0, %v4934_v0  ;;  %v430_v3 = vld [vmem:[%s3312_s25] sm:$0xff]  ;;  %v431_v4 = vld [vmem:[%s3312_s25 + $0x8] sm:$0xff] }
  0x13   : > { %406 = vst.msk [vmem:[#allocation2 + $0x120] sm:$0x1] %vm393_vm0, %v4934_v0  ;;  %407 = vst.msk [vmem:[#allocation2 + $0x138] sm:$0x1] %vm393_vm0, %v4934_v0  ;;  %v434_v5 = vld [vmem:[%s3312_s25 + $0x20] sm:$0xff]  ;;  %v435_v6 = vld [vmem:[%s3312_s25 + $0x28] sm:$0xff] }
  0x14   : > { %408 = vst.msk [vmem:[#allocation2 + $0x150] sm:$0x1] %vm393_vm0, %v4934_v0  ;;  %409 = vst.msk [vmem:[#allocation2 + $0x168] sm:$0x1] %vm393_vm0, %v4934_v0  ;;  %v436_v7 = vld [vmem:[%s3312_s25 + $0x30] sm:$0xff]  ;;  %v437_v8 = vld [vmem:[%s3312_s25 + $0x38] sm:$0xff] }
  0x15   : > { %410 = vst.msk [vmem:[#allocation2 + $0x180] sm:$0x1] %vm393_vm0, %v4934_v0  ;;  %411 = vst.msk [vmem:[#allocation2 + $0x198] sm:$0x1] %vm393_vm0, %v4934_v0  ;;  %v496_v9 = vld [vmem:[%s360_s28] sm:$0xff]  ;;  %v497_v10 = vld [vmem:[%s360_s28 + $0x8] sm:$0xff] }
  0x16   : > { %412 = vst.msk [vmem:[#allocation2 + $0x11] sm:$0x1] %vm393_vm0, %v4934_v0  ;;  %413 = vst.msk [vmem:[#allocation2 + $0x29] sm:$0x1] %vm393_vm0, %v4934_v0  ;;  %v438_v11 = vld [vmem:[%s3312_s25 + $0x40] sm:$0xff]  ;;  %v439_v12 = vld [vmem:[%s3312_s25 + $0x48] sm:$0xff] }
  0x17   : > { %414 = vst.msk [vmem:[#allocation2 + $0x41] sm:$0x1] %vm393_vm0, %v4934_v0  ;;  %415 = vst.msk [vmem:[#allocation2 + $0x59] sm:$0x1] %vm393_vm0, %v4934_v0  ;;  %v440_v13 = vld [vmem:[%s3312_s25 + $0x50] sm:$0xff]  ;;  %v441_v14 = vld [vmem:[%s3312_s25 + $0x58] sm:$0xff] }
  0x18   : > { %416 = vst.msk [vmem:[#allocation2 + $0x71] sm:$0x1] %vm393_vm0, %v4934_v0  ;;  %417 = vst.msk [vmem:[#allocation2 + $0x89] sm:$0x1] %vm393_vm0, %v4934_v0  ;;  %v442_v15 = vld [vmem:[%s3312_s25 + $0x60] sm:$0xff]  ;;  %v443_v16 = vld [vmem:[%s3312_s25 + $0x68] sm:$0xff] }
  0x19   : > { %418 = vst.msk [vmem:[#allocation2 + $0xa1] sm:$0x1] %vm393_vm0, %v4934_v0  ;;  %419 = vst.msk [vmem:[#allocation2 + $0xb9] sm:$0x1] %vm393_vm0, %v4934_v0  ;;  %v444_v17 = vld [vmem:[%s3312_s25 + $0x70] sm:$0xff]  ;;  %v445_v18 = vld [vmem:[%s3312_s25 + $0x78] sm:$0xff] }
  0x1a   : > { %420 = vst.msk [vmem:[#allocation2 + $0xd1] sm:$0x1] %vm393_vm0, %v4934_v0  ;;  %421 = vst.msk [vmem:[#allocation2 + $0xe9] sm:$0x1] %vm393_vm0, %v4934_v0  ;;  %v446_v19 = vld [vmem:[%s3312_s25 + $0x80] sm:$0xff]  ;;  %v447_v20 = vld [vmem:[%s3312_s25 + $0x88] sm:$0xff] }
  0x1b   : > { %422 = vst.msk [vmem:[#allocation2 + $0x101] sm:$0x1] %vm393_vm0, %v4934_v0  ;;  %423 = vst.msk [vmem:[#allocation2 + $0x119] sm:$0x1] %vm393_vm0, %v4934_v0  ;;  %v448_v21 = vld [vmem:[%s3312_s25 + $0x90] sm:$0xff]  ;;  %v449_v22 = vld [vmem:[%s3312_s25 + $0x98] sm:$0xff] }
  0x1c   : > { %424 = vst.msk [vmem:[#allocation2 + $0x131] sm:$0x1] %vm393_vm0, %v4934_v0  ;;  %425 = vst.msk [vmem:[#allocation2 + $0x149] sm:$0x1] %vm393_vm0, %v4934_v0  ;;  %v450_v23 = vld [vmem:[%s3312_s25 + $0xa0] sm:$0xff]  ;;  %v451_v24 = vld [vmem:[%s3312_s25 + $0xa8] sm:$0xff] }
  0x1d   : > { %426 = vst.msk [vmem:[#allocation2 + $0x161] sm:$0x1] %vm393_vm0, %v4934_v0  ;;  %427 = vst.msk [vmem:[#allocation2 + $0x179] sm:$0x1] %vm393_vm0, %v4934_v0  ;;  %s3175_s7 = smov 16   ;;  %s3176_s8 = smov 20  }
  0x1e   : > { %428 = vst.msk [vmem:[#allocation2 + $0x191] sm:$0x1] %vm393_vm0, %v4934_v0  ;;  %429 = vst.msk [vmem:[#allocation2 + $0x1a9] sm:$0x1] %vm393_vm0, %v4934_v0  ;;  %s3177_s9 = smov 24   ;;  %s3178_s10 = smov 28  }
  0x1f   : > { %466 = vst.msk [vmem:[#allocation2 + $0x31] sm:$0xff] %vm463_vm1, %v432_v1  ;;  %467 = vst.msk [vmem:[#allocation2 + $0x39] sm:$0xff] %vm463_vm1, %v433_v2  ;;  %vm1237_vm7 = vcmask 130144   ;;  %s3179_s23 = smov 32   ;;  %vm1462_vm8 = vcmask 162944   ;;  %vm1671_vm9 = vcmask 195744  }
  0x20   : > { %464 = vst.msk [vmem:[#allocation2 + $0x19] sm:$0xff] %vm463_vm1, %v430_v3  ;;  %465 = vst.msk [vmem:[#allocation2 + $0x21] sm:$0xff] %vm463_vm1, %v431_v4  ;;  %vm1881_vm10 = vcmask 228544   ;;  %vm2106_vm11 = vcmask 261344   ;;  %s3004_s26 = sadd.s32 240, %s3306_s22  ;;  %vm2315_vm12 = vcmask 294144  }
  0x21   : > { %468 = vst.msk [vmem:[#allocation2 + $0x49] sm:$0xff] %vm463_vm1, %v434_v5  ;;  %469 = vst.msk [vmem:[#allocation2 + $0x51] sm:$0xff] %vm463_vm1, %v435_v6  ;;  %vm2424_vm13 = vcmask 293888  }
  0x22   : > { %470 = vst.msk [vmem:[#allocation2 + $0x61] sm:$0xff] %vm463_vm1, %v436_v7  ;;  %471 = vst.msk [vmem:[#allocation2 + $0x69] sm:$0xff] %vm463_vm1, %v437_v8 }
  0x23   : > { %498 = vst.msk [vmem:[#allocation2 + $0x1] sm:$0xff] %vm463_vm1, %v496_v9  ;;  %499 = vst.msk [vmem:[#allocation2 + $0x9] sm:$0xff] %vm463_vm1, %v497_v10 }
  0x24   : > { %509 = vst.msk [vmem:[#allocation2 + $0x1] sm:$0xff] %vm463_vm1, %v4934_v0  ;;  %472 = vst.msk [vmem:[#allocation2 + $0x79] sm:$0xff] %vm463_vm1, %v438_v11 }
  0x25   : > { %473 = vst.msk [vmem:[#allocation2 + $0x81] sm:$0xff] %vm463_vm1, %v439_v12  ;;  %510 = vst.msk [vmem:[#allocation2 + $0x9] sm:$0xff] %vm463_vm1, %v4934_v0 }
  0x26   : > { %474 = vst.msk [vmem:[#allocation2 + $0x91] sm:$0xff] %vm463_vm1, %v440_v13  ;;  %475 = vst.msk [vmem:[#allocation2 + $0x99] sm:$0xff] %vm463_vm1, %v441_v14  ;;  %v3365_v25 = vld [vmem:[#allocation2 + $0x30] sm:$0xff]  ;;  %v3367_v26 = vld [vmem:[#allocation2 + $0x38] sm:$0xff] }
  0x27   : > { %476 = vst.msk [vmem:[#allocation2 + $0xa9] sm:$0xff] %vm463_vm1, %v442_v15  ;;  %477 = vst.msk [vmem:[#allocation2 + $0xb1] sm:$0xff] %vm463_vm1, %v443_v16  ;;  %v3369_v27 = vld [vmem:[#allocation2 + $0x18] sm:$0xff]  ;;  %v652_v28 = vrot.slane %v3365_v25, 1  ;;  %v3376_v29 = vrot.slane %v3367_v26, 1  ;;  %v3382_v30 = vld [vmem:[#allocation2 + $0x20] sm:$0xff] }
  0x28   : > { %478 = vst.msk [vmem:[#allocation2 + $0xc1] sm:$0xff] %vm463_vm1, %v444_v17  ;;  %479 = vst.msk [vmem:[#allocation2 + $0xc9] sm:$0xff] %vm463_vm1, %v445_v18  ;;  %v647_v31 = vrot.slane %v3369_v27, 1  ;;  %v3387_v32 = vld [vmem:[#allocation2 + $0x48] sm:$0xff]  ;;  %v3389_v33 = vld [vmem:[#allocation2 + $0x50] sm:$0xff]  ;;  %v3392_v34 = vrot.slane %v3382_v30, 1 }
  0x29   : > { %480 = vst.msk [vmem:[#allocation2 + $0xd9] sm:$0xff] %vm463_vm1, %v446_v19  ;;  %481 = vst.msk [vmem:[#allocation2 + $0xe1] sm:$0xff] %vm463_vm1, %v447_v20  ;;  %v657_v35 = vrot.slane %v3387_v32, 1  ;;  %v3398_v36 = vrot.slane %v3389_v33, 1  ;;  %v3404_v37 = vld [vmem:[#allocation2 + $0x28] sm:$0x3]  ;;  %v3410_v39 = vsel %vm641_vm2, %v652_v28, %v3376_v29 }
  0x2a   : > { %482 = vst.msk [vmem:[#allocation2 + $0xf1] sm:$0xff] %vm463_vm1, %v448_v21  ;;  %483 = vst.msk [vmem:[#allocation2 + $0xf9] sm:$0xff] %vm463_vm1, %v449_v22  ;;  %v3406_v38 = vld [vmem:[#allocation2 + $0x60] sm:$0xff]  ;;  %v650_v40 = vrot.slane %v3404_v37, 1  ;;  %v3413_v41 = vld [vmem:[#allocation2 + $0x68] sm:$0xff]  ;;  %730 = vrot.lane.b32.xlu0 %v3410_v39, %s3172_s29  ;;  %v3425_v44 = vsel %vm641_vm2, %v647_v31, %v3392_v34 }
  0x2b   : > { %484 = vst.msk [vmem:[#allocation2 + $0x109] sm:$0xff] %vm463_vm1, %v450_v23  ;;  %485 = vst.msk [vmem:[#allocation2 + $0x111] sm:$0xff] %vm463_vm1, %v451_v24  ;;  %v3417_v42 = vld [vmem:[#allocation2 + $0x40] sm:$0x3]  ;;  %v3433_v46 = vld [vmem:[#allocation2 + $0x78] sm:$0xff]  ;;  %726 = vrot.lane.b32.xlu1 %v3425_v44, %s3172_s29  ;;  %v3439_v47 = vsel %vm641_vm2, %v657_v35, %v3398_v36  ;;  %v662_v48 = vrot.slane %v3406_v38, 1 }
  0x2c   : > { %565 = vst.msk [vmem:[#allocation3 + $0x20] sm:$0xff] %vm463_vm1, %v3365_v25  ;;  %566 = vst.msk [vmem:[#allocation3 + $0x28] sm:$0xff] %vm463_vm1, %v3367_v26  ;;  %v3419_v43 = vld [vmem:[#allocation2] sm:$0xff]  ;;  %v3429_v45 = vld [vmem:[#allocation2 + $0x8] sm:$0xff]  ;;  %v3443_v49 = vrot.slane %v3413_v41, 1  ;;  %v651_v51 = vsel %vm641_vm2, %v3392_v34, %v650_v40  ;;  %v655_v52 = vrot.slane %v3417_v42, 1 }
  0x2d   : > { %563 = vst.msk [vmem:[#allocation3 + $0x10] sm:$0xff] %vm463_vm1, %v3369_v27  ;;  %564 = vst.msk [vmem:[#allocation3 + $0x18] sm:$0xff] %vm463_vm1, %v3382_v30  ;;  %v3447_v50 = vld [vmem:[#allocation2 + $0x80] sm:$0xff]  ;;  %v3456_v53 = vld [vmem:[#allocation2 + $0x58] sm:$0x3]  ;;  %v642_v60 = vrot.slane %v3419_v43, 1 }
  0x2e   : > { %4972 = vst [vmem:[#allocation4_spill] sm:$0xff] %v3398_v36  ;;  %567 = vst.msk [vmem:[#allocation3 + $0x30] sm:$0xff] %vm463_vm1, %v3387_v32  ;;  %v3458_v54 = vld [vmem:[#allocation2 + $0x90] sm:$0xff]  ;;  %v3460_v55 = vld [vmem:[#allocation2 + $0x98] sm:$0xff]  ;;  %734 = vrot.lane.b32.xlu0 %v3439_v47, %s3172_s29  ;;  %v3477_v59 = vsel %vm641_vm2, %v662_v48, %v3443_v49  ;;  %v643_v61 = vrot.slane %v3429_v45, 1  ;;  %v656_v1 = vsel %vm641_vm2, %v3376_v29, %v655_v52  ;;  %v660_v2 = vrot.slane %v3456_v53, 1 }
  0x2f   : > { %568 = vst.msk [vmem:[#allocation3 + $0x38] sm:$0xff] %vm463_vm1, %v3389_v33  ;;  %569 = vst.msk [vmem:[#allocation3 + $0x40] sm:$0xff] %vm463_vm1, %v3406_v38  ;;  %v3468_v56 = vld [vmem:[#allocation2 + $0xa8] sm:$0xff]  ;;  %v3470_v57 = vld [vmem:[#allocation2 + $0xb0] sm:$0xff]  ;;  %728 = vrot.lane.b32.xlu1 %v651_v51, %s3172_s29  ;;  %v667_v24 = vrot.slane %v3433_v46, 1  ;;  %v3553_v28 = vrot.slane %v3447_v50, 1 }
  0x30   : > { %570 = vst.msk [vmem:[#allocation3 + $0x48] sm:$0xff] %vm463_vm1, %v3413_v41  ;;  %561 = vst.msk [vmem:[#allocation3] sm:$0xff] %vm463_vm1, %v3419_v43  ;;  %v3472_v58 = vld [vmem:[#allocation2 + $0xc0] sm:$0xff]  ;;  %v3485_v62 = vld [vmem:[#allocation2 + $0xc8] sm:$0xff]  ;;  %v644_v10 = vsel %vm641_vm2, %v642_v60, %v643_v61  ;;  %v661_v15 = vsel %vm641_vm2, %v3398_v36, %v660_v2  ;;  %v672_v51 = vrot.slane %v3458_v54, 1  ;;  %v3568_v52 = vrot.slane %v3460_v55, 1 }
  0x31   : > { %4973 = vst [vmem:[#allocation5_spill] sm:$0xff] %v3439_v47  ;;  %4974 = vst [vmem:[#allocation6_spill] sm:$0xff] %v3443_v49  ;;  %v3489_v63 = vld [vmem:[#allocation2 + $0xd8] sm:$0xff]  ;;  %v3494_v3 = vld [vmem:[#allocation2 + $0x10] sm:$0x3]  ;;  %v3564_v48 = vsel %vm641_vm2, %v667_v24, %v3553_v28 }
  0x32   : > { %562 = vst.msk [vmem:[#allocation3 + $0x8] sm:$0xff] %vm463_vm1, %v3429_v45  ;;  %571 = vst.msk [vmem:[#allocation3 + $0x50] sm:$0xff] %vm463_vm1, %v3433_v46  ;;  %v3498_v4 = vld [vmem:[#allocation2 + $0xe0] sm:$0xff]  ;;  %v3502_v5 = vld [vmem:[#allocation2 + $0xf0] sm:$0xff]  ;;  %738 = vrot.lane.b32.xlu0 %v3477_v59, %s3172_s29  ;;  %v645_v11 = vrot.slane %v3494_v3, 1 }
  0x33   : > { %572 = vst.msk [vmem:[#allocation3 + $0x58] sm:$0xff] %vm463_vm1, %v3447_v50  ;;  %573 = vst.msk [vmem:[#allocation3 + $0x60] sm:$0xff] %vm463_vm1, %v3458_v54  ;;  %v3504_v6 = vld [vmem:[#allocation2 + $0x70] sm:$0x3]  ;;  %v3508_v7 = vld [vmem:[#allocation2 + $0xf8] sm:$0xff]  ;;  %732 = vrot.lane.b32.xlu1 %v656_v1, %s3172_s29  ;;  %v3648_v0 = vrot.slane %v3498_v4, 1 }
  0x34   : > { %574 = vst.msk [vmem:[#allocation3 + $0x68] sm:$0xff] %vm463_vm1, %v3460_v55  ;;  %4975 = vst [vmem:[#allocation7_spill] sm:$0xff] %v3477_v59  ;;  %v3516_v8 = vld [vmem:[#allocation2 + $0x108] sm:$0xff]  ;;  %v3518_v9 = vld [vmem:[#allocation2 + $0x110] sm:$0xff]  ;;  %v665_v16 = vrot.slane %v3504_v6, 1  ;;  %v646_v23 = vsel %vm641_vm2, %v643_v61, %v645_v11 }
  0x35   : > { %575 = vst.msk [vmem:[#allocation3 + $0x70] sm:$0xff] %vm463_vm1, %v3468_v56  ;;  %576 = vst.msk [vmem:[#allocation3 + $0x78] sm:$0xff] %vm463_vm1, %v3470_v57  ;;  %v3523_v12 = vld [vmem:[#allocation2 + $0x88] sm:$0x3]  ;;  %v452_v13 = vld [vmem:[%s3312_s25 + $0xb0] sm:$0xff] }
  0x36   : > { %577 = vst.msk [vmem:[#allocation3 + $0x80] sm:$0xff] %vm463_vm1, %v3472_v58  ;;  %578 = vst.msk [vmem:[#allocation3 + $0x88] sm:$0xff] %vm463_vm1, %v3485_v62  ;;  %v453_v14 = vld [vmem:[%s3312_s25 + $0xb8] sm:$0xff]  ;;  %v454_v17 = vld [vmem:[%s3312_s25 + $0xc0] sm:$0xff]  ;;  %722 = vrot.lane.b32.xlu0 %v644_v10, %s3172_s29  ;;  %v666_v31 = vsel %vm641_vm2, %v3443_v49, %v665_v16  ;;  %v670_v35 = vrot.slane %v3523_v12, 1 }
  0x37   : > { %579 = vst.msk [vmem:[#allocation3 + $0x90] sm:$0xff] %vm463_vm1, %v3489_v63  ;;  %580 = vst.msk [vmem:[#allocation3 + $0x98] sm:$0xff] %vm463_vm1, %v3498_v4  ;;  %v455_v18 = vld [vmem:[%s3312_s25 + $0xc8] sm:$0xff]  ;;  %v456_v19 = vld [vmem:[%s3312_s25 + $0xd0] sm:$0xff]  ;;  %736 = vrot.lane.b32.xlu1 %v661_v15, %s3172_s29 }
  0x38   : > { %581 = vst.msk [vmem:[#allocation3 + $0xa0] sm:$0xff] %vm463_vm1, %v3502_v5  ;;  %582 = vst.msk [vmem:[#allocation3 + $0xa8] sm:$0xff] %vm463_vm1, %v3508_v7  ;;  %v457_v20 = vld [vmem:[%s3312_s25 + $0xd8] sm:$0xff]  ;;  %v458_v21 = vld [vmem:[%s3312_s25 + $0xe0] sm:$0xff]  ;;  %v671_v1 = vsel %vm641_vm2, %v3553_v28, %v670_v35  ;;  %v3632_v35 = vrot.slane %v3485_v62, 1 }
  0x39   : > { %583 = vst.msk [vmem:[#allocation3 + $0xb0] sm:$0xff] %vm463_vm1, %v3516_v8  ;;  %584 = vst.msk [vmem:[#allocation3 + $0xb8] sm:$0xff] %vm463_vm1, %v3518_v9  ;;  %v459_v22 = vld [vmem:[%s3312_s25 + $0xe8] sm:$0xff]  ;;  %v3558_v40 = vld [vmem:[#allocation2 + $0xa0] sm:$0x3] }
  0x3a   : > { %486 = vst.msk [vmem:[#allocation2 + $0x121] sm:$0xff] %vm463_vm1, %v452_v13  ;;  %487 = vst.msk [vmem:[#allocation2 + $0x129] sm:$0xff] %vm463_vm1, %v453_v14  ;;  %724 = vrot.lane.b32.xlu0 %v646_v23, %s3172_s29  ;;  %v675_v2 = vrot.slane %v3558_v40, 1  ;;  %v3587_v14 = vld [vmem:[#allocation2 + $0xb8] sm:$0x3] }
  0x3b   : > { %488 = vst.msk [vmem:[#allocation2 + $0x139] sm:$0xff] %vm463_vm1, %v454_v17  ;;  %489 = vst.msk [vmem:[#allocation2 + $0x141] sm:$0xff] %vm463_vm1, %v455_v18  ;;  %740 = vrot.lane.b32.xlu1 %v666_v31, %s3172_s29  ;;  %v3608_v18 = vsel %vm641_vm2, %v672_v51, %v3568_v52  ;;  %v3621_v23 = vld [vmem:[#allocation2 + $0xd0] sm:$0x3]  ;;  %v682_v31 = vrot.slane %v3472_v58, 1 }
  0x3c   : > { %490 = vst.msk [vmem:[#allocation2 + $0x151] sm:$0xff] %vm463_vm1, %v456_v19  ;;  %491 = vst.msk [vmem:[#allocation2 + $0x159] sm:$0xff] %vm463_vm1, %v457_v20  ;;  %v677_v19 = vrot.slane %v3468_v56, 1  ;;  %v3612_v20 = vrot.slane %v3470_v57, 1 }
  0x3d   : > { %492 = vst.msk [vmem:[#allocation2 + $0x169] sm:$0xff] %vm463_vm1, %v458_v21  ;;  %493 = vst.msk [vmem:[#allocation2 + $0x171] sm:$0xff] %vm463_vm1, %v459_v22  ;;  %v676_v21 = vsel %vm641_vm2, %v3568_v52, %v675_v2  ;;  %v680_v22 = vrot.slane %v3587_v14, 1  ;;  %v3637_v2 = vld [vmem:[#allocation2 + $0xe8] sm:$0x3] }
  0x3e   : > { %4976 = vst [vmem:[#allocation8_spill] sm:$0xff] %v3553_v28  ;;  %4977 = vst [vmem:[#allocation9_spill] sm:$0xff] %v3564_v48  ;;  %742 = vrot.lane.b32.xlu0 %v3564_v48, %s3172_s29  ;;  %v3628_v24 = vsel %vm641_vm2, %v677_v19, %v3612_v20  ;;  %v3644_v19 = vsel %vm641_vm2, %v682_v31, %v3632_v35 }
  0x3f   : > { %4978 = vst [vmem:[#allocation10_spill] sm:$0xff] %v3568_v52  ;;  %744 = vrot.lane.b32.xlu1 %v671_v1, %s3172_s29  ;;  %4979 = vst [vmem:[#allocation11_spill] sm:$0xff] %v3608_v18  ;;  %v681_v51 = vsel %vm641_vm2, %v3612_v20, %v680_v22  ;;  %v685_v1 = vrot.slane %v3621_v23, 1  ;;  %v3653_v52 = vld [vmem:[#allocation2 + $0x100] sm:$0x3] }
  0x40   : > { %4980 = vst [vmem:[#allocation12_spill] sm:$0xff] %v3612_v20  ;;  %4981 = vst [vmem:[#allocation13_spill] sm:$0xff] %v3628_v24  ;;  %v690_v20 = vrot.slane %v3637_v2, 1 }
  0x41   : > { %v3570_v60 = vld [vmem:[#allocation2 + $0x120] sm:$0xff]  ;;  %v3572_v61 = vld [vmem:[#allocation2 + $0x128] sm:$0xff]  ;;  %4982 = vst [vmem:[#allocation14_spill] sm:$0xff] %v3632_v35  ;;  %4983 = vst [vmem:[#allocation15_spill] sm:$0xff] %v3644_v19  ;;  %v686_v22 = vsel %vm641_vm2, %v3632_v35, %v685_v1  ;;  %v695_v35 = vrot.slane %v3653_v52, 1 }
  0x42   : > { %585 = vst.msk [vmem:[#allocation3 + $0xc0] sm:$0xff] %vm463_vm1, %v3570_v60  ;;  %586 = vst.msk [vmem:[#allocation3 + $0xc8] sm:$0xff] %vm463_vm1, %v3572_v61  ;;  %v3581_v10 = vld [vmem:[#allocation2 + $0x138] sm:$0xff]  ;;  %v3583_v11 = vld [vmem:[#allocation2 + $0x140] sm:$0xff]  ;;  %746 = vrot.lane.b32.xlu0 %v3608_v18, %s3172_s29  ;;  %v691_v1 = vsel %vm641_vm2, %v3648_v0, %v690_v20 }
  0x43   : > { %v3585_v13 = vld [vmem:[#allocation2 + $0x150] sm:$0xff]  ;;  %587 = vst.msk [vmem:[#allocation3 + $0xd0] sm:$0xff] %vm463_vm1, %v3581_v10  ;;  %588 = vst.msk [vmem:[#allocation3 + $0xd8] sm:$0xff] %vm463_vm1, %v3583_v11  ;;  %v3593_v15 = vld [vmem:[#allocation2 + $0x158] sm:$0xff]  ;;  %748 = vrot.lane.b32.xlu1 %v676_v21, %s3172_s29  ;;  %v687_v21 = vrot.slane %v3489_v63, 1 }
  0x44   : > { %589 = vst.msk [vmem:[#allocation3 + $0xe0] sm:$0xff] %vm463_vm1, %v3585_v13  ;;  %590 = vst.msk [vmem:[#allocation3 + $0xe8] sm:$0xff] %vm463_vm1, %v3593_v15  ;;  %v3601_v16 = vld [vmem:[#allocation2 + $0x168] sm:$0xff]  ;;  %v3603_v17 = vld [vmem:[#allocation2 + $0x170] sm:$0xff] }
  0x45   : > { %591 = vst.msk [vmem:[#allocation3 + $0xf0] sm:$0xff] %vm463_vm1, %v3601_v16  ;;  %592 = vst.msk [vmem:[#allocation3 + $0xf8] sm:$0xff] %vm463_vm1, %v3603_v17  ;;  %v3660_v31 = vsel %vm641_vm2, %v687_v21, %v3648_v0  ;;  %v3669_v18 = vld [vmem:[#allocation2 + $0x118] sm:$0x3]  ;;  %v3687_v48 = vld [vmem:[#allocation2 + $0x130] sm:$0x3] }
  0x46   : > { %750 = vrot.lane.b32.xlu0 %v3628_v24, %s3172_s29  ;;  %4984 = vst [vmem:[#allocation16_spill] sm:$0xff] %v3648_v0  ;;  %4985 = vst [vmem:[#allocation17_spill] sm:$0xff] %v3660_v31  ;;  %v3664_v24 = vrot.slane %v3508_v7, 1  ;;  %v700_v0 = vrot.slane %v3669_v18, 1  ;;  %v3703_v28 = vld [vmem:[#allocation2 + $0x148] sm:$0x3] }
  0x47   : > { %752 = vrot.lane.b32.xlu1 %v681_v51, %s3172_s29  ;;  %v4944_v51 = vrot.slane %v3502_v5, 1  ;;  %v3719_v59 = vld [vmem:[#allocation2 + $0x160] sm:$0x3]  ;;  %v3735_v49 = vld [vmem:[#allocation2 + $0x178] sm:$0x3]  ;;  %v717_v47 = vrot.slane %v3601_v16, 1 }
  0x48   : > { %4986 = vst [vmem:[#allocation18_spill] sm:$0xff] %v3664_v24  ;;  %v696_v20 = vsel %vm641_vm2, %v3664_v24, %v695_v35  ;;  %v3748_v36 = vrot.slane %v3603_v17, 1 }
  0x49   : > { %v3678_v21 = vsel %vm641_vm2, %v4944_v51, %v3664_v24  ;;  %v702_v51 = vrot.slane %v3570_v60, 1  ;;  %v705_v24 = vrot.slane %v3687_v48, 1 }
  0x4a   : > { %754 = vrot.lane.b32.xlu0 %v3644_v19, %s3172_s29  ;;  %4987 = vst [vmem:[#allocation19_spill] sm:$0xff] %v3678_v21  ;;  %v3682_v19 = vrot.slane %v3518_v9, 1  ;;  %4995 = vst [vmem:[#allocation27_spill] sm:$0xff] %v3748_v36 }
  0x4b   : > { %756 = vrot.lane.b32.xlu1 %v686_v22, %s3172_s29  ;;  %v697_v22 = vrot.slane %v3516_v8, 1 }
  0x4c   : > { %4988 = vst [vmem:[#allocation20_spill] sm:$0xff] %v3682_v19  ;;  %v701_v35 = vsel %vm641_vm2, %v3682_v19, %v700_v0 }
  0x4e   : > { %758 = vrot.lane.b32.xlu0 %v3660_v31, %s3172_s29  ;;  %v3698_v31 = vrot.slane %v3572_v61, 1 }
  0x4f   : > { %760 = vrot.lane.b32.xlu1 %v691_v1, %s3172_s29  ;;  %v3694_v1 = vsel %vm641_vm2, %v697_v22, %v3682_v19  ;;  %v710_v19 = vrot.slane %v3703_v28, 1 }
  0x50   : > { %4989 = vst [vmem:[#allocation21_spill] sm:$0xff] %v3694_v1  ;;  %4990 = vst [vmem:[#allocation22_spill] sm:$0xff] %v3698_v31  ;;  %v3710_v22 = vsel %vm641_vm2, %v702_v51, %v3698_v31  ;;  %v706_v0 = vsel %vm641_vm2, %v3698_v31, %v705_v24  ;;  %v715_v31 = vrot.slane %v3719_v59, 1 }
  0x51   : > { %4991 = vst [vmem:[#allocation23_spill] sm:$0xff] %v3710_v22 }
  0x52   : > { %762 = vrot.lane.b32.xlu0 %v3678_v21, %s3172_s29  ;;  %v3714_v21 = vrot.slane %v3583_v11, 1 }
  0x53   : > { %764 = vrot.lane.b32.xlu1 %v696_v20, %s3172_s29  ;;  %v707_v20 = vrot.slane %v3581_v10, 1 }
  0x54   : > { %4992 = vst [vmem:[#allocation24_spill] sm:$0xff] %v3714_v21  ;;  %v711_v24 = vsel %vm641_vm2, %v3714_v21, %v710_v19 }
  0x55   : > { %v3726_v51 = vsel %vm641_vm2, %v707_v20, %v3714_v21  ;;  %v720_v21 = vrot.slane %v3735_v49, 1 }
  0x56   : > { %766 = vrot.lane.b32.xlu0 %v3694_v1, %s3172_s29  ;;  %v3730_v1 = vrot.slane %v3593_v15, 1 }
  0x57   : > { %768 = vrot.lane.b32.xlu1 %v701_v35, %s3172_s29  ;;  %v712_v35 = vrot.slane %v3585_v13, 1 }
  0x58   : > { %4993 = vst [vmem:[#allocation25_spill] sm:$0xff] %v3730_v1  ;;  %v716_v19 = vsel %vm641_vm2, %v3730_v1, %v715_v31  ;;  %v855_v31 = vrot.slane %v3494_v3, 2 }
  0x59   : > { %v3744_v20 = vsel %vm641_vm2, %v712_v35, %v3730_v1  ;;  %v3760_v35 = vsel %vm641_vm2, %v717_v47, %v3748_v36  ;;  %v857_v47 = vrot.slane %v3369_v27, 2  ;;  %v3773_v1 = vrot.slane %v3382_v30, 2 }
  0x5a   : > { %770 = vrot.lane.b32.xlu0 %v3710_v22, %s3172_s29  ;;  %v461_v22 = vld [vmem:[%s3312_s25 + $0xf8] sm:$0xff]  ;;  %4994 = vst [vmem:[#allocation26_spill] sm:$0xff] %v3744_v20  ;;  %4996 = vst [vmem:[#allocation28_spill] sm:$0xff] %v3760_v35 }
  0x5b   : > { %772 = vrot.lane.b32.xlu1 %v706_v0, %s3172_s29  ;;  %v460_v0 = vld [vmem:[%s3312_s25 + $0xf0] sm:$0xff]  ;;  %495 = vst.msk [vmem:[#allocation2 + $0x189] sm:$0xff] %vm463_vm1, %v461_v22  ;;  %v721_v22 = vsel %vm641_vm2, %v3748_v36, %v720_v21  ;;  %v3781_v3 = vsel %vm851_vm3, %v857_v47, %v3773_v1  ;;  %v862_v21 = vrot.slane %v3365_v25, 2 }
  0x5c   : > { %494 = vst.msk [vmem:[#allocation2 + $0x181] sm:$0xff] %vm463_vm1, %v460_v0  ;;  %v853_v0 = vrot.slane %v3429_v45, 2  ;;  %v860_v45 = vrot.slane %v3404_v37, 2 }
  0x5e   : > { %774 = vrot.lane.b32.xlu0 %v3726_v51, %s3172_s29 }
  0x5f   : > { %776 = vrot.lane.b32.xlu1 %v711_v24, %s3172_s29  ;;  %v852_v24 = vrot.slane %v3419_v43, 2  ;;  %v856_v43 = vsel %vm851_vm3, %v853_v0, %v855_v31  ;;  %v867_v31 = vrot.slane %v3387_v32, 2 }
  0x62   : > { %778 = vrot.lane.b32.xlu0 %v3744_v20, %s3172_s29 }
  0x63   : > { %780 = vrot.lane.b32.xlu1 %v716_v19, %s3172_s29  ;;  %v854_v19 = vsel %vm851_vm3, %v852_v24, %v853_v0  ;;  %v3785_v24 = vrot.slane %v3367_v26, 2  ;;  %v865_v0 = vrot.slane %v3417_v42, 2 }
  0x65   : > { %v3795_v37 = vsel %vm851_vm3, %v862_v21, %v3785_v24  ;;  %v866_v47 = vsel %vm851_vm3, %v3785_v24, %v865_v0  ;;  %v3813_v21 = vrot.slane %v3413_v41, 2  ;;  %v875_v0 = vrot.slane %v3504_v6, 2 }
  0x66   : > { %782 = vrot.lane.b32.xlu0 %v3760_v35, %s3172_s29 }
  0x67   : > { %784 = vrot.lane.b32.xlu1 %v721_v22, %s3172_s29  ;;  %v861_v22 = vsel %vm851_vm3, %v3773_v1, %v860_v45  ;;  %v872_v45 = vrot.slane %v3406_v38, 2  ;;  %v876_v36 = vsel %vm851_vm3, %v3813_v21, %v875_v0  ;;  %v885_v0 = vrot.slane %v3558_v40, 2  ;;  %s377_s29 = scalar_lea.vmem %s4930_s2, %s3004_s26 }
  0x6a   : > { %932 = vrot.lane.b32.xlu0 %v854_v19, %s3173_s30  ;;  %v3799_v19 = vrot.slane %v3389_v33, 2 }
  0x6b   : > { %934 = vrot.lane.b32.xlu1 %v856_v43, %s3173_s30  ;;  %v870_v43 = vrot.slane %v3456_v53, 2  ;;  %v3823_v53 = vsel %vm851_vm3, %v872_v45, %v3813_v21  ;;  %v882_v45 = vrot.slane %v3458_v54, 2 }
  0x6c   : > { %v3809_v42 = vsel %vm851_vm3, %v867_v31, %v3799_v19  ;;  %v877_v31 = vrot.slane %v3433_v46, 2 }
  0x6e   : > { %936 = vrot.lane.b32.xlu0 %v3781_v3, %s3173_s30 }
  0x6f   : > { %938 = vrot.lane.b32.xlu1 %v861_v22, %s3173_s30  ;;  %v871_v22 = vsel %vm851_vm3, %v3799_v19, %v870_v43  ;;  %v880_v43 = vrot.slane %v3523_v12, 2  ;;  %v887_v12 = vrot.slane %v3468_v56, 2 }
  0x72   : > { %940 = vrot.lane.b32.xlu0 %v3795_v37, %s3173_s30 }
  0x73   : > { %942 = vrot.lane.b32.xlu1 %v866_v47, %s3173_s30  ;;  %v3827_v47 = vrot.slane %v3447_v50, 2 }
  0x75   : > { %4997 = vst [vmem:[#allocation29_spill] sm:$0xff] %v3827_v47  ;;  %v3837_v6 = vsel %vm851_vm3, %v877_v31, %v3827_v47  ;;  %v881_v35 = vsel %vm851_vm3, %v3827_v47, %v880_v43  ;;  %v3855_v31 = vrot.slane %v3470_v57, 2  ;;  %v890_v43 = vrot.slane %v3587_v14, 2 }
  0x76   : > { %944 = vrot.lane.b32.xlu0 %v3809_v42, %s3173_s30  ;;  %4998 = vst [vmem:[#allocation30_spill] sm:$0xff] %v3837_v6 }
  0x77   : > { %946 = vrot.lane.b32.xlu1 %v871_v22, %s3173_s30  ;;  %v3841_v22 = vrot.slane %v3460_v55, 2  ;;  %5001 = vst [vmem:[#allocation33_spill] sm:$0xff] %v3855_v31  ;;  %v3865_v40 = vsel %vm851_vm3, %v887_v12, %v3855_v31  ;;  %v891_v47 = vsel %vm851_vm3, %v3855_v31, %v890_v43  ;;  %v3883_v12 = vrot.slane %v3498_v4, 2 }
  0x78   : > { %5002 = vst [vmem:[#allocation34_spill] sm:$0xff] %v3865_v40  ;;  %v900_v43 = vrot.slane %v3637_v2, 2 }
  0x79   : > { %4999 = vst [vmem:[#allocation31_spill] sm:$0xff] %v3841_v22  ;;  %v886_v20 = vsel %vm851_vm3, %v3841_v22, %v885_v0  ;;  %v895_v0 = vrot.slane %v3621_v23, 2 }
  0x7a   : > { %948 = vrot.lane.b32.xlu0 %v3823_v53, %s3173_s30  ;;  %v901_v31 = vsel %vm851_vm3, %v3883_v12, %v900_v43 }
  0x7b   : > { %950 = vrot.lane.b32.xlu1 %v876_v36, %s3173_s30  ;;  %v3851_v36 = vsel %vm851_vm3, %v882_v45, %v3841_v22  ;;  %v3869_v45 = vrot.slane %v3485_v62, 2 }
  0x7c   : > { %5000 = vst [vmem:[#allocation32_spill] sm:$0xff] %v3851_v36 }
  0x7d   : > { %5003 = vst [vmem:[#allocation35_spill] sm:$0xff] %v3869_v45  ;;  %v896_v22 = vsel %vm851_vm3, %v3869_v45, %v895_v0  ;;  %v905_v0 = vrot.slane %v3653_v52, 2  ;;  %v910_v52 = vrot.slane %v3669_v18, 2 }
  0x7e   : > { %952 = vrot.lane.b32.xlu0 %v3837_v6, %s3173_s30 }
  0x7f   : > { %954 = vrot.lane.b32.xlu1 %v881_v35, %s3173_s30  ;;  %v892_v35 = vrot.slane %v3472_v58, 2 }
  0x81   : > { %v3879_v14 = vsel %vm851_vm3, %v892_v35, %v3869_v45  ;;  %v3897_v35 = vrot.slane %v3508_v7, 2  ;;  %v3927_v45 = vrot.slane %v3572_v61, 2 }
  0x82   : > { %956 = vrot.lane.b32.xlu0 %v3851_v36, %s3173_s30  ;;  %5004 = vst [vmem:[#allocation36_spill] sm:$0xff] %v3879_v14 }
  0x83   : > { %958 = vrot.lane.b32.xlu1 %v886_v20, %s3173_s30  ;;  %v897_v20 = vrot.slane %v3489_v63, 2  ;;  %v906_v43 = vsel %vm851_vm3, %v3897_v35, %v905_v0  ;;  %v915_v0 = vrot.slane %v3687_v48, 2 }
  0x85   : > { %v3893_v23 = vsel %vm851_vm3, %v897_v20, %v3883_v12  ;;  %v3913_v20 = vrot.slane %v3518_v9, 2 }
  0x86   : > { %960 = vrot.lane.b32.xlu0 %v3865_v40, %s3173_s30  ;;  %v916_v40 = vsel %vm851_vm3, %v3927_v45, %v915_v0 }
  0x87   : > { %962 = vrot.lane.b32.xlu1 %v891_v47, %s3173_s30  ;;  %v4965_v47 = vrot.slane %v3502_v5, 2 }
  0x89   : > { %v3909_v2 = vsel %vm851_vm3, %v4965_v47, %v3897_v35  ;;  %v912_v47 = vrot.slane %v3570_v60, 2 }
  0x8a   : > { %964 = vrot.lane.b32.xlu0 %v3879_v14, %s3173_s30  ;;  %v911_v14 = vsel %vm851_vm3, %v3913_v20, %v910_v52  ;;  %v920_v52 = vrot.slane %v3703_v28, 2  ;;  %v925_v28 = vrot.slane %v3719_v59, 2 }
  0x8b   : > { %966 = vrot.lane.b32.xlu1 %v896_v22, %s3173_s30  ;;  %v907_v22 = vrot.slane %v3516_v8, 2  ;;  %v3937_v18 = vsel %vm851_vm3, %v912_v47, %v3927_v45  ;;  %v3955_v47 = vrot.slane %v3593_v15, 2 }
  0x8e   : > { %968 = vrot.lane.b32.xlu0 %v3893_v23, %s3173_s30 }
  0x8f   : > { %970 = vrot.lane.b32.xlu1 %v901_v31, %s3173_s30  ;;  %v3923_v31 = vsel %vm851_vm3, %v907_v22, %v3913_v20  ;;  %v917_v22 = vrot.slane %v3581_v10, 2 }
  0x92   : > { %972 = vrot.lane.b32.xlu0 %v3909_v2, %s3173_s30 }
  0x93   : > { %974 = vrot.lane.b32.xlu1 %v906_v43, %s3173_s30  ;;  %v3941_v43 = vrot.slane %v3583_v11, 2 }
  0x95   : > { %5005 = vst [vmem:[#allocation37_spill] sm:$0xff] %v3941_v43  ;;  %v3951_v48 = vsel %vm851_vm3, %v917_v22, %v3941_v43  ;;  %v921_v0 = vsel %vm851_vm3, %v3941_v43, %v920_v52  ;;  %v927_v22 = vrot.slane %v3601_v16, 2  ;;  %v3971_v52 = vrot.slane %v3603_v17, 2 }
  0x96   : > { %976 = vrot.lane.b32.xlu0 %v3923_v31, %s3173_s30 }
  0x97   : > { %978 = vrot.lane.b32.xlu1 %v911_v14, %s3173_s30  ;;  %v922_v14 = vrot.slane %v3585_v13, 2 }
  0x9a   : > { %980 = vrot.lane.b32.xlu0 %v3937_v18, %s3173_s30 }
  0x9b   : > { %982 = vrot.lane.b32.xlu1 %v916_v40, %s3173_s30  ;;  %v3967_v40 = vsel %vm851_vm3, %v922_v14, %v3955_v47  ;;  %v3983_v14 = vsel %vm851_vm3, %v927_v22, %v3971_v52 }
  0x9c   : > { %v731_v36 = vpop.permute.xlu0 %730 }
  0x9d   : > { %823 = vst.msk [vmem:[#allocation3 + $0x20] sm:$0xff] %vm818_vm4, %v731_v36  ;;  %v727_v6 = vpop.permute.xlu1 %726  ;;  %v926_v36 = vsel %vm851_vm3, %v3955_v47, %v925_v28 }
  0x9e   : > { %821 = vst.msk [vmem:[#allocation3 + $0x10] sm:$0xff] %vm818_vm4, %v727_v6  ;;  %984 = vrot.lane.b32.xlu0 %v3951_v48, %s3173_s30  ;;  %v930_v6 = vrot.slane %v3735_v49, 2 }
  0x9f   : > { %986 = vrot.lane.b32.xlu1 %v921_v0, %s3173_s30 }
  0xa0   : > { %v735_v59 = vpop.permute.xlu0 %734  ;;  %v931_v28 = vsel %vm851_vm3, %v3971_v52, %v930_v6 }
  0xa1   : > { %825 = vst.msk [vmem:[#allocation3 + $0x30] sm:$0xff] %vm818_vm4, %v735_v59  ;;  %v729_v43 = vpop.permute.xlu1 %728 }
  0xa2   : > { %822 = vst.msk [vmem:[#allocation3 + $0x18] sm:$0xff] %vm818_vm4, %v729_v43  ;;  %988 = vrot.lane.b32.xlu0 %v3967_v40, %s3173_s30 }
  0xa3   : > { %990 = vrot.lane.b32.xlu1 %v926_v36, %s3173_s30 }
  0xa4   : > { %v739_v0 = vpop.permute.xlu0 %738 }
  0xa5   : > { %827 = vst.msk [vmem:[#allocation3 + $0x40] sm:$0xff] %vm818_vm4, %v739_v0  ;;  %v733_v49 = vpop.permute.xlu1 %732 }
  0xa6   : > { %824 = vst.msk [vmem:[#allocation3 + $0x28] sm:$0xff] %vm818_vm4, %v733_v49  ;;  %992 = vrot.lane.b32.xlu0 %v3983_v14, %s3173_s30 }
  0xa7   : > { %994 = vrot.lane.b32.xlu1 %v931_v28, %s3173_s30 }
  0xa8   : > { %v723_v43 = vpop.permute.xlu0 %722 }
  0xa9   : > { %819 = vst.msk [vmem:[#allocation3] sm:$0xff] %vm818_vm4, %v723_v43  ;;  %v737_v59 = vpop.permute.xlu1 %736 }
  0xaa   : > { %826 = vst.msk [vmem:[#allocation3 + $0x38] sm:$0xff] %vm818_vm4, %v737_v59  ;;  %1141 = vrot.lane.b32.xlu0 %v3369_v27, %s3174_s6  ;;  %v4086_v59 = vld [vmem:[#allocation2 + $0x40] sm:$0x3] }
  0xab   : > { %1143 = vrot.lane.b32.xlu1 %v3382_v30, %s3174_s6 }
  0xac   : > { %v725_v22 = vpop.permute.xlu0 %724 }
  0xad   : > { %820 = vst.msk [vmem:[#allocation3 + $0x8] sm:$0xff] %vm818_vm4, %v725_v22  ;;  %v741_v36 = vpop.permute.xlu1 %740  ;;  %v1294_v22 = vrot.slane %v4086_v59, 1 }
  0xae   : > { %828 = vst.msk [vmem:[#allocation3 + $0x48] sm:$0xff] %vm818_vm4, %v741_v36  ;;  %1145 = vrot.lane.b32.xlu0 %v3365_v25, %s3174_s6 }
  0xaf   : > { %1147 = vrot.lane.b32.xlu1 %v3367_v26, %s3174_s6 }
  0xb0   : > { %v743_v6 = vpop.permute.xlu0 %742 }
  0xb1   : > { %829 = vst.msk [vmem:[#allocation3 + $0x50] sm:$0xff] %vm818_vm4, %v743_v6  ;;  %v745_v0 = vpop.permute.xlu1 %744  ;;  %v4095_v6 = vld [vmem:[#allocation2 + $0x58] sm:$0x3] }
  0xb2   : > { %830 = vst.msk [vmem:[#allocation3 + $0x58] sm:$0xff] %vm818_vm4, %v745_v0  ;;  %1149 = vrot.lane.b32.xlu0 %v3387_v32, %s3174_s6 }
  0xb3   : > { %1151 = vrot.lane.b32.xlu1 %v3389_v33, %s3174_s6 }
  0xb4   : > { %v747_v27 = vpop.permute.xlu0 %746 }
  0xb5   : > { %831 = vst.msk [vmem:[#allocation3 + $0x60] sm:$0xff] %vm818_vm4, %v747_v27  ;;  %v749_v30 = vpop.permute.xlu1 %748  ;;  %v1295_v27 = vsel %vm641_vm2, %v3376_v29, %v1294_v22 }
  0xb6   : > { %832 = vst.msk [vmem:[#allocation3 + $0x68] sm:$0xff] %vm818_vm4, %v749_v30  ;;  %1153 = vrot.lane.b32.xlu0 %v3406_v38, %s3174_s6 }
  0xb7   : > { %1155 = vrot.lane.b32.xlu1 %v3413_v41, %s3174_s6 }
  0xb8   : > { %v751_v25 = vpop.permute.xlu0 %750 }
  0xb9   : > { %833 = vst.msk [vmem:[#allocation3 + $0x70] sm:$0xff] %vm818_vm4, %v751_v25  ;;  %v753_v26 = vpop.permute.xlu1 %752  ;;  %v4105_v25 = vld [vmem:[#allocation2 + $0x70] sm:$0x3] }
  0xba   : > { %834 = vst.msk [vmem:[#allocation3 + $0x78] sm:$0xff] %vm818_vm4, %v753_v26  ;;  %1157 = vrot.lane.b32.xlu0 %v3433_v46, %s3174_s6  ;;  %v5006_v26 = vld [vmem:[#allocation4_spill] sm:$0xff]  ;;  %v1304_v29 = vrot.slane %v4105_v25, 1 }
  0xbb   : > { %1159 = vrot.lane.b32.xlu1 %v3447_v50, %s3174_s6 }
  0xbc   : > { %v755_v32 = vpop.permute.xlu0 %754 }
  0xbd   : > { %835 = vst.msk [vmem:[#allocation3 + $0x80] sm:$0xff] %vm818_vm4, %v755_v32  ;;  %v757_v33 = vpop.permute.xlu1 %756 }
  0xbe   : > { %836 = vst.msk [vmem:[#allocation3 + $0x88] sm:$0xff] %vm818_vm4, %v757_v33  ;;  %1161 = vrot.lane.b32.xlu0 %v3458_v54, %s3174_s6 }
  0xbf   : > { %1163 = vrot.lane.b32.xlu1 %v3460_v55, %s3174_s6 }
  0xc0   : > { %v759_v38 = vpop.permute.xlu0 %758 }
  0xc1   : > { %837 = vst.msk [vmem:[#allocation3 + $0x90] sm:$0xff] %vm818_vm4, %v759_v38  ;;  %v761_v41 = vpop.permute.xlu1 %760  ;;  %v4115_v38 = vld [vmem:[#allocation2 + $0x88] sm:$0x3] }
  0xc2   : > { %838 = vst.msk [vmem:[#allocation3 + $0x98] sm:$0xff] %vm818_vm4, %v761_v41  ;;  %1165 = vrot.lane.b32.xlu0 %v3468_v56, %s3174_s6  ;;  %v5007_v41 = vld [vmem:[#allocation5_spill] sm:$0xff] }
  0xc3   : > { %1167 = vrot.lane.b32.xlu1 %v3470_v57, %s3174_s6 }
  0xc4   : > { %v763_v46 = vpop.permute.xlu0 %762 }
  0xc5   : > { %839 = vst.msk [vmem:[#allocation3 + $0xa0] sm:$0xff] %vm818_vm4, %v763_v46  ;;  %v765_v50 = vpop.permute.xlu1 %764  ;;  %v5008_v46 = vld [vmem:[#allocation6_spill] sm:$0xff] }
  0xc6   : > { %840 = vst.msk [vmem:[#allocation3 + $0xa8] sm:$0xff] %vm818_vm4, %v765_v50  ;;  %1169 = vrot.lane.b32.xlu0 %v3472_v58, %s3174_s6  ;;  %v1305_v50 = vsel %vm641_vm2, %v5008_v46, %v1304_v29  ;;  %v5015_v46 = vrot.slane %v3502_v5, 1 }
  0xc7   : > { %1171 = vrot.lane.b32.xlu1 %v3485_v62, %s3174_s6 }
  0xc8   : > { %v767_v54 = vpop.permute.xlu0 %766 }
  0xc9   : > { %841 = vst.msk [vmem:[#allocation3 + $0xb0] sm:$0xff] %vm818_vm4, %v767_v54  ;;  %v769_v55 = vpop.permute.xlu1 %768  ;;  %v1309_v54 = vrot.slane %v4115_v38, 1 }
  0xca   : > { %842 = vst.msk [vmem:[#allocation3 + $0xb8] sm:$0xff] %vm818_vm4, %v769_v55  ;;  %1173 = vrot.lane.b32.xlu0 %v3489_v63, %s3174_s6 }
  0xcb   : > { %1175 = vrot.lane.b32.xlu1 %v3498_v4, %s3174_s6 }
  0xcc   : > { %v771_v56 = vpop.permute.xlu0 %770 }
  0xcd   : > { %843 = vst.msk [vmem:[#allocation3 + $0xc0] sm:$0xff] %vm818_vm4, %v771_v56  ;;  %v773_v57 = vpop.permute.xlu1 %772  ;;  %v5009_v56 = vld [vmem:[#allocation7_spill] sm:$0xff] }
  0xce   : > { %844 = vst.msk [vmem:[#allocation3 + $0xc8] sm:$0xff] %vm818_vm4, %v773_v57  ;;  %1177 = vrot.lane.b32.xlu0 %v3502_v5, %s3174_s6 }
  0xcf   : > { %1179 = vrot.lane.b32.xlu1 %v3508_v7, %s3174_s6 }
  0xd0   : > { %v775_v58 = vpop.permute.xlu0 %774 }
  0xd1   : > { %845 = vst.msk [vmem:[#allocation3 + $0xd0] sm:$0xff] %vm818_vm4, %v775_v58  ;;  %v777_v62 = vpop.permute.xlu1 %776  ;;  %v5010_v58 = vld [vmem:[#allocation8_spill] sm:$0xff] }
  0xd2   : > { %846 = vst.msk [vmem:[#allocation3 + $0xd8] sm:$0xff] %vm818_vm4, %v777_v62  ;;  %1181 = vrot.lane.b32.xlu0 %v3516_v8, %s3174_s6  ;;  %v1310_v62 = vsel %vm641_vm2, %v5010_v58, %v1309_v54 }
  0xd3   : > { %1183 = vrot.lane.b32.xlu1 %v3518_v9, %s3174_s6 }
  0xd4   : > { %v779_v63 = vpop.permute.xlu0 %778 }
  0xd5   : > { %847 = vst.msk [vmem:[#allocation3 + $0xe0] sm:$0xff] %vm818_vm4, %v779_v63  ;;  %v781_v4 = vpop.permute.xlu1 %780  ;;  %v1087_v63 = vld [vmem:[#allocation2 + $0xe8] sm:$0x3] }
  0xd6   : > { %848 = vst.msk [vmem:[#allocation3 + $0xe8] sm:$0xff] %vm818_vm4, %v781_v4  ;;  %1185 = vrot.lane.b32.xlu0 %v3570_v60, %s3174_s6 }
  0xd7   : > { %1187 = vrot.lane.b32.xlu1 %v3572_v61, %s3174_s6 }
  0xd8   : > { %v783_v7 = vpop.permute.xlu0 %782 }
  0xd9   : > { %849 = vst.msk [vmem:[#allocation3 + $0xf0] sm:$0xff] %vm818_vm4, %v783_v7  ;;  %v785_v28 = vpop.permute.xlu1 %784  ;;  %v5011_v7 = vld [vmem:[#allocation9_spill] sm:$0xff] }
  0xda   : > { %850 = vst.msk [vmem:[#allocation3 + $0xf8] sm:$0xff] %vm818_vm4, %v785_v28  ;;  %1189 = vrot.lane.b32.xlu0 %v3581_v10, %s3174_s6  ;;  %v4077_v10 = vld [vmem:[#allocation2 + $0x28] sm:$0x3]  ;;  %v1329_v28 = vrot.slane %v1087_v63, 1 }
  0xdb   : > { %1191 = vrot.lane.b32.xlu1 %v3583_v11, %s3174_s6  ;;  %v1106_v11 = vld [vmem:[#allocation2 + $0x180] sm:$0xff]  ;;  %v1289_v43 = vrot.slane %v4077_v10, 1 }
  0xdc   : > { %v933_v8 = vpop.permute.xlu0 %932 }
  0xdd   : > { %1029 = vst.msk [vmem:[#allocation3] sm:$0xff] %vm1028_vm5, %v933_v8  ;;  %v935_v9 = vpop.permute.xlu1 %934 }
  0xde   : > { %1030 = vst.msk [vmem:[#allocation3 + $0x8] sm:$0xff] %vm1028_vm5, %v935_v9  ;;  %1193 = vrot.lane.b32.xlu0 %v3585_v13, %s3174_s6  ;;  %v1107_v13 = vld [vmem:[#allocation2 + $0x188] sm:$0xff] }
  0xdf   : > { %1195 = vrot.lane.b32.xlu1 %v3593_v15, %s3174_s6 }
  0xe0   : > { %v937_v60 = vpop.permute.xlu0 %936 }
  0xe1   : > { %1031 = vst.msk [vmem:[#allocation3 + $0x10] sm:$0xff] %vm1028_vm5, %v937_v60  ;;  %v939_v61 = vpop.permute.xlu1 %938  ;;  %v5012_v60 = vld [vmem:[#allocation11_spill] sm:$0xff] }
  0xe2   : > { %1032 = vst.msk [vmem:[#allocation3 + $0x18] sm:$0xff] %vm1028_vm5, %v939_v61  ;;  %1197 = vrot.lane.b32.xlu0 %v3601_v16, %s3174_s6  ;;  %v5013_v61 = vld [vmem:[#allocation17_spill] sm:$0xff] }
  0xe3   : > { %1199 = vrot.lane.b32.xlu1 %v3603_v17, %s3174_s6  ;;  %v1290_v17 = vsel %vm641_vm2, %v3392_v34, %v1289_v43  ;;  %v1299_v34 = vrot.slane %v4095_v6, 1  ;;  %v1498_v43 = vrot.slane %v4077_v10, 2 }
  0xe4   : > { %v941_v49 = vpop.permute.xlu0 %940 }
  0xe5   : > { %1033 = vst.msk [vmem:[#allocation3 + $0x20] sm:$0xff] %vm1028_vm5, %v941_v49  ;;  %v943_v15 = vpop.permute.xlu1 %942  ;;  %v1300_v32 = vsel %vm641_vm2, %v5006_v26, %v1299_v34  ;;  %v1499_v22 = vsel %vm851_vm3, %v3773_v1, %v1498_v43  ;;  %v4160_v34 = vld [vmem:[#allocation2 + $0x38] sm:$0xff]  ;;  %v2382_v43 = vld [vmem:[%s4931_s3 + $0x10] sm:$0xff] }
  0xe6   : > { %1034 = vst.msk [vmem:[#allocation3 + $0x28] sm:$0xff] %vm1028_vm5, %v943_v15  ;;  %1201 = vrot.lane.b32.xlu0 %v1106_v11, %s3174_s6  ;;  %v5014_v11 = vld [vmem:[#allocation16_spill] sm:$0xff] }
  0xe7   : > { %1203 = vrot.lane.b32.xlu1 %v1107_v13, %s3174_s6  ;;  %v1330_v49 = vsel %vm641_vm2, %v5014_v11, %v1329_v28  ;;  %v2383_v11 = vld [vmem:[%s4931_s3 + $0x18] sm:$0xff] }
  0xe8   : > { %v945_v16 = vpop.permute.xlu0 %944 }
  0xe9   : > { %1035 = vst.msk [vmem:[#allocation3 + $0x30] sm:$0xff] %vm1028_vm5, %v945_v16  ;;  %v947_v36 = vpop.permute.xlu1 %946  ;;  %v1538_v16 = vrot.slane %v1087_v63, 2  ;;  %v5016_v63 = vld [vmem:[#allocation19_spill] sm:$0xff] }
  0xea   : > { %1036 = vst.msk [vmem:[#allocation3 + $0x38] sm:$0xff] %vm1028_vm5, %v947_v36  ;;  %1366 = vrot.lane.b32.xlu0 %v3425_v44, %s3175_s7 }
  0xeb   : > { %1368 = vrot.lane.b32.xlu1 %v1290_v17, %s3175_s7  ;;  %v1539_v10 = vsel %vm851_vm3, %v3883_v12, %v1538_v16  ;;  %v5017_v16 = vrot.slane %v3502_v5, 2 }
  0xec   : > { %v949_v0 = vpop.permute.xlu0 %948 }
  0xed   : > { %1037 = vst.msk [vmem:[#allocation3 + $0x40] sm:$0xff] %vm1028_vm5, %v949_v0  ;;  %v951_v30 = vpop.permute.xlu1 %950 }
  0xee   : > { %1038 = vst.msk [vmem:[#allocation3 + $0x48] sm:$0xff] %vm1028_vm5, %v951_v30  ;;  %1370 = vrot.lane.b32.xlu0 %v3410_v39, %s3175_s7  ;;  %v1931_v30 = vrot.slane %v4160_v34, 1 }
  0xef   : > { %1372 = vrot.lane.b32.xlu1 %v1295_v27, %s3175_s7 }
  0xf0   : > { %v953_v44 = vpop.permute.xlu0 %952 }
  0xf1   : > { %1039 = vst.msk [vmem:[#allocation3 + $0x50] sm:$0xff] %vm1028_vm5, %v953_v44  ;;  %v955_v33 = vpop.permute.xlu1 %954  ;;  %v4166_v44 = vld [vmem:[#allocation2 + $0xf8] sm:$0xff] }
  0xf2   : > { %1040 = vst.msk [vmem:[#allocation3 + $0x58] sm:$0xff] %vm1028_vm5, %v955_v33  ;;  %1374 = vrot.lane.b32.xlu0 %v5007_v41, %s3175_s7  ;;  %v1971_v26 = vrot.slane %v4166_v44, 1  ;;  %v4176_v33 = vld [vmem:[#allocation2 + $0x40] sm:$0x3]  ;;  %v2180_v28 = vrot.slane %v4166_v44, 2 }
  0xf3   : > { %1376 = vrot.lane.b32.xlu1 %v1300_v32, %s3175_s7  ;;  %v1933_v54 = vrot.slane %v4176_v33, 1 }
  0xf4   : > { %v957_v39 = vpop.permute.xlu0 %956 }
  0xf5   : > { %1041 = vst.msk [vmem:[#allocation3 + $0x60] sm:$0xff] %vm1028_vm5, %v957_v39  ;;  %v959_v55 = vpop.permute.xlu1 %958  ;;  %v4179_v39 = vld [vmem:[#allocation2 + $0x100] sm:$0x3] }
  0xf6   : > { %1042 = vst.msk [vmem:[#allocation3 + $0x68] sm:$0xff] %vm1028_vm5, %v959_v55  ;;  %1378 = vrot.lane.b32.xlu0 %v5009_v56, %s3175_s7  ;;  %v1973_v56 = vrot.slane %v4179_v39, 1 }
  0xf7   : > { %1380 = vrot.lane.b32.xlu1 %v1305_v50, %s3175_s7  ;;  %v1972_v50 = vsel %vm641_vm2, %v5015_v46, %v1971_v26  ;;  %v4256_v46 = vld [vmem:[#allocation2 + $0x50] sm:$0xff] }
  0xf8   : > { %v961_v57 = vpop.permute.xlu0 %960 }
  0xf9   : > { %1043 = vst.msk [vmem:[#allocation3 + $0x70] sm:$0xff] %vm1028_vm5, %v961_v57  ;;  %v963_v4 = vpop.permute.xlu1 %962 }
  0xfa   : > { %1044 = vst.msk [vmem:[#allocation3 + $0x78] sm:$0xff] %vm1028_vm5, %v963_v4  ;;  %1382 = vrot.lane.b32.xlu0 %v5011_v7, %s3175_s7  ;;  %v1934_v4 = vsel %vm641_vm2, %v1931_v30, %v1933_v54  ;;  %v2384_v7 = vld [vmem:[%s4931_s3 + $0x20] sm:$0xf] }
  0xfb   : > { %1384 = vrot.lane.b32.xlu1 %v1310_v62, %s3175_s7  ;;  %v2140_v62 = vrot.slane %v4160_v34, 2  ;;  %3044 = vmatprep.subr.msk.mxu0 %vm2521_vm6, %v2384_v7 }
  0xfc   : > { %v965_v8 = vpop.permute.xlu0 %964  ;;  %3102 = vmatprep.subr.msk.mxu1 %vm2521_vm6, %v2384_v7  ;;  %3045 = vmatpush3.msk.msra.mxu0 %vm2521_vm6, %v2384_v7 }
  0xfd   : > { %1045 = vst.msk [vmem:[#allocation3 + $0x80] sm:$0xff] %vm1028_vm5, %v965_v8  ;;  %v967_v9 = vpop.permute.xlu1 %966  ;;  %3107 = vmatpush3.msk.msra.mxu1 %vm2521_vm6, %v2384_v7  ;;  %3046 = vmatprep.subr.mxu0 %v2383_v11 }
  0xfe   : > { %1046 = vst.msk [vmem:[#allocation3 + $0x88] sm:$0xff] %vm1028_vm5, %v967_v9  ;;  %1386 = vrot.lane.b32.xlu0 %v5012_v60, %s3175_s7  ;;  %v1974_v9 = vsel %vm641_vm2, %v1971_v26, %v1973_v56  ;;  %v4202_v60 = vld [vmem:[#allocation2 + $0x100] sm:$0x3]  ;;  %3047 = vmatpush3.msra.mxu0 %v2383_v11  ;;  %v4262_v56 = vld [vmem:[#allocation2 + $0x110] sm:$0xff] }
  0xff   : > { %1398 = vrot.lane.b32.xlu1 %v5013_v61, %s3175_s7  ;;  %3048 = vmatprep.subr.mxu0 %v2382_v43  ;;  %v1543_v26 = vrot.slane %v4202_v60, 2 }
 0x100   : > { %v969_v13 = vpop.permute.xlu0 %968  ;;  %3103 = vmatprep.subr.mxu1 %v2383_v11  ;;  %3049 = vmatpush3.msra.mxu0 %v2382_v43 }
 0x101   : > { %1047 = vst.msk [vmem:[#allocation3 + $0x90] sm:$0xff] %vm1028_vm5, %v969_v13  ;;  %v971_v15 = vpop.permute.xlu1 %970  ;;  %v1334_v13 = vrot.slane %v4202_v60, 1  ;;  %3108 = vmatpush3.msra.mxu1 %v2383_v11 }
 0x102   : > { %1048 = vst.msk [vmem:[#allocation3 + $0x98] sm:$0xff] %vm1028_vm5, %v971_v15  ;;  %1400 = vrot.lane.b32.xlu0 %v1330_v49, %s3175_s7  ;;  %3104 = vmatprep.subr.mxu1 %v2382_v43 }
 0x103   : > { %1575 = vrot.lane.b32.xlu1 %v3781_v3, %s3176_s8  ;;  %v1705_v3 = vld [vmem:[#allocation2 + $0x30] sm:$0xff]  ;;  %3109 = vmatpush3.msra.mxu1 %v2382_v43  ;;  %v5019_v43 = vld [vmem:[#allocation21_spill] sm:$0xff] }
 0x104   : > { %v973_v17 = vpop.permute.xlu0 %972  ;;  %v1930_v1 = vrot.slane %v1705_v3, 1  ;;  %v2139_v58 = vrot.slane %v1705_v3, 2 }
 0x105   : > { %1049 = vst.msk [vmem:[#allocation3 + $0xa0] sm:$0xff] %vm1028_vm5, %v973_v17  ;;  %v975_v36 = vpop.permute.xlu1 %974  ;;  %v2181_v17 = vsel %vm851_vm3, %v5017_v16, %v2180_v28 }
 0x106   : > { %1050 = vst.msk [vmem:[#allocation3 + $0xa8] sm:$0xff] %vm1028_vm5, %v975_v36  ;;  %1607 = vrot.lane.b32.xlu0 %v3893_v23, %s3176_s8  ;;  %v1932_v29 = vsel %vm641_vm2, %v1930_v1, %v1931_v30  ;;  %v2141_v49 = vsel %vm851_vm3, %v2139_v58, %v2140_v62  ;;  %v2381_v36 = vld [vmem:[%s4931_s3 + $0x8] sm:$0xff]  ;;  %v2182_v1 = vrot.slane %v4179_v39, 2  ;;  %v1976_v58 = vrot.slane %v4262_v56, 1 }
 0x107   : > { %1577 = vrot.lane.b32.xlu1 %v1499_v22, %s3176_s8  ;;  %3050 = vmatprep.subr.mxu0 %v2381_v36 }
 0x108   : > { %v977_v0 = vpop.permute.xlu0 %976  ;;  %3051 = vmatpush3.msra.mxu0 %v2381_v36  ;;  %3105 = vmatprep.subr.mxu1 %v2381_v36 }
 0x109   : > { %1051 = vst.msk [vmem:[#allocation3 + $0xb0] sm:$0xff] %vm1028_vm5, %v977_v0  ;;  %v979_v27 = vpop.permute.xlu1 %978  ;;  %v2380_v0 = vld [vmem:[%s4931_s3] sm:$0xff]  ;;  %3110 = vmatpush3.msra.mxu1 %v2381_v36 }
 0x10a   : > { %1052 = vst.msk [vmem:[#allocation3 + $0xb8] sm:$0xff] %vm1028_vm5, %v979_v27  ;;  %1609 = vrot.lane.b32.xlu0 %v1539_v10, %s3176_s8  ;;  %v2142_v27 = vrot.slane %v4176_v33, 2  ;;  %3052 = vmatprep.subr.mxu0 %v2380_v0 }
 0x10b   : > { %1785 = vrot.lane.b32.xlu1 %v1705_v3, %s3177_s9  ;;  %3053 = vmatpush3.msra.mxu0 %v2380_v0 }
 0x10c   : > { %v981_v23 = vpop.permute.xlu0 %980  ;;  %v2143_v30 = vsel %vm851_vm3, %v2140_v62, %v2142_v27  ;;  %3106 = vmatprep.subr.mxu1 %v2380_v0 }
 0x10d   : > { %1053 = vst.msk [vmem:[#allocation3 + $0xc0] sm:$0xff] %vm1028_vm5, %v981_v23  ;;  %v983_v12 = vpop.permute.xlu1 %982  ;;  %3111 = vmatpush3.msra.mxu1 %v2380_v0 }
 0x10e   : > { %1054 = vst.msk [vmem:[#allocation3 + $0xc8] sm:$0xff] %vm1028_vm5, %v983_v12  ;;  %1817 = vrot.lane.b32.xlu0 %v3502_v5, %s3177_s9  ;;  %v5018_v5 = vld [vmem:[#allocation18_spill] sm:$0xff] }
 0x10f   : > { %1787 = vrot.lane.b32.xlu1 %v4160_v34, %s3177_s9  ;;  %v1335_v10 = vsel %vm641_vm2, %v5018_v5, %v1334_v13  ;;  %v2145_v13 = vrot.slane %v4256_v46, 2  ;;  %v1093_v5 = vld [vmem:[#allocation2 + $0x118] sm:$0x3] }
 0x110   : > { %v985_v32 = vpop.permute.xlu0 %984 }
 0x111   : > { %1055 = vst.msk [vmem:[#allocation3 + $0xd0] sm:$0xff] %vm1028_vm5, %v985_v32  ;;  %v987_v41 = vpop.permute.xlu1 %986 }
 0x112   : > { %1056 = vst.msk [vmem:[#allocation3 + $0xd8] sm:$0xff] %vm1028_vm5, %v987_v41  ;;  %1819 = vrot.lane.b32.xlu0 %v4166_v44, %s3177_s9  ;;  %v1503_v44 = vrot.slane %v4086_v59, 2  ;;  %v1708_v41 = vld [vmem:[#allocation2 + $0x48] sm:$0xff] }
 0x113   : > { %2010 = vrot.lane.b32.xlu1 %v1932_v29, %s3178_s10 }
 0x114   : > { %v989_v55 = vpop.permute.xlu0 %988  ;;  %v1504_v59 = vsel %vm851_vm3, %v3785_v24, %v1503_v44  ;;  %v1732_v24 = vld [vmem:[#allocation2 + $0x108] sm:$0xff] }
 0x115   : > { %1057 = vst.msk [vmem:[#allocation3 + $0xe0] sm:$0xff] %vm1028_vm5, %v989_v55  ;;  %v991_v57 = vpop.permute.xlu1 %990  ;;  %v1936_v55 = vrot.slane %v4256_v46, 1  ;;  %v2184_v16 = vrot.slane %v1732_v24, 2 }
 0x116   : > { %1058 = vst.msk [vmem:[#allocation3 + $0xe8] sm:$0xff] %vm1028_vm5, %v991_v57  ;;  %2042 = vrot.lane.b32.xlu0 %v1972_v50, %s3178_s10  ;;  %v1935_v50 = vrot.slane %v1708_v41, 1  ;;  %v1975_v57 = vrot.slane %v1732_v24, 1 }
 0x117   : > { %1402 = vrot.lane.b32.xlu1 %v5016_v63, %s3175_s7 }
 0x118   : > { %v993_v8 = vpop.permute.xlu0 %992  ;;  %v1937_v63 = vsel %vm641_vm2, %v1935_v50, %v1936_v55 }
 0x119   : > { %1059 = vst.msk [vmem:[#allocation3 + $0xf0] sm:$0xff] %vm1028_vm5, %v993_v8  ;;  %v995_v61 = vpop.permute.xlu1 %994  ;;  %v1977_v8 = vsel %vm641_vm2, %v1975_v57, %v1976_v58  ;;  %v4326_v57 = vld [vmem:[#allocation2 + $0x128] sm:$0xff] }
 0x11a   : > { %1060 = vst.msk [vmem:[#allocation3 + $0xf8] sm:$0xff] %vm1028_vm5, %v995_v61  ;;  %2012 = vrot.lane.b32.xlu0 %v1934_v4, %s3178_s10  ;;  %v1710_v4 = vld [vmem:[#allocation2 + $0x58] sm:$0x3] }
 0x11b   : > { %2044 = vrot.lane.b32.xlu1 %v1974_v9, %s3178_s10  ;;  %v1938_v9 = vrot.slane %v1710_v4, 1 }
 0x11c   : > { %v1142_v15 = vpop.permute.xlu0 %1141 }
 0x11d   : > { %1238 = vst.msk [vmem:[#allocation3] sm:$0xff] %vm1237_vm7, %v1142_v15  ;;  %v1144_v22 = vpop.permute.xlu1 %1143  ;;  %v1939_v15 = vsel %vm641_vm2, %v1936_v55, %v1938_v9 }
 0x11e   : > { %1239 = vst.msk [vmem:[#allocation3 + $0x8] sm:$0xff] %vm1237_vm7, %v1144_v22  ;;  %2219 = vrot.lane.b32.xlu0 %v2141_v49, %s3179_s23  ;;  %v2144_v49 = vrot.slane %v1708_v41, 2 }
 0x11f   : > { %2251 = vrot.lane.b32.xlu1 %v2181_v17, %s3179_s23  ;;  %v2185_v17 = vrot.slane %v4262_v56, 2 }
 0x120   : > { %v1146_v3 = vpop.permute.xlu0 %1145  ;;  %v2146_v0 = vsel %vm851_vm3, %v2144_v49, %v2145_v13 }
 0x121   : > { %1240 = vst.msk [vmem:[#allocation3 + $0x10] sm:$0xff] %vm1237_vm7, %v1146_v3  ;;  %v1148_v34 = vpop.permute.xlu1 %1147  ;;  %v1339_v3 = vrot.slane %v1093_v5, 1 }
 0x122   : > { %1241 = vst.msk [vmem:[#allocation3 + $0x18] sm:$0xff] %vm1237_vm7, %v1148_v34  ;;  %1404 = vrot.lane.b32.xlu0 %v1335_v10, %s3175_s7  ;;  %v2186_v34 = vsel %vm851_vm3, %v2184_v16, %v2185_v17 }
 0x123   : > { %1579 = vrot.lane.b32.xlu1 %v3795_v37, %s3176_s8  ;;  %v2183_v37 = vsel %vm851_vm3, %v2180_v28, %v2182_v1  ;;  %v1734_v28 = vld [vmem:[#allocation2 + $0x118] sm:$0x3] }
 0x124   : > { %v1150_v23 = vpop.permute.xlu0 %1149  ;;  %v1978_v61 = vrot.slane %v1734_v28, 1 }
 0x125   : > { %1242 = vst.msk [vmem:[#allocation3 + $0x20] sm:$0xff] %vm1237_vm7, %v1150_v23  ;;  %v1152_v12 = vpop.permute.xlu1 %1151  ;;  %v5020_v23 = vld [vmem:[#allocation20_spill] sm:$0xff] }
 0x126   : > { %1243 = vst.msk [vmem:[#allocation3 + $0x28] sm:$0xff] %vm1237_vm7, %v1152_v12  ;;  %1611 = vrot.lane.b32.xlu0 %v3909_v2, %s3176_s8  ;;  %v1544_v2 = vsel %vm851_vm3, %v3897_v35, %v1543_v26  ;;  %v1979_v36 = vsel %vm641_vm2, %v1976_v58, %v1978_v61  ;;  %v2147_v12 = vrot.slane %v1710_v4, 2  ;;  %v2187_v26 = vrot.slane %v1734_v28, 2 }
 0x127   : > { %2221 = vrot.lane.b32.xlu1 %v2143_v30, %s3179_s23  ;;  %v1340_v30 = vsel %vm641_vm2, %v5020_v23, %v1339_v3 }
 0x128   : > { %v1154_v32 = vpop.permute.xlu0 %1153 }
 0x129   : > { %1244 = vst.msk [vmem:[#allocation3 + $0x30] sm:$0xff] %vm1237_vm7, %v1154_v32  ;;  %v1156_v29 = vpop.permute.xlu1 %1155 }
 0x12a   : > { %1245 = vst.msk [vmem:[#allocation3 + $0x38] sm:$0xff] %vm1237_vm7, %v1156_v29  ;;  %2253 = vrot.lane.b32.xlu0 %v2183_v37, %s3179_s23  ;;  %v1508_v29 = vrot.slane %v4095_v6, 2 }
 0x12b   : > { %1581 = vrot.lane.b32.xlu1 %v1504_v59, %s3176_s8  ;;  %v2148_v59 = vsel %vm851_vm3, %v2145_v13, %v2147_v12 }
 0x12c   : > { %v1158_v33 = vpop.permute.xlu0 %1157 }
 0x12d   : > { %1246 = vst.msk [vmem:[#allocation3 + $0x40] sm:$0xff] %vm1237_vm7, %v1158_v33  ;;  %v1160_v39 = vpop.permute.xlu1 %1159  ;;  %v2188_v33 = vsel %vm851_vm3, %v2185_v17, %v2187_v26 }
 0x12e   : > { %1247 = vst.msk [vmem:[#allocation3 + $0x48] sm:$0xff] %vm1237_vm7, %v1160_v39  ;;  %1613 = vrot.lane.b32.xlu0 %v1544_v2, %s3176_s8  ;;  %v1509_v39 = vsel %vm851_vm3, %v3799_v19, %v1508_v29  ;;  %v1735_v19 = vld [vmem:[#allocation2 + $0x120] sm:$0xff] }
 0x12f   : > { %1789 = vrot.lane.b32.xlu1 %v1708_v41, %s3177_s9  ;;  %v1548_v41 = vrot.slane %v1093_v5, 2  ;;  %v1980_v58 = vrot.slane %v1735_v19, 1  ;;  %v2189_v17 = vrot.slane %v1735_v19, 2 }
 0x130   : > { %v1162_v54 = vpop.permute.xlu0 %1161 }
 0x131   : > { %1248 = vst.msk [vmem:[#allocation3 + $0x50] sm:$0xff] %vm1237_vm7, %v1162_v54  ;;  %v1164_v35 = vpop.permute.xlu1 %1163  ;;  %v4320_v54 = vld [vmem:[#allocation2 + $0x68] sm:$0xff] }
 0x132   : > { %1249 = vst.msk [vmem:[#allocation3 + $0x58] sm:$0xff] %vm1237_vm7, %v1164_v35  ;;  %1821 = vrot.lane.b32.xlu0 %v1732_v24, %s3177_s9  ;;  %v1711_v24 = vld [vmem:[#allocation2 + $0x60] sm:$0xff]  ;;  %v1941_v35 = vrot.slane %v4320_v54, 1 }
 0x133   : > { %1791 = vrot.lane.b32.xlu1 %v4256_v46, %s3177_s9  ;;  %v1940_v55 = vrot.slane %v1711_v24, 1  ;;  %v2149_v13 = vrot.slane %v1711_v24, 2 }
 0x134   : > { %v1166_v62 = vpop.permute.xlu0 %1165 }
 0x135   : > { %1250 = vst.msk [vmem:[#allocation3 + $0x60] sm:$0xff] %vm1237_vm7, %v1166_v62  ;;  %v1168_v7 = vpop.permute.xlu1 %1167  ;;  %v1981_v62 = vrot.slane %v4326_v57, 1  ;;  %v1942_v4 = vsel %vm641_vm2, %v1940_v55, %v1941_v35  ;;  %v4390_v55 = vld [vmem:[#allocation2 + $0x140] sm:$0xff] }
 0x136   : > { %1251 = vst.msk [vmem:[#allocation3 + $0x68] sm:$0xff] %vm1237_vm7, %v1168_v7  ;;  %1823 = vrot.lane.b32.xlu0 %v4262_v56, %s3177_s9  ;;  %v1713_v7 = vld [vmem:[#allocation2 + $0x70] sm:$0x3] }
 0x137   : > { %2014 = vrot.lane.b32.xlu1 %v1937_v63, %s3178_s10  ;;  %v1982_v9 = vsel %vm641_vm2, %v1980_v58, %v1981_v62  ;;  %v1716_v58 = vld [vmem:[#allocation2 + $0x88] sm:$0x3] }
 0x138   : > { %v1170_v60 = vpop.permute.xlu0 %1169 }
 0x139   : > { %1252 = vst.msk [vmem:[#allocation3 + $0x70] sm:$0xff] %vm1237_vm7, %v1170_v60  ;;  %v1172_v11 = vpop.permute.xlu1 %1171  ;;  %v1943_v60 = vrot.slane %v1713_v7, 1 }
 0x13a   : > { %1253 = vst.msk [vmem:[#allocation3 + $0x78] sm:$0xff] %vm1237_vm7, %v1172_v11  ;;  %2046 = vrot.lane.b32.xlu0 %v1977_v8, %s3178_s10  ;;  %v1737_v8 = vld [vmem:[#allocation2 + $0x130] sm:$0x3] }
 0x13b   : > { %1406 = vrot.lane.b32.xlu1 %v5019_v43, %s3175_s7  ;;  %v1983_v11 = vrot.slane %v1737_v8, 1  ;;  %v2150_v43 = vrot.slane %v4320_v54, 2  ;;  %v1944_v16 = vsel %vm641_vm2, %v1941_v35, %v1943_v60  ;;  %v1986_v35 = vrot.slane %v4390_v55, 1 }
 0x13c   : > { %v1174_v22 = vpop.permute.xlu0 %1173 }
 0x13d   : > { %1254 = vst.msk [vmem:[#allocation3 + $0x80] sm:$0xff] %vm1237_vm7, %v1174_v22  ;;  %v1176_v10 = vpop.permute.xlu1 %1175  ;;  %v2190_v22 = vrot.slane %v4326_v57, 2  ;;  %v1984_v5 = vsel %vm641_vm2, %v1981_v62, %v1983_v11  ;;  %v2151_v3 = vsel %vm851_vm3, %v2149_v13, %v2150_v43  ;;  %v2195_v13 = vrot.slane %v4390_v55, 2 }
 0x13e   : > { %1255 = vst.msk [vmem:[#allocation3 + $0x88] sm:$0xff] %vm1237_vm7, %v1176_v10  ;;  %2016 = vrot.lane.b32.xlu0 %v1939_v15, %s3178_s10  ;;  %v5021_v15 = vld [vmem:[#allocation23_spill] sm:$0xff]  ;;  %v1096_v10 = vld [vmem:[#allocation2 + $0x130] sm:$0x3] }
 0x13f   : > { %2048 = vrot.lane.b32.xlu1 %v1979_v36, %s3178_s10 }
 0x140   : > { %v1178_v27 = vpop.permute.xlu0 %1177 }
 0x141   : > { %1256 = vst.msk [vmem:[#allocation3 + $0x90] sm:$0xff] %vm1237_vm7, %v1178_v27  ;;  %v1180_v1 = vpop.permute.xlu1 %1179  ;;  %v1344_v27 = vrot.slane %v1096_v10, 1 }
 0x142   : > { %1257 = vst.msk [vmem:[#allocation3 + $0x98] sm:$0xff] %vm1237_vm7, %v1180_v1  ;;  %2223 = vrot.lane.b32.xlu0 %v2146_v0, %s3179_s23  ;;  %v2191_v1 = vsel %vm851_vm3, %v2189_v17, %v2190_v22 }
 0x143   : > { %2255 = vrot.lane.b32.xlu1 %v2186_v34, %s3179_s23 }
 0x144   : > { %v1182_v44 = vpop.permute.xlu0 %1181 }
 0x145   : > { %1258 = vst.msk [vmem:[#allocation3 + $0xa0] sm:$0xff] %vm1237_vm7, %v1182_v44  ;;  %v1184_v37 = vpop.permute.xlu1 %1183 }
 0x146   : > { %1259 = vst.msk [vmem:[#allocation3 + $0xa8] sm:$0xff] %vm1237_vm7, %v1184_v37  ;;  %1408 = vrot.lane.b32.xlu0 %v1340_v30, %s3175_s7  ;;  %v5022_v30 = vld [vmem:[#allocation22_spill] sm:$0xff]  ;;  %v2152_v37 = vrot.slane %v1713_v7, 2  ;;  %v1948_v7 = vrot.slane %v1716_v58, 1 }
 0x147   : > { %1583 = vrot.lane.b32.xlu1 %v3809_v42, %s3176_s8  ;;  %v1345_v44 = vsel %vm641_vm2, %v5022_v30, %v1344_v27 }
 0x148   : > { %v1186_v32 = vpop.permute.xlu0 %1185  ;;  %v2153_v29 = vsel %vm851_vm3, %v2150_v43, %v2152_v37 }
 0x149   : > { %1260 = vst.msk [vmem:[#allocation3 + $0xb0] sm:$0xff] %vm1237_vm7, %v1186_v32  ;;  %v1188_v2 = vpop.permute.xlu1 %1187  ;;  %v2192_v32 = vrot.slane %v1737_v8, 2 }
 0x14a   : > { %1261 = vst.msk [vmem:[#allocation3 + $0xb8] sm:$0xff] %vm1237_vm7, %v1188_v2  ;;  %1615 = vrot.lane.b32.xlu0 %v3923_v31, %s3176_s8  ;;  %v1549_v31 = vsel %vm851_vm3, %v3913_v20, %v1548_v41  ;;  %v1513_v2 = vrot.slane %v4105_v25, 2 }
 0x14b   : > { %2225 = vrot.lane.b32.xlu1 %v2148_v59, %s3179_s23  ;;  %v2193_v41 = vsel %vm851_vm3, %v2190_v22, %v2192_v32 }
 0x14c   : > { %v1190_v42 = vpop.permute.xlu0 %1189 }
 0x14d   : > { %1262 = vst.msk [vmem:[#allocation3 + $0xc0] sm:$0xff] %vm1237_vm7, %v1190_v42  ;;  %v1192_v6 = vpop.permute.xlu1 %1191  ;;  %v1553_v42 = vrot.slane %v1096_v10, 2 }
 0x14e   : > { %1263 = vst.msk [vmem:[#allocation3 + $0xc8] sm:$0xff] %vm1237_vm7, %v1192_v6  ;;  %2257 = vrot.lane.b32.xlu0 %v2188_v33, %s3179_s23 }
 0x14f   : > { %1585 = vrot.lane.b32.xlu1 %v1509_v39, %s3176_s8  ;;  %v1514_v39 = vsel %vm851_vm3, %v3813_v21, %v1513_v2  ;;  %v1738_v21 = vld [vmem:[#allocation2 + $0x138] sm:$0xff] }
 0x150   : > { %v1194_v46 = vpop.permute.xlu0 %1193 }
 0x151   : > { %1264 = vst.msk [vmem:[#allocation3 + $0xd0] sm:$0xff] %vm1237_vm7, %v1194_v46  ;;  %v1196_v50 = vpop.permute.xlu1 %1195 }
 0x152   : > { %1265 = vst.msk [vmem:[#allocation3 + $0xd8] sm:$0xff] %vm1237_vm7, %v1196_v50  ;;  %1617 = vrot.lane.b32.xlu0 %v1549_v31, %s3176_s8  ;;  %v1714_v31 = vld [vmem:[#allocation2 + $0x78] sm:$0xff] }
 0x153   : > { %1793 = vrot.lane.b32.xlu1 %v1711_v24, %s3177_s9  ;;  %v4384_v24 = vld [vmem:[#allocation2 + $0x80] sm:$0xff]  ;;  %v1945_v50 = vrot.slane %v1714_v31, 1  ;;  %v2154_v60 = vrot.slane %v1714_v31, 2 }
 0x154   : > { %v1198_v56 = vpop.permute.xlu0 %1197 }
 0x155   : > { %1266 = vst.msk [vmem:[#allocation3 + $0xe0] sm:$0xff] %vm1237_vm7, %v1198_v56  ;;  %v1200_v20 = vpop.permute.xlu1 %1199  ;;  %v1985_v56 = vrot.slane %v1738_v21, 1 }
 0x156   : > { %1267 = vst.msk [vmem:[#allocation3 + $0xe8] sm:$0xff] %vm1237_vm7, %v1200_v20  ;;  %1825 = vrot.lane.b32.xlu0 %v1735_v19, %s3177_s9  ;;  %v1946_v19 = vrot.slane %v4384_v24, 1 }
 0x157   : > { %1795 = vrot.lane.b32.xlu1 %v4320_v54, %s3177_s9 }
 0x158   : > { %v1202_v63 = vpop.permute.xlu0 %1201  ;;  %v1947_v20 = vsel %vm641_vm2, %v1945_v50, %v1946_v19  ;;  %v1949_v11 = vsel %vm641_vm2, %v1946_v19, %v1948_v7 }
 0x159   : > { %1268 = vst.msk [vmem:[#allocation3 + $0xf0] sm:$0xff] %vm1237_vm7, %v1202_v63  ;;  %v1204_v28 = vpop.permute.xlu1 %1203  ;;  %v4400_v63 = vld [vmem:[#allocation2 + $0x148] sm:$0x3] }
 0x15a   : > { %1269 = vst.msk [vmem:[#allocation3 + $0xf8] sm:$0xff] %vm1237_vm7, %v1204_v28  ;;  %1827 = vrot.lane.b32.xlu0 %v4326_v57, %s3177_s9  ;;  %v1988_v8 = vrot.slane %v4400_v63, 1  ;;  %v2197_v37 = vrot.slane %v4400_v63, 2 }
 0x15b   : > { %2018 = vrot.lane.b32.xlu1 %v1942_v4, %s3178_s10  ;;  %v1987_v4 = vsel %vm641_vm2, %v1985_v56, %v1986_v35 }
 0x15c   : > { %v1367_v61 = vpop.permute.xlu0 %1366  ;;  %v2198_v2 = vsel %vm851_vm3, %v2195_v13, %v2197_v37 }
 0x15d   : > { %1463 = vst.msk [vmem:[#allocation3] sm:$0xff] %vm1462_vm8, %v1367_v61  ;;  %v1369_v49 = vpop.permute.xlu1 %1368  ;;  %v2155_v61 = vrot.slane %v4384_v24, 2 }
 0x15e   : > { %1464 = vst.msk [vmem:[#allocation3 + $0x8] sm:$0xff] %vm1462_vm8, %v1369_v49  ;;  %2050 = vrot.lane.b32.xlu0 %v1982_v9, %s3178_s10  ;;  %v2194_v49 = vrot.slane %v1738_v21, 2 }
 0x15f   : > { %1410 = vrot.lane.b32.xlu1 %v5021_v15, %s3175_s7  ;;  %v1989_v15 = vsel %vm641_vm2, %v1986_v35, %v1988_v8 }
 0x160   : > { %v1371_v36 = vpop.permute.xlu0 %1370 }
 0x161   : > { %1465 = vst.msk [vmem:[#allocation3 + $0x10] sm:$0xff] %vm1462_vm8, %v1371_v36  ;;  %v1373_v0 = vpop.permute.xlu1 %1372 }
 0x162   : > { %1466 = vst.msk [vmem:[#allocation3 + $0x18] sm:$0xff] %vm1462_vm8, %v1373_v0  ;;  %2020 = vrot.lane.b32.xlu0 %v1944_v16, %s3178_s10  ;;  %v1099_v16 = vld [vmem:[#allocation2 + $0x148] sm:$0x3]  ;;  %v500_v0 = vld [vmem:[%s377_s29] sm:$0xff] }
 0x163   : > { %2052 = vrot.lane.b32.xlu1 %v1984_v5, %s3178_s10  ;;  %v1349_v22 = vrot.slane %v1099_v16, 1  ;;  %v2196_v5 = vsel %vm851_vm3, %v2194_v49, %v2195_v13  ;;  %503 = vst.msk [vmem:[#allocation2 + $0x199] sm:$0xff] %vm463_vm1, %v500_v0  ;;  %v5028_v13 = vld [vmem:[#allocation26_spill] sm:$0xff] }
 0x164   : > { %v1375_v34 = vpop.permute.xlu0 %1374 }
 0x165   : > { %1467 = vst.msk [vmem:[#allocation3 + $0x20] sm:$0xff] %vm1462_vm8, %v1375_v34  ;;  %v1377_v23 = vpop.permute.xlu1 %1376  ;;  %v5024_v34 = vmov 0.0  }
 0x166   : > { %1468 = vst.msk [vmem:[#allocation3 + $0x28] sm:$0xff] %vm1462_vm8, %v1377_v23  ;;  %2227 = vrot.lane.b32.xlu0 %v2151_v3, %s3179_s23  ;;  %v5023_v3 = vld [vmem:[#allocation24_spill] sm:$0xff]  ;;  %v2157_v23 = vrot.slane %v1716_v58, 2  ;;  %v1719_v58 = vld [vmem:[#allocation2 + $0xa0] sm:$0x3] }
 0x167   : > { %2259 = vrot.lane.b32.xlu1 %v2191_v1, %s3179_s23  ;;  %v1350_v27 = vsel %vm641_vm2, %v5023_v3, %v1349_v22  ;;  %511 = vst.msk [vmem:[#allocation2 + $0x199] sm:$0xff] %vm463_vm1, %v5024_v34  ;;  %v1078_v22 = vld [vmem:[#allocation2 + $0xa0] sm:$0x3] }
 0x168   : > { %v1379_v12 = vpop.permute.xlu0 %1378  ;;  %v2158_v32 = vsel %vm851_vm3, %v2155_v61, %v2157_v23  ;;  %v1314_v0 = vrot.slane %v1078_v22, 1  ;;  %v5029_v23 = vld [vmem:[#allocation10_spill] sm:$0xff] }
 0x169   : > { %1469 = vst.msk [vmem:[#allocation3 + $0x30] sm:$0xff] %vm1462_vm8, %v1379_v12  ;;  %v1381_v26 = vpop.permute.xlu1 %1380  ;;  %v5025_v12 = vld [vmem:[#allocation30_spill] sm:$0xff] }
 0x16a   : > { %1470 = vst.msk [vmem:[#allocation3 + $0x38] sm:$0xff] %vm1462_vm8, %v1381_v26  ;;  %1412 = vrot.lane.b32.xlu0 %v1345_v44, %s3175_s7  ;;  %v501_v44 = vld [vmem:[%s377_s29 + $0x8] sm:$0xff] }
 0x16b   : > { %1587 = vrot.lane.b32.xlu1 %v3823_v53, %s3176_s8  ;;  %504 = vst.msk [vmem:[#allocation2 + $0x1a1] sm:$0xff] %vm463_vm1, %v501_v44 }
 0x16c   : > { %v1383_v59 = vpop.permute.xlu0 %1382  ;;  %512 = vst.msk [vmem:[#allocation2 + $0x1a1] sm:$0xff] %vm463_vm1, %v5024_v34 }
 0x16d   : > { %1471 = vst.msk [vmem:[#allocation3 + $0x40] sm:$0xff] %vm1462_vm8, %v1383_v59  ;;  %v1385_v33 = vpop.permute.xlu1 %1384  ;;  %v1518_v59 = vrot.slane %v4115_v38, 2 }
 0x16e   : > { %1472 = vst.msk [vmem:[#allocation3 + $0x48] sm:$0xff] %vm1462_vm8, %v1385_v33  ;;  %1619 = vrot.lane.b32.xlu0 %v3937_v18, %s3176_s8  ;;  %v1554_v18 = vsel %vm851_vm3, %v3927_v45, %v1553_v42  ;;  %v1558_v33 = vrot.slane %v1099_v16, 2  ;;  %v5026_v42 = vld [vmem:[#allocation29_spill] sm:$0xff] }
 0x16f   : > { %2229 = vrot.lane.b32.xlu1 %v2153_v29, %s3179_s23 }
 0x170   : > { %v1387_v53 = vpop.permute.xlu0 %1386 }
 0x171   : > { %1473 = vst.msk [vmem:[#allocation3 + $0x50] sm:$0xff] %vm1462_vm8, %v1387_v53  ;;  %v1399_v25 = vpop.permute.xlu1 %1398  ;;  %v1519_v53 = vsel %vm851_vm3, %v5026_v42, %v1518_v59  ;;  %v1523_v42 = vrot.slane %v1078_v22, 2 }
 0x172   : > { %1479 = vst.msk [vmem:[#allocation3 + $0x80] sm:$0xff] %vm1462_vm8, %v1399_v25  ;;  %2261 = vrot.lane.b32.xlu0 %v2193_v41, %s3179_s23 }
 0x173   : > { %1589 = vrot.lane.b32.xlu1 %v1514_v39, %s3176_s8 }
 0x174   : > { %v1401_v6 = vpop.permute.xlu0 %1400 }
 0x175   : > { %1480 = vst.msk [vmem:[#allocation3 + $0x88] sm:$0xff] %vm1462_vm8, %v1401_v6  ;;  %v1576_v46 = vpop.permute.xlu1 %1575  ;;  %v1717_v6 = vld [vmem:[#allocation2 + $0x90] sm:$0xff] }
 0x176   : > { %1672 = vst.msk [vmem:[#allocation3] sm:$0xff] %vm1671_vm9, %v1576_v46  ;;  %1621 = vrot.lane.b32.xlu0 %v1554_v18, %s3176_s8  ;;  %v1950_v50 = vrot.slane %v1717_v6, 1 }
 0x177   : > { %1797 = vrot.lane.b32.xlu1 %v1714_v31, %s3177_s9 }
 0x178   : > { %v1608_v54 = vpop.permute.xlu0 %1607 }
 0x179   : > { %1688 = vst.msk [vmem:[#allocation3 + $0x80] sm:$0xff] %vm1671_vm9, %v1608_v54  ;;  %v1578_v45 = vpop.permute.xlu1 %1577 }
 0x17a   : > { %1673 = vst.msk [vmem:[#allocation3 + $0x8] sm:$0xff] %vm1671_vm9, %v1578_v45  ;;  %1829 = vrot.lane.b32.xlu0 %v1738_v21, %s3177_s9  ;;  %v1741_v21 = vld [vmem:[#allocation2 + $0x150] sm:$0xff] }
 0x17b   : > { %1799 = vrot.lane.b32.xlu1 %v4384_v24, %s3177_s9  ;;  %v4463_v24 = vld [vmem:[#allocation2 + $0x98] sm:$0xff]  ;;  %v1990_v56 = vrot.slane %v1741_v21, 1 }
 0x17c   : > { %v1610_v57 = vpop.permute.xlu0 %1609  ;;  %v1951_v19 = vrot.slane %v4463_v24, 1  ;;  %v2160_v49 = vrot.slane %v4463_v24, 2 }
 0x17d   : > { %1689 = vst.msk [vmem:[#allocation3 + $0x88] sm:$0xff] %vm1671_vm9, %v1610_v57  ;;  %v1786_v62 = vpop.permute.xlu1 %1785 }
 0x17e   : > { %1882 = vst.msk [vmem:[#allocation3] sm:$0xff] %vm1881_vm10, %v1786_v62  ;;  %1831 = vrot.lane.b32.xlu0 %v4390_v55, %s3177_s9  ;;  %v4470_v55 = vld [vmem:[#allocation2 + $0x158] sm:$0xff] }
 0x17f   : > { %2022 = vrot.lane.b32.xlu1 %v1947_v20, %s3178_s10  ;;  %v1991_v35 = vrot.slane %v4470_v55, 1  ;;  %v1952_v20 = vsel %vm641_vm2, %v1950_v50, %v1951_v19  ;;  %v2200_v16 = vrot.slane %v4470_v55, 2 }
 0x180   : > { %v1818_v28 = vpop.permute.xlu0 %1817 }
 0x181   : > { %1898 = vst.msk [vmem:[#allocation3 + $0x80] sm:$0xff] %vm1881_vm10, %v1818_v28  ;;  %v1788_v9 = vpop.permute.xlu1 %1787  ;;  %v1992_v7 = vsel %vm641_vm2, %v1990_v56, %v1991_v35  ;;  %v1953_v28 = vrot.slane %v1719_v58, 1 }
 0x182   : > { %1883 = vst.msk [vmem:[#allocation3 + $0x8] sm:$0xff] %vm1881_vm10, %v1788_v9  ;;  %2054 = vrot.lane.b32.xlu0 %v1987_v4, %s3178_s10  ;;  %v1743_v4 = vld [vmem:[#allocation2 + $0x160] sm:$0x3] }
 0x183   : > { %1414 = vrot.lane.b32.xlu1 %v3726_v51, %s3175_s7  ;;  %v2156_v51 = vsel %vm851_vm3, %v2154_v60, %v2155_v61  ;;  %v1993_v60 = vrot.slane %v1743_v4, 1 }
 0x184   : > { %v1820_v43 = vpop.permute.xlu0 %1819 }
 0x185   : > { %1899 = vst.msk [vmem:[#allocation3 + $0x88] sm:$0xff] %vm1881_vm10, %v1820_v43  ;;  %v2011_v17 = vpop.permute.xlu1 %2010  ;;  %v1954_v43 = vsel %vm641_vm2, %v1951_v19, %v1953_v28  ;;  %v4536_v19 = vld [vmem:[#allocation2 + $0xb0] sm:$0xff] }
 0x186   : > { %2107 = vst.msk [vmem:[#allocation3] sm:$0xff] %vm2106_vm11, %v2011_v17  ;;  %2024 = vrot.lane.b32.xlu0 %v1949_v11, %s3178_s10  ;;  %v2159_v11 = vrot.slane %v1717_v6, 2  ;;  %v1956_v56 = vrot.slane %v4536_v19, 1 }
 0x187   : > { %2056 = vrot.lane.b32.xlu1 %v1989_v15, %s3178_s10  ;;  %v2199_v15 = vrot.slane %v1741_v21, 2 }
 0x188   : > { %v2043_v36 = vpop.permute.xlu0 %2042 }
 0x189   : > { %2123 = vst.msk [vmem:[#allocation3 + $0x80] sm:$0xff] %vm2106_vm11, %v2043_v36  ;;  %v1403_v10 = vpop.permute.xlu1 %1402 }
 0x18a   : > { %1481 = vst.msk [vmem:[#allocation3 + $0x90] sm:$0xff] %vm1462_vm8, %v1403_v10  ;;  %2231 = vrot.lane.b32.xlu0 %v2156_v51, %s3179_s23  ;;  %v1994_v51 = vsel %vm641_vm2, %v1991_v35, %v1993_v60  ;;  %v2161_v10 = vsel %vm851_vm3, %v2159_v11, %v2160_v49  ;;  %v1746_v60 = vld [vmem:[#allocation2 + $0x178] sm:$0x3] }
 0x18b   : > { %2263 = vrot.lane.b32.xlu1 %v2196_v5, %s3179_s23  ;;  %v1102_v5 = vld [vmem:[#allocation2 + $0x160] sm:$0x3] }
 0x18c   : > { %v2013_v1 = vpop.permute.xlu0 %2012  ;;  %v1354_v34 = vrot.slane %v1102_v5, 1 }
 0x18d   : > { %2108 = vst.msk [vmem:[#allocation3 + $0x8] sm:$0xff] %vm2106_vm11, %v2013_v1  ;;  %v2045_v30 = vpop.permute.xlu1 %2044 }
 0x18e   : > { %2124 = vst.msk [vmem:[#allocation3 + $0x88] sm:$0xff] %vm2106_vm11, %v2045_v30  ;;  %1416 = vrot.lane.b32.xlu0 %v1350_v27, %s3175_s7  ;;  %v2201_v27 = vsel %vm851_vm3, %v2199_v15, %v2200_v16  ;;  %v1315_v30 = vsel %vm641_vm2, %v5029_v23, %v1314_v0  ;;  %v1081_v0 = vld [vmem:[#allocation2 + $0xb8] sm:$0x3] }
 0x18f   : > { %1591 = vrot.lane.b32.xlu1 %v5025_v12, %s3176_s8  ;;  %v5030_v12 = vld [vmem:[#allocation25_spill] sm:$0xff] }
 0x190   : > { %v2220_v26 = vpop.permute.xlu0 %2219  ;;  %v1355_v37 = vsel %vm641_vm2, %v5030_v12, %v1354_v34 }
 0x191   : > { %2316 = vst.msk [vmem:[#allocation3] sm:$0xff] %vm2315_vm12, %v2220_v26  ;;  %v2252_v29 = vpop.permute.xlu1 %2251 }
 0x192   : > { %2332 = vst.msk [vmem:[#allocation3 + $0x80] sm:$0xff] %vm2315_vm12, %v2252_v29  ;;  %1623 = vrot.lane.b32.xlu0 %v3951_v48, %s3176_s8  ;;  %v5027_v48 = vld [vmem:[#allocation37_spill] sm:$0xff]  ;;  %v2202_v29 = vrot.slane %v1743_v4, 2 }
 0x193   : > { %2233 = vrot.lane.b32.xlu1 %v2158_v32, %s3179_s23  ;;  %v1559_v39 = vsel %vm851_vm3, %v5027_v48, %v1558_v33  ;;  %v2162_v32 = vrot.slane %v1719_v58, 2  ;;  %v5031_v33 = vld [vmem:[#allocation32_spill] sm:$0xff]  ;;  %v1563_v48 = vrot.slane %v1102_v5, 2 }
 0x194   : > { %v1405_v41 = vpop.permute.xlu0 %1404 }
 0x195   : > { %1482 = vst.msk [vmem:[#allocation3 + $0x98] sm:$0xff] %vm1462_vm8, %v1405_v41  ;;  %v1580_v38 = vpop.permute.xlu1 %1579  ;;  %v2163_v41 = vsel %vm851_vm3, %v2160_v49, %v2162_v32  ;;  %v1998_v49 = vrot.slane %v1746_v60, 1 }
 0x196   : > { %1674 = vst.msk [vmem:[#allocation3 + $0x10] sm:$0xff] %vm1671_vm9, %v1580_v38  ;;  %2265 = vrot.lane.b32.xlu0 %v2198_v2, %s3179_s23  ;;  %v2203_v38 = vsel %vm851_vm3, %v2200_v16, %v2202_v29  ;;  %v2165_v16 = vrot.slane %v4536_v19, 2 }
 0x197   : > { %1593 = vrot.lane.b32.xlu1 %v1519_v53, %s3176_s8 }
 0x198   : > { %v1612_v25 = vpop.permute.xlu0 %1611  ;;  %v2348_v18 = vld [vmem:[#allocation3] sm:$0xff] }
 0x199   : > { %1690 = vst.msk [vmem:[#allocation3 + $0x90] sm:$0xff] %vm1671_vm9, %v1612_v25  ;;  %v2222_v31 = vpop.permute.xlu1 %2221  ;;  %3054 = vmatprep.mubr.msk.f32.mxu0 %vm2424_vm13, %v2348_v18  ;;  %v2364_v46 = vld [vmem:[#allocation3 + $0x80] sm:$0xff]  ;;  %v5032_v25 = vld [vmem:[#allocation31_spill] sm:$0xff] }
 0x19a   : > { %2317 = vst.msk [vmem:[#allocation3 + $0x8] sm:$0xff] %vm2315_vm12, %v2222_v31  ;;  %3078 = vmatprep.mubr.msk.f32.mxu1 %vm2424_vm13, %v2364_v46  ;;  %1625 = vrot.lane.b32.xlu0 %v1559_v39, %s3176_s8  ;;  %v1524_v18 = vsel %vm851_vm3, %v5032_v25, %v1523_v42  ;;  %v1564_v31 = vsel %vm851_vm3, %v3955_v47, %v1563_v48  ;;  %v2207_v42 = vrot.slane %v1746_v60, 2  ;;  %v4637_v60 = vld [vmem:[#allocation2 + $0x188] sm:$0xff] }
 0x19b   : > { %1801 = vrot.lane.b32.xlu1 %v1717_v6, %s3177_s9 }
 0x19c   : > { %v2254_v54 = vpop.permute.xlu0 %2253 }
 0x19d   : > { %2333 = vst.msk [vmem:[#allocation3 + $0x88] sm:$0xff] %vm2315_vm12, %v2254_v54  ;;  %v1582_v45 = vpop.permute.xlu1 %1581  ;;  %v1744_v54 = vld [vmem:[#allocation2 + $0x168] sm:$0xff] }
 0x19e   : > { %1675 = vst.msk [vmem:[#allocation3 + $0x18] sm:$0xff] %vm1671_vm9, %v1582_v45  ;;  %1833 = vrot.lane.b32.xlu0 %v1741_v21, %s3177_s9  ;;  %v1720_v21 = vld [vmem:[#allocation2 + $0xa8] sm:$0xff]  ;;  %v1995_v35 = vrot.slane %v1744_v54, 1  ;;  %v2204_v22 = vrot.slane %v1744_v54, 2 }
 0x19f   : > { %1803 = vrot.lane.b32.xlu1 %v4463_v24, %s3177_s9  ;;  %v1955_v45 = vrot.slane %v1720_v21, 1  ;;  %v2164_v15 = vrot.slane %v1720_v21, 2 }
 0x1a0   : > { %v1614_v57 = vpop.permute.xlu0 %1613 }
 0x1a1   : > { %1691 = vst.msk [vmem:[#allocation3 + $0x98] sm:$0xff] %vm1671_vm9, %v1614_v57  ;;  %v1790_v62 = vpop.permute.xlu1 %1789  ;;  %v2349_v63 = vld [vmem:[#allocation3 + $0x8] sm:$0xff]  ;;  %v2166_v34 = vsel %vm851_vm3, %v2164_v15, %v2165_v16  ;;  %v4644_v15 = vld [vmem:[#allocation2 + $0x190] sm:$0x3] }
 0x1a2   : > { %1884 = vst.msk [vmem:[#allocation3 + $0x10] sm:$0xff] %vm1881_vm10, %v1790_v62  ;;  %3055 = vmatmul.mubr.msk.f32.vlgmr.msra.gmra.mxu0 %vm2424_vm13, %v2349_v63  ;;  %1835 = vrot.lane.b32.xlu0 %v4470_v55, %s3177_s9  ;;  %v4539_v55 = vld [vmem:[#allocation2 + $0x170] sm:$0xff]  ;;  %v1957_v63 = vsel %vm641_vm2, %v1955_v45, %v1956_v56  ;;  %v4614_v45 = vld [vmem:[#allocation2 + $0xc8] sm:$0xff] }
 0x1a3   : > { %2026 = vrot.lane.b32.xlu1 %v1952_v20, %s3178_s10  ;;  %v1996_v20 = vrot.slane %v4539_v55, 1 }
 0x1a4   : > { %v1822_v8 = vpop.permute.xlu0 %1821  ;;  %v2365_v9 = vld [vmem:[#allocation3 + $0x88] sm:$0xff] }
 0x1a5   : > { %1900 = vst.msk [vmem:[#allocation3 + $0x90] sm:$0xff] %vm1881_vm10, %v1822_v8  ;;  %v1792_v61 = vpop.permute.xlu1 %1791  ;;  %3079 = vmatmul.mubr.msk.f32.vlgmr.msra.gmra.mxu1 %vm2424_vm13, %v2365_v9  ;;  %v1997_v28 = vsel %vm641_vm2, %v1995_v35, %v1996_v20  ;;  %v1722_v8 = vld [vmem:[#allocation2 + $0xb8] sm:$0x3]  ;;  %v4617_v35 = vld [vmem:[#allocation2 + $0x188] sm:$0xff] }
 0x1a6   : > { %1885 = vst.msk [vmem:[#allocation3 + $0x18] sm:$0xff] %vm1881_vm10, %v1792_v61  ;;  %2058 = vrot.lane.b32.xlu0 %v1992_v7, %s3178_s10  ;;  %v1958_v61 = vrot.slane %v1722_v8, 1 }
 0x1a7   : > { %1418 = vrot.lane.b32.xlu1 %v5028_v13, %s3175_s7 }
 0x1a8   : > { %v1824_v17 = vpop.permute.xlu0 %1823 }
 0x1a9   : > { %1901 = vst.msk [vmem:[#allocation3 + $0x98] sm:$0xff] %vm1881_vm10, %v1824_v17  ;;  %v2015_v36 = vpop.permute.xlu1 %2014  ;;  %v5034_v17 = vld [vmem:[#allocation28_spill] sm:$0xff] }
 0x1aa   : > { %2109 = vst.msk [vmem:[#allocation3 + $0x10] sm:$0xff] %vm2106_vm11, %v2015_v36  ;;  %2028 = vrot.lane.b32.xlu0 %v1954_v43, %s3178_s10  ;;  %v5033_v43 = vld [vmem:[#allocation13_spill] sm:$0xff]  ;;  %v2205_v36 = vrot.slane %v4539_v55, 2 }
 0x1ab   : > { %2060 = vrot.lane.b32.xlu1 %v1994_v51, %s3178_s10  ;;  %v1959_v51 = vsel %vm641_vm2, %v1956_v56, %v1958_v61  ;;  %v1362_v61 = vrot.slane %v4637_v60, 1 }
 0x1ac   : > { %v2047_v3 = vpop.permute.xlu0 %2046 }
 0x1ad   : > { %2125 = vst.msk [vmem:[#allocation3 + $0x90] sm:$0xff] %vm2106_vm11, %v2047_v3  ;;  %v1407_v1 = vpop.permute.xlu1 %1406 }
 0x1ae   : > { %1483 = vst.msk [vmem:[#allocation3 + $0xa0] sm:$0xff] %vm1462_vm8, %v1407_v1  ;;  %2235 = vrot.lane.b32.xlu0 %v2161_v10, %s3179_s23  ;;  %v1999_v10 = vsel %vm641_vm2, %v1996_v20, %v1998_v49  ;;  %v1319_v1 = vrot.slane %v1081_v0, 1  ;;  %v1961_v20 = vrot.slane %v4614_v45, 1 }
 0x1af   : > { %2267 = vrot.lane.b32.xlu1 %v2201_v27, %s3179_s23  ;;  %v1105_v27 = vld [vmem:[#allocation2 + $0x178] sm:$0x3] }
 0x1b0   : > { %v2017_v44 = vpop.permute.xlu0 %2016 }
 0x1b1   : > { %2110 = vst.msk [vmem:[#allocation3 + $0x18] sm:$0xff] %vm2106_vm11, %v2017_v44  ;;  %v2049_v26 = vpop.permute.xlu1 %2048  ;;  %v1359_v44 = vrot.slane %v1105_v27, 1 }
 0x1b2   : > { %2126 = vst.msk [vmem:[#allocation3 + $0x98] sm:$0xff] %vm2106_vm11, %v2049_v26  ;;  %1388 = vrot.lane.b32.xlu0 %v1315_v30, %s3175_s7  ;;  %v2206_v30 = vsel %vm851_vm3, %v2204_v22, %v2205_v36  ;;  %v2003_v22 = vrot.slane %v4644_v15, 1 }
 0x1b3   : > { %1420 = vrot.lane.b32.xlu1 %v1355_v37, %s3175_s7  ;;  %v5035_v37 = vld [vmem:[#allocation12_spill] sm:$0xff] }
 0x1b4   : > { %v2224_v59 = vpop.permute.xlu0 %2223  ;;  %v1320_v26 = vsel %vm641_vm2, %v5035_v37, %v1319_v1 }
 0x1b5   : > { %2318 = vst.msk [vmem:[#allocation3 + $0x10] sm:$0xff] %vm2315_vm12, %v2224_v59  ;;  %v2256_v2 = vpop.permute.xlu1 %2255  ;;  %v5036_v59 = vld [vmem:[#allocation27_spill] sm:$0xff] }
 0x1b6   : > { %2334 = vst.msk [vmem:[#allocation3 + $0x90] sm:$0xff] %vm2315_vm12, %v2256_v2  ;;  %1595 = vrot.lane.b32.xlu0 %v5031_v33, %s3176_s8  ;;  %v1360_v29 = vsel %vm641_vm2, %v5036_v59, %v1359_v44  ;;  %v2167_v33 = vrot.slane %v1722_v8, 2  ;;  %v3145_v8 = vld [vmem:[#allocation2 + $0x180] sm:$0xff] }
 0x1b7   : > { %1627 = vrot.lane.b32.xlu1 %v3967_v40, %s3176_s8 }
 0x1b8   : > { %v1409_v53 = vpop.permute.xlu0 %1408  ;;  %v2168_v48 = vsel %vm851_vm3, %v2165_v16, %v2167_v33  ;;  %v5040_v33 = vld [vmem:[#allocation14_spill] sm:$0xff] }
 0x1b9   : > { %1484 = vst.msk [vmem:[#allocation3 + $0xa8] sm:$0xff] %vm1462_vm8, %v1409_v53  ;;  %v1584_v39 = vpop.permute.xlu1 %1583 }
 0x1ba   : > { %1676 = vst.msk [vmem:[#allocation3 + $0x20] sm:$0xff] %vm1671_vm9, %v1584_v39  ;;  %2237 = vrot.lane.b32.xlu0 %v2163_v41, %s3179_s23  ;;  %v1528_v39 = vrot.slane %v1081_v0, 2  ;;  %v2170_v0 = vrot.slane %v4614_v45, 2 }
 0x1bb   : > { %2269 = vrot.lane.b32.xlu1 %v2203_v38, %s3179_s23  ;;  %v5037_v38 = vld [vmem:[#allocation34_spill] sm:$0xff] }
 0x1bc   : > { %v1616_v40 = vpop.permute.xlu0 %1615  ;;  %v2350_v6 = vld [vmem:[#allocation3 + $0x10] sm:$0xff] }
 0x1bd   : > { %1692 = vst.msk [vmem:[#allocation3 + $0xa0] sm:$0xff] %vm1671_vm9, %v1616_v40  ;;  %v2226_v46 = vpop.permute.xlu1 %2225  ;;  %3057 = vmatprep.mubr.msk.f32.mxu0 %vm2424_vm13, %v2350_v6  ;;  %v2366_v24 = vld [vmem:[#allocation3 + $0x90] sm:$0xff]  ;;  %v2208_v40 = vsel %vm851_vm3, %v2205_v36, %v2207_v42  ;;  %v1568_v6 = vrot.slane %v1105_v27, 2  ;;  %v1570_v42 = vrot.slane %v3145_v8, 2 }
 0x1be   : > { %2319 = vst.msk [vmem:[#allocation3 + $0x18] sm:$0xff] %vm2315_vm12, %v2226_v46  ;;  %3081 = vmatprep.mubr.msk.f32.mxu1 %vm2424_vm13, %v2366_v24  ;;  %1597 = vrot.lane.b32.xlu0 %v1524_v18, %s3176_s8 }
 0x1bf   : > { %1629 = vrot.lane.b32.xlu1 %v1564_v31, %s3176_s8 }
 0x1c0   : > { %v2258_v50 = vpop.permute.xlu0 %2257 }
 0x1c1   : > { %2335 = vst.msk [vmem:[#allocation3 + $0x98] sm:$0xff] %vm2315_vm12, %v2258_v50  ;;  %v1586_v47 = vpop.permute.xlu1 %1585  ;;  %v1569_v50 = vsel %vm851_vm3, %v3971_v52, %v1568_v6 }
 0x1c2   : > { %1677 = vst.msk [vmem:[#allocation3 + $0x28] sm:$0xff] %vm1671_vm9, %v1586_v47  ;;  %1805 = vrot.lane.b32.xlu0 %v1720_v21, %s3177_s9 }
 0x1c3   : > { %1837 = vrot.lane.b32.xlu1 %v1744_v54, %s3177_s9 }
 0x1c4   : > { %v1618_v57 = vpop.permute.xlu0 %1617 }
 0x1c5   : > { %1693 = vst.msk [vmem:[#allocation3 + $0xa8] sm:$0xff] %vm1671_vm9, %v1618_v57  ;;  %v1794_v58 = vpop.permute.xlu1 %1793  ;;  %v2351_v62 = vld [vmem:[#allocation3 + $0x18] sm:$0xff] }
 0x1c6   : > { %1886 = vst.msk [vmem:[#allocation3 + $0x20] sm:$0xff] %vm1881_vm10, %v1794_v58  ;;  %3058 = vmatmul.mubr.msk.f32.gmra.mxu0 %vm2424_vm13, %v2351_v62  ;;  %1807 = vrot.lane.b32.xlu0 %v4536_v19, %s3177_s9  ;;  %v4610_v19 = vld [vmem:[#allocation2 + $0xc0] sm:$0xff] }
 0x1c7   : > { %1839 = vrot.lane.b32.xlu1 %v4539_v55, %s3177_s9  ;;  %v4612_v55 = vld [vmem:[#allocation2 + $0x180] sm:$0xff]  ;;  %v1960_v57 = vrot.slane %v4610_v19, 1 }
 0x1c8   : > { %v1826_v4 = vpop.permute.xlu0 %1825  ;;  %v2367_v7 = vld [vmem:[#allocation3 + $0x98] sm:$0xff]  ;;  %v2000_v58 = vrot.slane %v4612_v55, 1  ;;  %v2209_v27 = vrot.slane %v4612_v55, 2 }
 0x1c9   : > { %1902 = vst.msk [vmem:[#allocation3 + $0xa0] sm:$0xff] %vm1881_vm10, %v1826_v4  ;;  %v1796_v9 = vpop.permute.xlu1 %1795  ;;  %3082 = vmatmul.mubr.msk.f32.gmra.mxu1 %vm2424_vm13, %v2367_v7  ;;  %v2001_v4 = vrot.slane %v4617_v35, 1 }
 0x1ca   : > { %1887 = vst.msk [vmem:[#allocation3 + $0x28] sm:$0xff] %vm1881_vm10, %v1796_v9  ;;  %2030 = vrot.lane.b32.xlu0 %v1957_v63, %s3178_s10  ;;  %v1361_v9 = vrot.slane %v3145_v8, 1  ;;  %v1751_v8 = vld [vmem:[#allocation2 + $0x1a0] sm:$0xff] }
 0x1cb   : > { %2062 = vrot.lane.b32.xlu1 %v1997_v28, %s3178_s10  ;;  %v1962_v28 = vsel %vm641_vm2, %v1960_v57, %v1961_v20  ;;  %v2002_v49 = vsel %vm641_vm2, %v2000_v58, %v2001_v4  ;;  %v1726_v58 = vld [vmem:[#allocation2 + $0xd8] sm:$0xff] }
 0x1cc   : > { %v1828_v11 = vpop.permute.xlu0 %1827 }
 0x1cd   : > { %1903 = vst.msk [vmem:[#allocation3 + $0xa8] sm:$0xff] %vm1881_vm10, %v1828_v11  ;;  %v2019_v13 = vpop.permute.xlu1 %2018 }
 0x1ce   : > { %2111 = vst.msk [vmem:[#allocation3 + $0x20] sm:$0xff] %vm2106_vm11, %v2019_v13  ;;  %1390 = vrot.lane.b32.xlu0 %v5033_v43, %s3175_s7  ;;  %v4641_v13 = vld [vmem:[#allocation2 + $0xd0] sm:$0x3] }
 0x1cf   : > { %1422 = vrot.lane.b32.xlu1 %v5034_v17, %s3175_s7  ;;  %v1963_v16 = vrot.slane %v4641_v13, 1 }
 0x1d0   : > { %v2051_v5 = vpop.permute.xlu0 %2050 }
 0x1d1   : > { %2127 = vst.msk [vmem:[#allocation3 + $0xa0] sm:$0xff] %vm2106_vm11, %v2051_v5  ;;  %v1411_v3 = vpop.permute.xlu1 %1410  ;;  %v5039_v5 = vld [vmem:[#allocation15_spill] sm:$0xff] }
 0x1d2   : > { %1485 = vst.msk [vmem:[#allocation3 + $0xb0] sm:$0xff] %vm1462_vm8, %v1411_v3  ;;  %2032 = vrot.lane.b32.xlu0 %v1959_v51, %s3178_s10  ;;  %v1363_v51 = vsel %vm641_vm2, %v1361_v9, %v1362_v61  ;;  %v1964_v3 = vsel %vm641_vm2, %v1961_v20, %v1963_v16  ;;  %v1965_v9 = vrot.slane %v1726_v58, 1 }
 0x1d3   : > { %2064 = vrot.lane.b32.xlu1 %v1999_v10, %s3178_s10  ;;  %v2169_v10 = vrot.slane %v4610_v19, 2 }
 0x1d4   : > { %v2021_v23 = vpop.permute.xlu0 %2020 }
 0x1d5   : > { %2112 = vst.msk [vmem:[#allocation3 + $0x28] sm:$0xff] %vm2106_vm11, %v2021_v23  ;;  %v2053_v12 = vpop.permute.xlu1 %2052  ;;  %v2004_v23 = vsel %vm641_vm2, %v2001_v4, %v2003_v22  ;;  %v2171_v37 = vsel %vm851_vm3, %v2169_v10, %v2170_v0  ;;  %v1750_v4 = vld [vmem:[#allocation2 + $0x198] sm:$0xff]  ;;  %v2174_v10 = vrot.slane %v1726_v58, 2 }
 0x1d6   : > { %2128 = vst.msk [vmem:[#allocation3 + $0xa8] sm:$0xff] %vm2106_vm11, %v2053_v12  ;;  %2239 = vrot.lane.b32.xlu0 %v2166_v34, %s3179_s23  ;;  %v2210_v34 = vrot.slane %v4617_v35, 2  ;;  %v1108_v12 = vld [vmem:[#allocation2 + $0x190] sm:$0x3] }
 0x1d7   : > { %2271 = vrot.lane.b32.xlu1 %v2206_v30, %s3179_s23  ;;  %v1084_v30 = vld [vmem:[#allocation2 + $0xd0] sm:$0x3] }
 0x1d8   : > { %v2228_v32 = vpop.permute.xlu0 %2227  ;;  %v2211_v59 = vsel %vm851_vm3, %v2209_v27, %v2210_v34  ;;  %v2214_v27 = vrot.slane %v1750_v4, 2 }
 0x1d9   : > { %2320 = vst.msk [vmem:[#allocation3 + $0x20] sm:$0xff] %vm2315_vm12, %v2228_v32  ;;  %v2260_v2 = vpop.permute.xlu1 %2259 }
 0x1da   : > { %2336 = vst.msk [vmem:[#allocation3 + $0xa0] sm:$0xff] %vm2315_vm12, %v2260_v2  ;;  %1392 = vrot.lane.b32.xlu0 %v1320_v26, %s3175_s7  ;;  %v1324_v26 = vrot.slane %v1084_v30, 1 }
 0x1db   : > { %1424 = vrot.lane.b32.xlu1 %v1360_v29, %s3175_s7  ;;  %v1364_v29 = vrot.slane %v1108_v12, 1 }
 0x1dc   : > { %v1413_v41 = vpop.permute.xlu0 %1412 }
 0x1dd   : > { %1486 = vst.msk [vmem:[#allocation3 + $0xb8] sm:$0xff] %vm1462_vm8, %v1413_v41  ;;  %v1588_v53 = vpop.permute.xlu1 %1587  ;;  %v1325_v41 = vsel %vm641_vm2, %v5040_v33, %v1324_v26 }
 0x1de   : > { %1678 = vst.msk [vmem:[#allocation3 + $0x30] sm:$0xff] %vm1671_vm9, %v1588_v53  ;;  %1599 = vrot.lane.b32.xlu0 %v5037_v38, %s3176_s8  ;;  %v1571_v53 = vrot.slane %v4637_v60, 2 }
 0x1df   : > { %1631 = vrot.lane.b32.xlu1 %v3983_v14, %s3176_s8  ;;  %v5038_v14 = vld [vmem:[#allocation33_spill] sm:$0xff] }
 0x1e0   : > { %v1620_v25 = vpop.permute.xlu0 %1619  ;;  %v2352_v18 = vld [vmem:[#allocation3 + $0x20] sm:$0xff]  ;;  %v1529_v24 = vsel %vm851_vm3, %v5038_v14, %v1528_v39  ;;  %v1572_v6 = vsel %vm851_vm3, %v1570_v42, %v1571_v53 }
 0x1e1   : > { %1694 = vst.msk [vmem:[#allocation3 + $0xb0] sm:$0xff] %vm1671_vm9, %v1620_v25  ;;  %v2230_v31 = vpop.permute.xlu1 %2229  ;;  %3060 = vmatprep.mubr.msk.f32.mxu0 %vm2424_vm13, %v2352_v18  ;;  %v2368_v46 = vld [vmem:[#allocation3 + $0xa0] sm:$0xff]  ;;  %v2172_v25 = vrot.slane %v4641_v13, 2  ;;  %v1728_v13 = vld [vmem:[#allocation2 + $0xe8] sm:$0x3] }
 0x1e2   : > { %2321 = vst.msk [vmem:[#allocation3 + $0x28] sm:$0xff] %vm2315_vm12, %v2230_v31  ;;  %3084 = vmatprep.mubr.msk.f32.mxu1 %vm2424_vm13, %v2368_v46  ;;  %2241 = vrot.lane.b32.xlu0 %v2168_v48, %s3179_s23  ;;  %v1365_v48 = vsel %vm641_vm2, %v1362_v61, %v1364_v29  ;;  %v2212_v31 = vrot.slane %v4644_v15, 2  ;;  %v2005_v61 = vrot.slane %v1750_v4, 1  ;;  %v1752_v15 = vld [vmem:[#allocation2 + $0x1a8] sm:$0x3] }
 0x1e3   : > { %2273 = vrot.lane.b32.xlu1 %v2208_v40, %s3179_s23 }
 0x1e4   : > { %v2262_v21 = vpop.permute.xlu0 %2261 }
 0x1e5   : > { %2337 = vst.msk [vmem:[#allocation3 + $0xa8] sm:$0xff] %vm2315_vm12, %v2262_v21  ;;  %v1590_v54 = vpop.permute.xlu1 %1589  ;;  %v2173_v21 = vsel %vm851_vm3, %v2170_v0, %v2172_v25 }
 0x1e6   : > { %1679 = vst.msk [vmem:[#allocation3 + $0x38] sm:$0xff] %vm1671_vm9, %v1590_v54  ;;  %1601 = vrot.lane.b32.xlu0 %v1529_v24, %s3176_s8  ;;  %v5041_v24 = vld [vmem:[#allocation36_spill] sm:$0xff] }
 0x1e7   : > { %1633 = vrot.lane.b32.xlu1 %v1569_v50, %s3176_s8  ;;  %v1533_v50 = vrot.slane %v1084_v30, 2 }
 0x1e8   : > { %v1622_v47 = vpop.permute.xlu0 %1621 }
 0x1e9   : > { %1695 = vst.msk [vmem:[#allocation3 + $0xb8] sm:$0xff] %vm1671_vm9, %v1622_v47  ;;  %v1798_v56 = vpop.permute.xlu1 %1797  ;;  %v2353_v52 = vld [vmem:[#allocation3 + $0x28] sm:$0xff]  ;;  %v1573_v47 = vrot.slane %v1108_v12, 2  ;;  %v2177_v12 = vrot.slane %v1728_v13, 2 }
 0x1ea   : > { %1888 = vst.msk [vmem:[#allocation3 + $0x30] sm:$0xff] %vm1881_vm10, %v1798_v56  ;;  %3061 = vmatmul.mubr.msk.f32.gmra.mxu0 %vm2424_vm13, %v2353_v52  ;;  %1809 = vrot.lane.b32.xlu0 %v4610_v19, %s3177_s9  ;;  %v2213_v19 = vsel %vm851_vm3, %v2210_v34, %v2212_v31  ;;  %v2215_v34 = vrot.slane %v1751_v8, 2 }
 0x1eb   : > { %1841 = vrot.lane.b32.xlu1 %v4612_v55, %s3177_s9 }
 0x1ec   : > { %v1830_v62 = vpop.permute.xlu0 %1829  ;;  %v2369_v63 = vld [vmem:[#allocation3 + $0xa8] sm:$0xff]  ;;  %v2216_v26 = vsel %vm851_vm3, %v2214_v27, %v2215_v34 }
 0x1ed   : > { %1904 = vst.msk [vmem:[#allocation3 + $0xb0] sm:$0xff] %vm1881_vm10, %v1830_v62  ;;  %v1800_v7 = vpop.permute.xlu1 %1799  ;;  %3085 = vmatmul.mubr.msk.f32.gmra.mxu1 %vm2424_vm13, %v2369_v63 }
 0x1ee   : > { %1889 = vst.msk [vmem:[#allocation3 + $0x38] sm:$0xff] %vm1881_vm10, %v1800_v7  ;;  %1811 = vrot.lane.b32.xlu0 %v4614_v45, %s3177_s9  ;;  %v5042_v45 = vld [vmem:[#allocation35_spill] sm:$0xff]  ;;  %v1727_v7 = vld [vmem:[#allocation2 + $0xe0] sm:$0xff] }
 0x1ef   : > { %1843 = vrot.lane.b32.xlu1 %v4617_v35, %s3177_s9  ;;  %v1534_v56 = vsel %vm851_vm3, %v5042_v45, %v1533_v50  ;;  %v1574_v35 = vsel %vm851_vm3, %v1571_v53, %v1573_v47  ;;  %v1966_v60 = vrot.slane %v1727_v7, 1  ;;  %v2175_v0 = vrot.slane %v1727_v7, 2 }
 0x1f0   : > { %v1832_v11 = vpop.permute.xlu0 %1831 }
 0x1f1   : > { %1905 = vst.msk [vmem:[#allocation3 + $0xb8] sm:$0xff] %vm1881_vm10, %v1832_v11  ;;  %v2023_v43 = vpop.permute.xlu1 %2022  ;;  %v1967_v16 = vsel %vm641_vm2, %v1965_v9, %v1966_v60  ;;  %v2178_v29 = vsel %vm851_vm3, %v2175_v0, %v2177_v12 }
 0x1f2   : > { %2113 = vst.msk [vmem:[#allocation3 + $0x30] sm:$0xff] %vm2106_vm11, %v2023_v43  ;;  %2034 = vrot.lane.b32.xlu0 %v1962_v28, %s3178_s10 }
 0x1f3   : > { %2066 = vrot.lane.b32.xlu1 %v2002_v49, %s3178_s10  ;;  %v2006_v49 = vrot.slane %v1751_v8, 1 }
 0x1f4   : > { %v2055_v17 = vpop.permute.xlu0 %2054 }
 0x1f5   : > { %2129 = vst.msk [vmem:[#allocation3 + $0xb0] sm:$0xff] %vm2106_vm11, %v2055_v17  ;;  %v1415_v36 = vpop.permute.xlu1 %1414  ;;  %v1968_v17 = vrot.slane %v1728_v13, 1  ;;  %v2007_v22 = vsel %vm641_vm2, %v2005_v61, %v2006_v49  ;;  %v4777_v13 = vld [vmem:[%s4932_s4] ss:$0 sm:$0xff] }
 0x1f6   : > { %1487 = vst.msk [vmem:[#allocation3 + $0xc0] sm:$0xff] %vm1462_vm8, %v1415_v36  ;;  %1394 = vrot.lane.b32.xlu0 %v5039_v5, %s3175_s7  ;;  %v2008_v36 = vrot.slane %v1752_v15, 1 }
 0x1f7   : > { %1426 = vrot.lane.b32.xlu1 %v1363_v51, %s3175_s7 }
 0x1f8   : > { %v2025_v1 = vpop.permute.xlu0 %2024 }
 0x1f9   : > { %2114 = vst.msk [vmem:[#allocation3 + $0x38] sm:$0xff] %vm2106_vm11, %v2025_v1  ;;  %v2057_v44 = vpop.permute.xlu1 %2056 }
 0x1fa   : > { %2130 = vst.msk [vmem:[#allocation3 + $0xb8] sm:$0xff] %vm2106_vm11, %v2057_v44  ;;  %2036 = vrot.lane.b32.xlu0 %v1964_v3, %s3178_s10  ;;  %v1969_v3 = vsel %vm641_vm2, %v1966_v60, %v1968_v17  ;;  %v2176_v44 = vsel %vm851_vm3, %v2174_v10, %v2175_v0 }
 0x1fb   : > { %2068 = vrot.lane.b32.xlu1 %v2004_v23, %s3178_s10  ;;  %v2009_v23 = vsel %vm641_vm2, %v2006_v49, %v2008_v36 }
 0x1fc   : > { %v2232_v32 = vpop.permute.xlu0 %2231 }
 0x1fd   : > { %2322 = vst.msk [vmem:[#allocation3 + $0x30] sm:$0xff] %vm2315_vm12, %v2232_v32  ;;  %v2264_v2 = vpop.permute.xlu1 %2263  ;;  %v2217_v32 = vrot.slane %v1752_v15, 2  ;;  %v2386_v15 = vld [vmem:[#allocation2 + $0x21] sm:$0xff] }
 0x1fe   : > { %2338 = vst.msk [vmem:[#allocation3 + $0xb0] sm:$0xff] %vm2315_vm12, %v2264_v2  ;;  %2243 = vrot.lane.b32.xlu0 %v2171_v37, %s3179_s23 }
 0x1ff   : > { %2275 = vrot.lane.b32.xlu1 %v2211_v59, %s3179_s23  ;;  %v2218_v33 = vsel %vm851_vm3, %v2215_v34, %v2217_v32 }
 0x200   : > { %v1417_v38 = vpop.permute.xlu0 %1416 }
 0x201   : > { %1488 = vst.msk [vmem:[#allocation3 + $0xc8] sm:$0xff] %vm1462_vm8, %v1417_v38  ;;  %v1592_v39 = vpop.permute.xlu1 %1591 }
 0x202   : > { %1680 = vst.msk [vmem:[#allocation3 + $0x40] sm:$0xff] %vm1671_vm9, %v1592_v39  ;;  %1396 = vrot.lane.b32.xlu0 %v1325_v41, %s3175_s7 }
 0x203   : > { %1428 = vrot.lane.b32.xlu1 %v1365_v48, %s3175_s7 }
 0x204   : > { %v1624_v18 = vpop.permute.xlu0 %1623  ;;  %v2354_v40 = vld [vmem:[#allocation3 + $0x30] sm:$0xff] }
 0x205   : > { %1696 = vst.msk [vmem:[#allocation3 + $0xc0] sm:$0xff] %vm1671_vm9, %v1624_v18  ;;  %v2234_v46 = vpop.permute.xlu1 %2233  ;;  %3063 = vmatprep.mubr.msk.f32.mxu0 %vm2424_vm13, %v2354_v40  ;;  %v2370_v14 = vld [vmem:[#allocation3 + $0xb0] sm:$0xff] }
 0x206   : > { %2323 = vst.msk [vmem:[#allocation3 + $0x38] sm:$0xff] %vm2315_vm12, %v2234_v46  ;;  %3087 = vmatprep.mubr.msk.f32.mxu1 %vm2424_vm13, %v2370_v14  ;;  %1603 = vrot.lane.b32.xlu0 %v5041_v24, %s3176_s8 }
 0x207   : > { %1635 = vrot.lane.b32.xlu1 %v1572_v6, %s3176_s8 }
 0x208   : > { %v2266_v54 = vpop.permute.xlu0 %2265 }
 0x209   : > { %2339 = vst.msk [vmem:[#allocation3 + $0xb8] sm:$0xff] %vm2315_vm12, %v2266_v54  ;;  %v1594_v55 = vpop.permute.xlu1 %1593 }
 0x20a   : > { %1681 = vst.msk [vmem:[#allocation3 + $0x48] sm:$0xff] %vm1671_vm9, %v1594_v55  ;;  %2245 = vrot.lane.b32.xlu0 %v2173_v21, %s3179_s23 }
 0x20b   : > { %2277 = vrot.lane.b32.xlu1 %v2213_v19, %s3179_s23 }
 0x20c   : > { %v1626_v52 = vpop.permute.xlu0 %1625 }
 0x20d   : > { %1697 = vst.msk [vmem:[#allocation3 + $0xc8] sm:$0xff] %vm1671_vm9, %v1626_v52  ;;  %v1802_v57 = vpop.permute.xlu1 %1801  ;;  %v2355_v20 = vld [vmem:[#allocation3 + $0x38] sm:$0xff] }
 0x20e   : > { %1890 = vst.msk [vmem:[#allocation3 + $0x40] sm:$0xff] %vm1881_vm10, %v1802_v57  ;;  %3064 = vmatmul.mubr.msk.f32.gmra.mxu0 %vm2424_vm13, %v2355_v20  ;;  %1605 = vrot.lane.b32.xlu0 %v1534_v56, %s3176_s8 }
 0x20f   : > { %1637 = vrot.lane.b32.xlu1 %v1574_v35, %s3176_s8 }
 0x210   : > { %v1834_v62 = vpop.permute.xlu0 %1833  ;;  %v2371_v63 = vld [vmem:[#allocation3 + $0xb8] sm:$0xff] }
 0x211   : > { %1906 = vst.msk [vmem:[#allocation3 + $0xc0] sm:$0xff] %vm1881_vm10, %v1834_v62  ;;  %v1804_v28 = vpop.permute.xlu1 %1803  ;;  %3088 = vmatmul.mubr.msk.f32.gmra.mxu1 %vm2424_vm13, %v2371_v63 }
 0x212   : > { %1891 = vst.msk [vmem:[#allocation3 + $0x48] sm:$0xff] %vm1881_vm10, %v1804_v28  ;;  %1813 = vrot.lane.b32.xlu0 %v1726_v58, %s3177_s9 }
 0x213   : > { %1845 = vrot.lane.b32.xlu1 %v1750_v4, %s3177_s9 }
 0x214   : > { %v1836_v11 = vpop.permute.xlu0 %1835 }
 0x215   : > { %1907 = vst.msk [vmem:[#allocation3 + $0xc8] sm:$0xff] %vm1881_vm10, %v1836_v11  ;;  %v2027_v43 = vpop.permute.xlu1 %2026 }
 0x216   : > { %2115 = vst.msk [vmem:[#allocation3 + $0x40] sm:$0xff] %vm2106_vm11, %v2027_v43  ;;  %1815 = vrot.lane.b32.xlu0 %v1727_v7, %s3177_s9 }
 0x217   : > { %1847 = vrot.lane.b32.xlu1 %v1751_v8, %s3177_s9  ;;  %s4786_s9 = scalar_lea.vmem %s4933_s5, %s3306_s22 }
 0x218   : > { %v2059_v51 = vpop.permute.xlu0 %2058 }
 0x219   : > { %2131 = vst.msk [vmem:[#allocation3 + $0xc0] sm:$0xff] %vm2106_vm11, %v2059_v51  ;;  %v1419_v5 = vpop.permute.xlu1 %1418  ;;  %v2385_v51 = vld [vmem:[#allocation2 + $0x19] sm:$0xff] }
 0x21a   : > { %1489 = vst.msk [vmem:[#allocation3 + $0xd0] sm:$0xff] %vm1462_vm8, %v1419_v5  ;;  %2038 = vrot.lane.b32.xlu0 %v1967_v16, %s3178_s10 }
 0x21b   : > { %2070 = vrot.lane.b32.xlu1 %v2007_v22, %s3178_s10 }
 0x21c   : > { %v2029_v1 = vpop.permute.xlu0 %2028 }
 0x21d   : > { %2116 = vst.msk [vmem:[#allocation3 + $0x48] sm:$0xff] %vm2106_vm11, %v2029_v1  ;;  %v2061_v30 = vpop.permute.xlu1 %2060 }
 0x21e   : > { %2132 = vst.msk [vmem:[#allocation3 + $0xc8] sm:$0xff] %vm2106_vm11, %v2061_v30  ;;  %2040 = vrot.lane.b32.xlu0 %v1969_v3, %s3178_s10  ;;  %v2402_v3 = vld [vmem:[#allocation2 + $0xe1] sm:$0xff] }
 0x21f   : > { %2072 = vrot.lane.b32.xlu1 %v2009_v23, %s3178_s10  ;;  %v2401_v23 = vld [vmem:[#allocation2 + $0xd9] sm:$0xff] }
 0x220   : > { %v2236_v37 = vpop.permute.xlu0 %2235 }
 0x221   : > { %2324 = vst.msk [vmem:[#allocation3 + $0x40] sm:$0xff] %vm2315_vm12, %v2236_v37  ;;  %v2268_v59 = vpop.permute.xlu1 %2267 }
 0x222   : > { %2340 = vst.msk [vmem:[#allocation3 + $0xc0] sm:$0xff] %vm2315_vm12, %v2268_v59  ;;  %2247 = vrot.lane.b32.xlu0 %v2176_v44, %s3179_s23 }
 0x223   : > { %2279 = vrot.lane.b32.xlu1 %v2216_v26, %s3179_s23 }
 0x224   : > { %v1389_v2 = vpop.permute.xlu0 %1388 }
 0x225   : > { %1474 = vst.msk [vmem:[#allocation3 + $0x58] sm:$0xff] %vm1462_vm8, %v1389_v2  ;;  %v1421_v41 = vpop.permute.xlu1 %1420 }
 0x226   : > { %1490 = vst.msk [vmem:[#allocation3 + $0xd8] sm:$0xff] %vm1462_vm8, %v1421_v41  ;;  %2249 = vrot.lane.b32.xlu0 %v2178_v29, %s3179_s23 }
 0x227   : > { %2281 = vrot.lane.b32.xlu1 %v2218_v33, %s3179_s23 }
 0x228   : > { %v1596_v42 = vpop.permute.xlu0 %1595  ;;  %v2356_v53 = vld [vmem:[#allocation3 + $0x40] sm:$0xff] }
 0x229   : > { %1682 = vst.msk [vmem:[#allocation3 + $0x50] sm:$0xff] %vm1671_vm9, %v1596_v42  ;;  %v1628_v38 = vpop.permute.xlu1 %1627  ;;  %3066 = vmatprep.mubr.msk.f32.mxu0 %vm2424_vm13, %v2356_v53  ;;  %v2372_v48 = vld [vmem:[#allocation3 + $0xc0] sm:$0xff] }
 0x22a   : > { %1698 = vst.msk [vmem:[#allocation3 + $0xd0] sm:$0xff] %vm1671_vm9, %v1628_v38  ;;  %3090 = vmatprep.mubr.msk.f32.mxu1 %vm2424_vm13, %v2372_v48 }
 0x22c   : > { %v2238_v39 = vpop.permute.xlu0 %2237 }
 0x22d   : > { %2325 = vst.msk [vmem:[#allocation3 + $0x48] sm:$0xff] %vm2315_vm12, %v2238_v39  ;;  %v2270_v25 = vpop.permute.xlu1 %2269 }
 0x22e   : > { %2341 = vst.msk [vmem:[#allocation3 + $0xc8] sm:$0xff] %vm2315_vm12, %v2270_v25 }
 0x230   : > { %v1598_v18 = vpop.permute.xlu0 %1597 }
 0x231   : > { %1683 = vst.msk [vmem:[#allocation3 + $0x58] sm:$0xff] %vm1671_vm9, %v1598_v18  ;;  %v1630_v40 = vpop.permute.xlu1 %1629 }
 0x232   : > { %1699 = vst.msk [vmem:[#allocation3 + $0xd8] sm:$0xff] %vm1671_vm9, %v1630_v40 }
 0x234   : > { %v1806_v6 = vpop.permute.xlu0 %1805  ;;  %v2357_v31 = vld [vmem:[#allocation3 + $0x48] sm:$0xff] }
 0x235   : > { %1892 = vst.msk [vmem:[#allocation3 + $0x50] sm:$0xff] %vm1881_vm10, %v1806_v6  ;;  %v1838_v46 = vpop.permute.xlu1 %1837  ;;  %3067 = vmatmul.mubr.msk.f32.gmra.mxu0 %vm2424_vm13, %v2357_v31  ;;  %v2373_v14 = vld [vmem:[#allocation3 + $0xc8] sm:$0xff] }
 0x236   : > { %1908 = vst.msk [vmem:[#allocation3 + $0xd0] sm:$0xff] %vm1881_vm10, %v1838_v46  ;;  %3091 = vmatmul.mubr.msk.f32.gmra.mxu1 %vm2424_vm13, %v2373_v14 }
 0x238   : > { %v1808_v24 = vpop.permute.xlu0 %1807 }
 0x239   : > { %1893 = vst.msk [vmem:[#allocation3 + $0x58] sm:$0xff] %vm1881_vm10, %v1808_v24  ;;  %v1840_v21 = vpop.permute.xlu1 %1839 }
 0x23a   : > { %1909 = vst.msk [vmem:[#allocation3 + $0xd8] sm:$0xff] %vm1881_vm10, %v1840_v21  ;;  %v2388_v21 = vld [vmem:[#allocation2 + $0x39] sm:$0xff] }
 0x23c   : > { %v2031_v50 = vpop.permute.xlu0 %2030 }
 0x23d   : > { %2117 = vst.msk [vmem:[#allocation3 + $0x50] sm:$0xff] %vm2106_vm11, %v2031_v50  ;;  %v2063_v54 = vpop.permute.xlu1 %2062 }
 0x23e   : > { %2133 = vst.msk [vmem:[#allocation3 + $0xd0] sm:$0xff] %vm2106_vm11, %v2063_v54 }
 0x240   : > { %v1391_v19 = vpop.permute.xlu0 %1390 }
 0x241   : > { %1475 = vst.msk [vmem:[#allocation3 + $0x60] sm:$0xff] %vm1462_vm8, %v1391_v19  ;;  %v1423_v47 = vpop.permute.xlu1 %1422  ;;  %v2387_v19 = vld [vmem:[#allocation2 + $0x31] sm:$0xff] }
 0x242   : > { %1491 = vst.msk [vmem:[#allocation3 + $0xe0] sm:$0xff] %vm1462_vm8, %v1423_v47 }
 0x244   : > { %v2033_v55 = vpop.permute.xlu0 %2032 }
 0x245   : > { %2118 = vst.msk [vmem:[#allocation3 + $0x58] sm:$0xff] %vm2106_vm11, %v2033_v55  ;;  %v2065_v45 = vpop.permute.xlu1 %2064 }
 0x246   : > { %2134 = vst.msk [vmem:[#allocation3 + $0xd8] sm:$0xff] %vm2106_vm11, %v2065_v45 }
 0x248   : > { %v2240_v56 = vpop.permute.xlu0 %2239 }
 0x249   : > { %2326 = vst.msk [vmem:[#allocation3 + $0x50] sm:$0xff] %vm2315_vm12, %v2240_v56  ;;  %v2272_v52 = vpop.permute.xlu1 %2271 }
 0x24a   : > { %2342 = vst.msk [vmem:[#allocation3 + $0xd0] sm:$0xff] %vm2315_vm12, %v2272_v52 }
 0x24c   : > { %v1393_v35 = vpop.permute.xlu0 %1392 }
 0x24d   : > { %1476 = vst.msk [vmem:[#allocation3 + $0x68] sm:$0xff] %vm1462_vm8, %v1393_v35  ;;  %v1425_v57 = vpop.permute.xlu1 %1424  ;;  %v2404_v35 = vld [vmem:[#allocation2 + $0xf9] sm:$0xff] }
 0x24e   : > { %1492 = vst.msk [vmem:[#allocation3 + $0xe8] sm:$0xff] %vm1462_vm8, %v1425_v57 }
 0x250   : > { %v1600_v20 = vpop.permute.xlu0 %1599  ;;  %v2358_v58 = vld [vmem:[#allocation3 + $0x50] sm:$0xff] }
 0x251   : > { %1684 = vst.msk [vmem:[#allocation3 + $0x60] sm:$0xff] %vm1671_vm9, %v1600_v20  ;;  %v1632_v62 = vpop.permute.xlu1 %1631  ;;  %3069 = vmatprep.mubr.msk.f32.mxu0 %vm2424_vm13, %v2358_v58  ;;  %v2374_v63 = vld [vmem:[#allocation3 + $0xd0] sm:$0xff] }
 0x252   : > { %1700 = vst.msk [vmem:[#allocation3 + $0xe0] sm:$0xff] %vm1671_vm9, %v1632_v62  ;;  %3093 = vmatprep.mubr.msk.f32.mxu1 %vm2424_vm13, %v2374_v63  ;;  %v2403_v62 = vld [vmem:[#allocation2 + $0xf1] sm:$0xff] }
 0x254   : > { %v2242_v4 = vpop.permute.xlu0 %2241 }
 0x255   : > { %2327 = vst.msk [vmem:[#allocation3 + $0x58] sm:$0xff] %vm2315_vm12, %v2242_v4  ;;  %v2274_v7 = vpop.permute.xlu1 %2273 }
 0x256   : > { %2343 = vst.msk [vmem:[#allocation3 + $0xd8] sm:$0xff] %vm2315_vm12, %v2274_v7 }
 0x258   : > { %v1602_v28 = vpop.permute.xlu0 %1601 }
 0x259   : > { %1685 = vst.msk [vmem:[#allocation3 + $0x68] sm:$0xff] %vm1671_vm9, %v1602_v28  ;;  %v1634_v8 = vpop.permute.xlu1 %1633 }
 0x25a   : > { %1701 = vst.msk [vmem:[#allocation3 + $0xe8] sm:$0xff] %vm1671_vm9, %v1634_v8 }
 0x25c   : > { %v1810_v9 = vpop.permute.xlu0 %1809  ;;  %v2359_v60 = vld [vmem:[#allocation3 + $0x58] sm:$0xff] }
 0x25d   : > { %1894 = vst.msk [vmem:[#allocation3 + $0x60] sm:$0xff] %vm1881_vm10, %v1810_v9  ;;  %v1842_v61 = vpop.permute.xlu1 %1841  ;;  %3070 = vmatmul.mubr.msk.f32.gmra.mxu0 %vm2424_vm13, %v2359_v60  ;;  %v2375_v11 = vld [vmem:[#allocation3 + $0xd8] sm:$0xff] }
 0x25e   : > { %1910 = vst.msk [vmem:[#allocation3 + $0xe0] sm:$0xff] %vm1881_vm10, %v1842_v61  ;;  %3094 = vmatmul.mubr.msk.f32.gmra.mxu1 %vm2424_vm13, %v2375_v11 }
 0x260   : > { %v1812_v49 = vpop.permute.xlu0 %1811 }
 0x261   : > { %1895 = vst.msk [vmem:[#allocation3 + $0x68] sm:$0xff] %vm1881_vm10, %v1812_v49  ;;  %v1844_v43 = vpop.permute.xlu1 %1843 }
 0x262   : > { %1911 = vst.msk [vmem:[#allocation3 + $0xe8] sm:$0xff] %vm1881_vm10, %v1844_v43  ;;  %v3056_v16 = vpop.f32.mrf.mxu0 }
 0x263   : > { %v2597_v17 = vadd.f32 %v3056_v16, %v4777_v13 }
 0x264   : > { %v2591_v22 = vpop.f32.mrf.mxu0  ;;  %v2035_v36 = vpop.permute.xlu0 %2034 }
 0x265   : > { %v2751_v5 = vadd.f32 %v2597_v17, %v2386_v15  ;;  %v2592_v10 = vadd.f32 %v4777_v13, %v2591_v22  ;;  %2119 = vst.msk [vmem:[#allocation3 + $0x60] sm:$0xff] %vm2106_vm11, %v2035_v36  ;;  %v2067_v0 = vpop.permute.xlu1 %2066  ;;  %v3080_v27 = vpop.f32.mrf.mxu1  ;;  %v2390_v36 = vld [vmem:[#allocation2 + $0x51] sm:$0xff] }
 0x266   : > { %2135 = vst.msk [vmem:[#allocation3 + $0xe0] sm:$0xff] %vm2106_vm11, %v2067_v0  ;;  %v2677_v34 = vadd.f32 %v3080_v27, %v4777_v13  ;;  %v2389_v0 = vld [vmem:[#allocation2 + $0x49] sm:$0xff] }
 0x267   : > { %2783 = vst.msk [vmem:[%s4786_s9 + $0x8] sm:$0xff] %vm463_vm1, %v2751_v5  ;;  %v2750_v1 = vadd.f32 %v2592_v10, %v2385_v51  ;;  %v2671_v30 = vpop.f32.mrf.mxu1 }
 0x268   : > { %v2767_v44 = vadd.f32 %v2677_v34, %v2402_v3  ;;  %v2672_v12 = vadd.f32 %v4777_v13, %v2671_v30  ;;  %v1395_v37 = vpop.permute.xlu0 %1394 }
 0x269   : > { %2782 = vst.msk [vmem:[%s4786_s9] sm:$0xff] %vm463_vm1, %v2750_v1  ;;  %v1427_v26 = vpop.permute.xlu1 %1426  ;;  %v2406_v1 = vld [vmem:[#allocation2 + $0x111] sm:$0xff] }
 0x26a   : > { %1477 = vst.msk [vmem:[#allocation3 + $0x70] sm:$0xff] %vm1462_vm8, %v1395_v37  ;;  %v2766_v32 = vadd.f32 %v2672_v12, %v2401_v23  ;;  %1493 = vst.msk [vmem:[#allocation3 + $0xf0] sm:$0xff] %vm1462_vm8, %v1427_v26  ;;  %v2405_v12 = vld [vmem:[#allocation2 + $0x109] sm:$0xff] }
 0x26b   : > { %2799 = vst.msk [vmem:[%s4786_s9 + $0x88] sm:$0xff] %vm463_vm1, %v2767_v44 }
 0x26c   : > { %2798 = vst.msk [vmem:[%s4786_s9 + $0x80] sm:$0xff] %vm463_vm1, %v2766_v32  ;;  %v2037_v59 = vpop.permute.xlu0 %2036 }
 0x26d   : > { %2120 = vst.msk [vmem:[#allocation3 + $0x68] sm:$0xff] %vm2106_vm11, %v2037_v59  ;;  %v2069_v29 = vpop.permute.xlu1 %2068 }
 0x26e   : > { %2136 = vst.msk [vmem:[#allocation3 + $0xe8] sm:$0xff] %vm2106_vm11, %v2069_v29  ;;  %v2392_v29 = vld [vmem:[#allocation2 + $0x69] sm:$0xff] }
 0x270   : > { %v2244_v2 = vpop.permute.xlu0 %2243 }
 0x271   : > { %2328 = vst.msk [vmem:[#allocation3 + $0x60] sm:$0xff] %vm2315_vm12, %v2244_v2  ;;  %v2276_v33 = vpop.permute.xlu1 %2275 }
 0x272   : > { %2344 = vst.msk [vmem:[#allocation3 + $0xe0] sm:$0xff] %vm2315_vm12, %v2276_v33 }
 0x274   : > { %v1397_v41 = vpop.permute.xlu0 %1396 }
 0x275   : > { %1478 = vst.msk [vmem:[#allocation3 + $0x78] sm:$0xff] %vm1462_vm8, %v1397_v41  ;;  %v1429_v42 = vpop.permute.xlu1 %1428  ;;  %v2391_v41 = vld [vmem:[#allocation2 + $0x61] sm:$0xff] }
 0x276   : > { %1494 = vst.msk [vmem:[#allocation3 + $0xf8] sm:$0xff] %vm1462_vm8, %v1429_v42 }
 0x278   : > { %v1604_v53 = vpop.permute.xlu0 %1603  ;;  %v2360_v38 = vld [vmem:[#allocation3 + $0x60] sm:$0xff] }
 0x279   : > { %1686 = vst.msk [vmem:[#allocation3 + $0x70] sm:$0xff] %vm1671_vm9, %v1604_v53  ;;  %v1636_v48 = vpop.permute.xlu1 %1635  ;;  %3072 = vmatprep.mubr.msk.f32.mxu0 %vm2424_vm13, %v2360_v38  ;;  %v2376_v39 = vld [vmem:[#allocation3 + $0xe0] sm:$0xff] }
 0x27a   : > { %1702 = vst.msk [vmem:[#allocation3 + $0xf0] sm:$0xff] %vm1671_vm9, %v1636_v48  ;;  %3096 = vmatprep.mubr.msk.f32.mxu1 %vm2424_vm13, %v2376_v39  ;;  %v2408_v48 = vld [vmem:[#allocation2 + $0x129] sm:$0xff] }
 0x27c   : > { %v2246_v25 = vpop.permute.xlu0 %2245 }
 0x27d   : > { %2329 = vst.msk [vmem:[#allocation3 + $0x68] sm:$0xff] %vm2315_vm12, %v2246_v25  ;;  %v2278_v18 = vpop.permute.xlu1 %2277 }
 0x27e   : > { %2345 = vst.msk [vmem:[#allocation3 + $0xe8] sm:$0xff] %vm2315_vm12, %v2278_v18 }
 0x280   : > { %v1606_v40 = vpop.permute.xlu0 %1605 }
 0x281   : > { %1687 = vst.msk [vmem:[#allocation3 + $0x78] sm:$0xff] %vm1671_vm9, %v1606_v40  ;;  %v1638_v6 = vpop.permute.xlu1 %1637  ;;  %v2407_v40 = vld [vmem:[#allocation2 + $0x121] sm:$0xff] }
 0x282   : > { %1703 = vst.msk [vmem:[#allocation3 + $0xf8] sm:$0xff] %vm1671_vm9, %v1638_v6 }
 0x284   : > { %v1814_v31 = vpop.permute.xlu0 %1813  ;;  %v2361_v46 = vld [vmem:[#allocation3 + $0x68] sm:$0xff] }
 0x285   : > { %1896 = vst.msk [vmem:[#allocation3 + $0x70] sm:$0xff] %vm1881_vm10, %v1814_v31  ;;  %v1846_v14 = vpop.permute.xlu1 %1845  ;;  %3073 = vmatmul.mubr.msk.f32.gmra.mxu0 %vm2424_vm13, %v2361_v46  ;;  %v2377_v24 = vld [vmem:[#allocation3 + $0xe8] sm:$0xff] }
 0x286   : > { %1912 = vst.msk [vmem:[#allocation3 + $0xf0] sm:$0xff] %vm1881_vm10, %v1846_v14  ;;  %v3059_v50 = vpop.f32.mrf.mxu0  ;;  %3097 = vmatmul.mubr.msk.f32.gmra.mxu1 %vm2424_vm13, %v2377_v24  ;;  %v2394_v24 = vld [vmem:[#allocation2 + $0x81] sm:$0xff] }
 0x287   : > { %v2607_v54 = vadd.f32 %v3059_v50, %v4777_v13 }
 0x288   : > { %v2601_v47 = vpop.f32.mrf.mxu0  ;;  %v1816_v55 = vpop.permute.xlu0 %1815 }
 0x289   : > { %v2753_v45 = vadd.f32 %v2607_v54, %v2388_v21  ;;  %v2602_v56 = vadd.f32 %v4777_v13, %v2601_v47  ;;  %1897 = vst.msk [vmem:[#allocation3 + $0x78] sm:$0xff] %vm1881_vm10, %v1816_v55  ;;  %v1848_v52 = vpop.permute.xlu1 %1847  ;;  %v3083_v57 = vpop.f32.mrf.mxu1  ;;  %v2410_v54 = vld [vmem:[#allocation2 + $0x141] sm:$0xff]  ;;  %v2393_v55 = vld [vmem:[#allocation2 + $0x79] sm:$0xff] }
 0x28a   : > { %1913 = vst.msk [vmem:[#allocation3 + $0xf8] sm:$0xff] %vm1881_vm10, %v1848_v52  ;;  %v2687_v20 = vadd.f32 %v3083_v57, %v4777_v13 }
 0x28b   : > { %2785 = vst.msk [vmem:[%s4786_s9 + $0x18] sm:$0xff] %vm463_vm1, %v2753_v45  ;;  %v2752_v58 = vadd.f32 %v2602_v56, %v2387_v19  ;;  %v2681_v63 = vpop.f32.mrf.mxu1 }
 0x28c   : > { %v2769_v4 = vadd.f32 %v2687_v20, %v2404_v35  ;;  %v2682_v7 = vadd.f32 %v4777_v13, %v2681_v63  ;;  %v2039_v28 = vpop.permute.xlu0 %2038  ;;  %v2409_v35 = vld [vmem:[#allocation2 + $0x139] sm:$0xff] }
 0x28d   : > { %2784 = vst.msk [vmem:[%s4786_s9 + $0x10] sm:$0xff] %vm463_vm1, %v2752_v58  ;;  %v2071_v8 = vpop.permute.xlu1 %2070 }
 0x28e   : > { %2121 = vst.msk [vmem:[#allocation3 + $0x70] sm:$0xff] %vm2106_vm11, %v2039_v28  ;;  %v2768_v9 = vadd.f32 %v2682_v7, %v2403_v62  ;;  %2137 = vst.msk [vmem:[#allocation3 + $0xf0] sm:$0xff] %vm2106_vm11, %v2071_v8  ;;  %v2412_v8 = vld [vmem:[#allocation2 + $0x159] sm:$0xff] }
 0x28f   : > { %2801 = vst.msk [vmem:[%s4786_s9 + $0x98] sm:$0xff] %vm463_vm1, %v2769_v4  ;;  %v2396_v4 = vld [vmem:[#allocation2 + $0x99] sm:$0xff] }
 0x290   : > { %2800 = vst.msk [vmem:[%s4786_s9 + $0x90] sm:$0xff] %vm463_vm1, %v2768_v9  ;;  %v2041_v60 = vpop.permute.xlu0 %2040 }
 0x291   : > { %2122 = vst.msk [vmem:[#allocation3 + $0x78] sm:$0xff] %vm2106_vm11, %v2041_v60  ;;  %v2073_v61 = vpop.permute.xlu1 %2072 }
 0x292   : > { %2138 = vst.msk [vmem:[#allocation3 + $0xf8] sm:$0xff] %vm2106_vm11, %v2073_v61  ;;  %v2395_v61 = vld [vmem:[#allocation2 + $0x91] sm:$0xff] }
 0x294   : > { %v2248_v11 = vpop.permute.xlu0 %2247 }
 0x295   : > { %2330 = vst.msk [vmem:[#allocation3 + $0x70] sm:$0xff] %vm2315_vm12, %v2248_v11  ;;  %v2280_v49 = vpop.permute.xlu1 %2279 }
 0x296   : > { %2346 = vst.msk [vmem:[#allocation3 + $0xf0] sm:$0xff] %vm2315_vm12, %v2280_v49 }
 0x298   : > { %v2250_v43 = vpop.permute.xlu0 %2249 }
 0x299   : > { %2331 = vst.msk [vmem:[#allocation3 + $0x78] sm:$0xff] %vm2315_vm12, %v2250_v43  ;;  %v2282_v15 = vpop.permute.xlu1 %2281 }
 0x29a   : > { %2347 = vst.msk [vmem:[#allocation3 + $0xf8] sm:$0xff] %vm2315_vm12, %v2282_v15  ;;  %v2411_v15 = vld [vmem:[#allocation2 + $0x151] sm:$0xff] }
 0x29c   : > { %v2362_v16 = vld [vmem:[#allocation3 + $0x70] sm:$0xff] }
 0x29d   : > { %3075 = vmatprep.mubr.msk.f32.mxu0 %vm2424_vm13, %v2362_v16  ;;  %v2378_v17 = vld [vmem:[#allocation3 + $0xf0] sm:$0xff] }
 0x29e   : > { %3099 = vmatprep.mubr.msk.f32.mxu1 %vm2424_vm13, %v2378_v17 }
 0x2a0   : > { %v2363_v51 = vld [vmem:[#allocation3 + $0x78] sm:$0xff] }
 0x2a1   : > { %3076 = vmatmul.mubr.msk.f32.gmra.mxu0 %vm2424_vm13, %v2363_v51  ;;  %v2379_v22 = vld [vmem:[#allocation3 + $0xf8] sm:$0xff] }
 0x2a2   : > { %3100 = vmatmul.mubr.msk.f32.gmra.mxu1 %vm2424_vm13, %v2379_v22 }
 0x2aa   : > { %v3062_v5 = vpop.f32.mrf.mxu0 }
 0x2ab   : > { %v2617_v10 = vadd.f32 %v3062_v5, %v4777_v13  ;;  %v2398_v5 = vld [vmem:[#allocation2 + $0xb1] sm:$0xff] }
 0x2ac   : > { %v2611_v3 = vpop.f32.mrf.mxu0 }
 0x2ad   : > { %v2755_v27 = vadd.f32 %v2617_v10, %v2390_v36  ;;  %v2612_v34 = vadd.f32 %v4777_v13, %v2611_v3  ;;  %v3086_v23 = vpop.f32.mrf.mxu1  ;;  %v2414_v3 = vld [vmem:[#allocation2 + $0x171] sm:$0xff] }
 0x2ae   : > { %v2697_v30 = vadd.f32 %v3086_v23, %v4777_v13 }
 0x2af   : > { %2787 = vst.msk [vmem:[%s4786_s9 + $0x28] sm:$0xff] %vm463_vm1, %v2755_v27  ;;  %v2754_v44 = vadd.f32 %v2612_v34, %v2389_v0  ;;  %v2691_v37 = vpop.f32.mrf.mxu1 }
 0x2b0   : > { %v2771_v26 = vadd.f32 %v2697_v30, %v2406_v1  ;;  %v2692_v32 = vadd.f32 %v4777_v13, %v2691_v37  ;;  %v2397_v1 = vld [vmem:[#allocation2 + $0xa9] sm:$0xff] }
 0x2b1   : > { %2786 = vst.msk [vmem:[%s4786_s9 + $0x20] sm:$0xff] %vm463_vm1, %v2754_v44 }
 0x2b2   : > { %2803 = vst.msk [vmem:[%s4786_s9 + $0xa8] sm:$0xff] %vm463_vm1, %v2771_v26  ;;  %v2770_v59 = vadd.f32 %v2692_v32, %v2405_v12  ;;  %v2413_v12 = vld [vmem:[#allocation2 + $0x169] sm:$0xff] }
 0x2b4   : > { %2802 = vst.msk [vmem:[%s4786_s9 + $0xa0] sm:$0xff] %vm463_vm1, %v2770_v59 }
 0x2ce   : > { %v3065_v2 = vpop.f32.mrf.mxu0 }
 0x2cf   : > { %v2627_v33 = vadd.f32 %v3065_v2, %v4777_v13  ;;  %v2400_v2 = vld [vmem:[#allocation2 + $0xc9] sm:$0xff] }
 0x2d0   : > { %v2621_v42 = vpop.f32.mrf.mxu0 }
 0x2d1   : > { %v2757_v53 = vadd.f32 %v2627_v33, %v2392_v29  ;;  %v2622_v38 = vadd.f32 %v4777_v13, %v2621_v42  ;;  %v3089_v39 = vpop.f32.mrf.mxu1  ;;  %v2416_v42 = vld [vmem:[#allocation2 + $0x189] sm:$0xff] }
 0x2d2   : > { %v2707_v25 = vadd.f32 %v3089_v39, %v4777_v13 }
 0x2d3   : > { %2789 = vst.msk [vmem:[%s4786_s9 + $0x38] sm:$0xff] %vm463_vm1, %v2757_v53  ;;  %v2756_v18 = vadd.f32 %v2622_v38, %v2391_v41  ;;  %v2701_v6 = vpop.f32.mrf.mxu1 }
 0x2d4   : > { %v2773_v31 = vadd.f32 %v2707_v25, %v2408_v48  ;;  %v2702_v46 = vadd.f32 %v4777_v13, %v2701_v6  ;;  %v2399_v48 = vld [vmem:[#allocation2 + $0xc1] sm:$0xff] }
 0x2d5   : > { %2788 = vst.msk [vmem:[%s4786_s9 + $0x30] sm:$0xff] %vm463_vm1, %v2756_v18 }
 0x2d6   : > { %2805 = vst.msk [vmem:[%s4786_s9 + $0xb8] sm:$0xff] %vm463_vm1, %v2773_v31  ;;  %v2772_v14 = vadd.f32 %v2702_v46, %v2407_v40  ;;  %v2415_v40 = vld [vmem:[#allocation2 + $0x181] sm:$0xff] }
 0x2d8   : > { %2804 = vst.msk [vmem:[%s4786_s9 + $0xb0] sm:$0xff] %vm463_vm1, %v2772_v14 }
 0x2f5   : > { %v3068_v21 = vpop.f32.mrf.mxu0 }
 0x2f6   : > { %v2637_v50 = vadd.f32 %v3068_v21, %v4777_v13  ;;  %v3092_v19 = vpop.f32.mrf.mxu1 }
 0x2f7   : > { %v2717_v47 = vadd.f32 %v3092_v19, %v4777_v13  ;;  %v2631_v45 = vpop.f32.mrf.mxu0 }
 0x2f8   : > { %v2759_v56 = vadd.f32 %v2637_v50, %v2394_v24  ;;  %v2632_v52 = vadd.f32 %v4777_v13, %v2631_v45  ;;  %v2711_v57 = vpop.f32.mrf.mxu1 }
 0x2f9   : > { %v2775_v20 = vadd.f32 %v2717_v47, %v2410_v54  ;;  %v2712_v58 = vadd.f32 %v4777_v13, %v2711_v57 }
 0x2fa   : > { %2791 = vst.msk [vmem:[%s4786_s9 + $0x48] sm:$0xff] %vm463_vm1, %v2759_v56  ;;  %v2758_v62 = vadd.f32 %v2632_v52, %v2393_v55 }
 0x2fb   : > { %2807 = vst.msk [vmem:[%s4786_s9 + $0xc8] sm:$0xff] %vm463_vm1, %v2775_v20  ;;  %v2774_v63 = vadd.f32 %v2712_v58, %v2409_v35 }
 0x2fc   : > { %2790 = vst.msk [vmem:[%s4786_s9 + $0x40] sm:$0xff] %vm463_vm1, %v2758_v62 }
 0x2fd   : > { %2806 = vst.msk [vmem:[%s4786_s9 + $0xc0] sm:$0xff] %vm463_vm1, %v2774_v63 }
 0x31d   : > { %v3071_v7 = vpop.f32.mrf.mxu0 }
 0x31e   : > { %v2647_v28 = vadd.f32 %v3071_v7, %v4777_v13  ;;  %v3095_v9 = vpop.f32.mrf.mxu1 }
 0x31f   : > { %v2727_v60 = vadd.f32 %v3095_v9, %v4777_v13  ;;  %v2641_v11 = vpop.f32.mrf.mxu0 }
 0x320   : > { %v2761_v49 = vadd.f32 %v2647_v28, %v2396_v4  ;;  %v2642_v43 = vadd.f32 %v4777_v13, %v2641_v11  ;;  %v2721_v16 = vpop.f32.mrf.mxu1 }
 0x321   : > { %v2777_v17 = vadd.f32 %v2727_v60, %v2412_v8  ;;  %v2722_v51 = vadd.f32 %v4777_v13, %v2721_v16 }
 0x322   : > { %2793 = vst.msk [vmem:[%s4786_s9 + $0x58] sm:$0xff] %vm463_vm1, %v2761_v49  ;;  %v2760_v22 = vadd.f32 %v2642_v43, %v2395_v61 }
 0x323   : > { %2809 = vst.msk [vmem:[%s4786_s9 + $0xd8] sm:$0xff] %vm463_vm1, %v2777_v17  ;;  %v2776_v36 = vadd.f32 %v2722_v51, %v2411_v15 }
 0x324   : > { %2792 = vst.msk [vmem:[%s4786_s9 + $0x50] sm:$0xff] %vm463_vm1, %v2760_v22 }
 0x325   : > { %2808 = vst.msk [vmem:[%s4786_s9 + $0xd0] sm:$0xff] %vm463_vm1, %v2776_v36 }
 0x345   : > { %v3074_v10 = vpop.f32.mrf.mxu0 }
 0x346   : > { %v2657_v0 = vadd.f32 %v3074_v10, %v4777_v13  ;;  %v3098_v27 = vpop.f32.mrf.mxu1 }
 0x347   : > { %v2737_v34 = vadd.f32 %v3098_v27, %v4777_v13  ;;  %v2651_v23 = vpop.f32.mrf.mxu0 }
 0x348   : > { %v2763_v30 = vadd.f32 %v2657_v0, %v2398_v5  ;;  %v2652_v44 = vadd.f32 %v4777_v13, %v2651_v23  ;;  %v2731_v37 = vpop.f32.mrf.mxu1 }
 0x349   : > { %v2779_v26 = vadd.f32 %v2737_v34, %v2414_v3  ;;  %v2732_v32 = vadd.f32 %v4777_v13, %v2731_v37 }
 0x34a   : > { %2795 = vst.msk [vmem:[%s4786_s9 + $0x68] sm:$0xff] %vm463_vm1, %v2763_v30  ;;  %v2762_v59 = vadd.f32 %v2652_v44, %v2397_v1 }
 0x34b   : > { %2811 = vst.msk [vmem:[%s4786_s9 + $0xe8] sm:$0xff] %vm463_vm1, %v2779_v26  ;;  %v2778_v29 = vadd.f32 %v2732_v32, %v2413_v12 }
 0x34c   : > { %2794 = vst.msk [vmem:[%s4786_s9 + $0x60] sm:$0xff] %vm463_vm1, %v2762_v59 }
 0x34d   : > { %2810 = vst.msk [vmem:[%s4786_s9 + $0xe0] sm:$0xff] %vm463_vm1, %v2778_v29 }
 0x361   : > { %v3077_v33 = vpop.f32.mrf.mxu0 }
 0x362   : > { %v2667_v41 = vadd.f32 %v3077_v33, %v4777_v13  ;;  %v3101_v53 = vpop.f32.mrf.mxu1 }
 0x363   : > { %v2747_v38 = vadd.f32 %v3101_v53, %v4777_v13  ;;  %v2661_v39 = vpop.f32.mrf.mxu0 }
 0x364   : > { %v2765_v25 = vadd.f32 %v2667_v41, %v2400_v2  ;;  %v2662_v18 = vadd.f32 %v4777_v13, %v2661_v39  ;;  %v2741_v6 = vpop.f32.mrf.mxu1 }
 0x365   : > { %v2781_v31 = vadd.f32 %v2747_v38, %v2416_v42  ;;  %v2742_v46 = vadd.f32 %v4777_v13, %v2741_v6 }
 0x366   : > { %2797 = vst.msk [vmem:[%s4786_s9 + $0x78] sm:$0xff] %vm463_vm1, %v2765_v25  ;;  %v2764_v14 = vadd.f32 %v2662_v18, %v2399_v48 }
 0x367   : > { %2813 = vst.msk [vmem:[%s4786_s9 + $0xf8] sm:$0xff] %vm463_vm1, %v2781_v31  ;;  %v2780_v24 = vadd.f32 %v2742_v46, %v2415_v40 }
 0x368   : > { %2796 = vst.msk [vmem:[%s4786_s9 + $0x70] sm:$0xff] %vm463_vm1, %v2764_v14 }
 0x369   : > { %2812 = vst.msk [vmem:[%s4786_s9 + $0xf0] sm:$0xff] %vm463_vm1, %v2780_v24 }
 0x36a PF: > { %s15_s20 = sadd.s32 1, %s3169_s20   ;;  %s5043_s18 = smov %s3165_s19 }
 0x36b   : > { %p12_p5 = scmp.ge.s32.totalorder %s15_s20, 4   ;;  %s5044_s19 = smov %s5046_s21 }
 0x36d   :  { %14 = sbr.rel (!%p12_p5) target bundleno = 2 (0x2), region = 83 }

</bundles_post_ra>
